<compile_context>
chip_gen: v7x
topology: tpu7x:2x2x1
jax: 0.10.0
libtpu: 0.0.40
codegen_flags: <defaults>
</compile_context>

<pallas_src>
import functools

import jax
import jax.numpy as jnp
import numpy as np
from jax.experimental import pallas as pl
from jax.experimental.pallas import tpu as pltpu


def convlstm_kernel(xcol_ref, w_ref, b_ref, out_ref, col_ref, c_ref,
                    *, H, W, Cin, Ch, K):
    """One grid step == one ConvLSTM timestep for one batch element."""
    t = pl.program_id(1)
    pad = K // 2
    HW = H * W
    KKH = K * K * Ch          # hidden-tap columns of the combined LHS
    KKC = K * K * Cin         # input im2col columns of the combined LHS

    # t == 0: reset carried state.  Zeroing col_ref encodes h_0 == 0 and also
    # keeps the lane-padding columns zero for the whole sequence.
    @pl.when(t == 0)
    def _init():
        col_ref[...] = jnp.zeros_like(col_ref)
        c_ref[...] = jnp.zeros_like(c_ref)

    # Drop this step's x patches into their column slot of the combined LHS.
    col_ref[:, KKH:KKH + KKC] = xcol_ref[...]

    # Single deep matmul for the whole gate conv (input + hidden parts).
    # Bias added once; everything below stays in local values.
    conv = jnp.dot(col_ref[...], w_ref[...],
                   preferred_element_type=jnp.float32) + b_ref[...]

    sig = jax.nn.sigmoid(conv[:, :3 * Ch])        # i | f | o on one contiguous slice
    i = sig[:, 0 * Ch:1 * Ch]
    f = sig[:, 1 * Ch:2 * Ch]
    o = sig[:, 2 * Ch:3 * Ch]
    g = jnp.tanh(conv[:, 3 * Ch:4 * Ch])

    c_new = f * c_ref[...] + i * g
    h_new = o * jnp.tanh(c_new)
    c_ref[...] = c_new

    # Emit the final hidden state on the last timestep only.
    @pl.when(t == pl.num_programs(1) - 1)
    def _emit():
        out_ref[...] = h_new

    # Scatter h_new into the K*K shifted tap blocks so next step's LHS is
    # already formed.  Target rows whose source row (y+sy) is out of the frame
    # are never written (stay zero from init); the x-direction boundary is
    # zeroed with a per-row mask.
    @pl.when(t < pl.num_programs(1) - 1)
    def _scatter():
        ridx = jax.lax.broadcasted_iota(jnp.int32, (HW, 1), 0)
        xpos = ridx % W
        for ky in range(K):
            for kx in range(K):
                j = ky * K + kx
                sy = ky - pad
                sx = kx - pad
                s = sy * W + sx            # flat source shift
                r0 = max(0, -s)            # valid target row range [r0, r1)
                r1 = min(HW, HW - s)
                src = h_new[r0 + s:r1 + s, :]
                if sx < 0:
                    src = jnp.where(xpos[r0:r1] >= -sx, src, 0.0)
                elif sx > 0:
                    src = jnp.where(xpos[r0:r1] < (W - sx), src, 0.0)
                col_ref[r0:r1, j * Ch:(j + 1) * Ch] = src


def convlstm_forward(x_seq, w_full, bias, hidden_channels):
    """x_seq: (B, T, Cin, H, W) f32; w_full: (K, K, Cin+Ch, 4*Ch) HWIO;
    bias: (4*Ch,).  Returns final h of shape (B, Ch, H, W) (PyTorch NCHW)."""
    B, T, Cin, H, W = x_seq.shape
    Ch = hidden_channels
    K = w_full.shape[0]
    pad = K // 2
    HW = H * W
    C4 = 4 * Ch
    KKC = K * K * Cin
    KKH = K * K * Ch
    Ktot = ((KKH + KKC + 127) // 128) * 128     # lane-pad the contraction depth

    # ---- glue: layout prep (no FLOPs) ----
    # NCHW -> NHWC per frame, zero spatial padding, im2col of x only:
    # columns ordered (ky, kx, c) to match the weight row layout below.
    x = jnp.transpose(x_seq, (0, 1, 3, 4, 2)).astype(jnp.float32)   # (B,T,H,W,Cin)
    x_pad = jnp.pad(x, ((0, 0), (0, 0), (pad, pad), (pad, pad), (0, 0)))
    patches = [x_pad[:, :, ky:ky + H, kx:kx + W, :]
               for ky in range(K) for kx in range(K)]
    x_col = jnp.concatenate(patches, axis=-1).reshape(B, T, HW, KKC)

    # Combined gate weight: rows [0,KKH) = hidden taps ((ky,kx,c) order,
    # matching the tap column blocks), rows [KKH, KKH+KKC) = x im2col rows,
    # remaining rows zero (they multiply the zero pad columns).
    wx = w_full[:, :, :Cin, :].reshape(KKC, C4)
    wh = w_full[:, :, Cin:, :].reshape(KKH, C4)
    w_comb = jnp.zeros((Ktot, C4), jnp.float32)
    w_comb = w_comb.at[:KKH, :].set(wh)
    w_comb = w_comb.at[KKH:KKH + KKC, :].set(wx)
    b2 = bias.reshape(1, C4).astype(jnp.float32)

    kernel = functools.partial(convlstm_kernel,
                               H=H, W=W, Cin=Cin, Ch=Ch, K=K)

    out = pl.pallas_call(
        kernel,
        out_shape=jax.ShapeDtypeStruct((B, HW, Ch), jnp.float32),
        grid_spec=pltpu.PrefetchScalarGridSpec(
            num_scalar_prefetch=0,
            grid=(B, T),
            in_specs=[
                # per-(b,t) x patches, leading dims squeezed away
                pl.BlockSpec((None, None, HW, KKC), lambda b, t: (b, t, 0, 0)),
                pl.BlockSpec((Ktot, C4), lambda b, t: (0, 0)),
                pl.BlockSpec((1, C4), lambda b, t: (0, 0)),
            ],
            out_specs=pl.BlockSpec((None, HW, Ch), lambda b, t: (b, 0, 0)),
            scratch_shapes=[
                pltpu.VMEM((HW, Ktot), jnp.float32),   # combined im2col LHS
                pltpu.VMEM((HW, Ch), jnp.float32),     # cell state c
            ]),
        compiler_params=pltpu.CompilerParams(
            dimension_semantics=("parallel", "arbitrary")),
    )(x_col, w_comb, b2)

    # (B, H*W, Ch) -> (B, Ch, H, W) to match the PyTorch output convention.
    return jnp.transpose(out.reshape(B, H, W, Ch), (0, 3, 1, 2))


def convlstm_reference(x_seq, w_full, bias, hidden_channels):
    """Pure-JAX reference matching the PyTorch module semantics."""
    B, T, Cin, H, W = x_seq.shape
    Ch = hidden_channels
    x = jnp.transpose(x_seq, (0, 1, 3, 4, 2))                 # (B,T,H,W,Cin)
    h = jnp.zeros((B, H, W, Ch), jnp.float32)
    c = jnp.zeros((B, H, W, Ch), jnp.float32)
    for t in range(T):
        combined = jnp.concatenate([x[:, t], h], axis=-1)
        conv = jax.lax.conv_general_dilated(
            combined, w_full, (1, 1), 'SAME',
            dimension_numbers=('NHWC', 'HWIO', 'NHWC'),
            precision=jax.lax.Precision.HIGHEST) + bias.reshape(1, 1, 1, -1)
        i = jax.nn.sigmoid(conv[..., 0 * Ch:1 * Ch])
        f = jax.nn.sigmoid(conv[..., 1 * Ch:2 * Ch])
        o = jax.nn.sigmoid(conv[..., 2 * Ch:3 * Ch])
        g = jnp.tanh(conv[..., 3 * Ch:4 * Ch])
        c = f * c + i * g
        h = o * jnp.tanh(c)
    return jnp.transpose(h, (0, 3, 1, 2))                     # (B,Ch,H,W)


if __name__ == "__main__":
    B, T, Cin, H, W = 2, 8, 4, 16, 16
    Ch, K = 32, 3

    key = jax.random.PRNGKey(0)
    k_w, k_b, k_x = jax.random.split(key, 3)

    # Deterministic params (mimic PyTorch Conv2d default U(-1/sqrt(fan_in), ...)).
    fan_in = (Cin + Ch) * K * K
    bound = 1.0 / np.sqrt(fan_in)
    w_full = jax.random.uniform(k_w, (K, K, Cin + Ch, 4 * Ch),
                                jnp.float32, -bound, bound)   # HWIO
    bias = jax.random.uniform(k_b, (4 * Ch,), jnp.float32, -bound, bound)

    x_seq = jax.random.normal(k_x, (B, T, Cin, H, W), jnp.float32)

    out = jax.block_until_ready(convlstm_forward(x_seq, w_full, bias, Ch))
    ref = jax.block_until_ready(convlstm_reference(x_seq, w_full, bias, Ch))

    np.testing.assert_allclose(np.asarray(out), np.asarray(ref),
                               atol=2e-2, rtol=2e-2)
    assert out.shape == (B, Ch, H, W)

    print("KERNEL_OK")
</pallas_src>

<mosaic_0001>
module attributes {stable_mosaic.version = 11 : i64} {
  func.func @convlstm_kernel(%arg0: i32, %arg1: i32, %arg2: memref<1x1x256x36xf32, #tpu.memory_space<vmem>>, %arg3: memref<384x128xf32, #tpu.memory_space<vmem>>, %arg4: memref<1x128xf32, #tpu.memory_space<vmem>>, %arg5: memref<1x256x32xf32, #tpu.memory_space<vmem>>, %arg6: memref<256x384xf32, #tpu.memory_space<vmem>>, %arg7: memref<256x32xf32, #tpu.memory_space<vmem>>) attributes {dimension_semantics = [#tpu.dimension_semantics<parallel>, #tpu.dimension_semantics<arbitrary>], iteration_bounds = array<i64: 2, 8>, scalar_prefetch = 0 : i64, scratch_operands = 2 : i64, tpu.core_type = #tpu.core_type<tc>, window_params = [{transform_indices = @transform_0, window_bounds = array<i64: 1, 1, 256, 36>}, {pipeline_mode = #tpu.pipeline_mode<synchronous>, transform_indices = @transform_1, window_bounds = array<i64: 384, 128>}, {pipeline_mode = #tpu.pipeline_mode<synchronous>, transform_indices = @transform_2, window_bounds = array<i64: 1, 128>}, {transform_indices = @transform_3, window_bounds = array<i64: 1, 256, 32>}]} {
    %c0_i32 = arith.constant 0 : i32
    %0 = arith.cmpi eq, %arg1, %c0_i32 : i32
    %1 = arith.extui %0 : i1 to i32
    %c0_i32_0 = arith.constant 0 : i32
    %2 = arith.cmpi ne, %1, %c0_i32_0 : i32
    scf.if %2 {
      %cst_19 = arith.constant 0.000000e+00 : f32
      %36 = vector.broadcast %cst_19 : f32 to vector<256x384xf32>
      %c0_20 = arith.constant 0 : index
      %c0_21 = arith.constant 0 : index
      %37 = vector.load %arg6[%c0_20, %c0_21] : memref<256x384xf32, #tpu.memory_space<vmem>>, vector<256x384xf32>
      tpu.vector_store %arg6[%c0_20, %c0_21], %36 {strides = array<i32>} : memref<256x384xf32, #tpu.memory_space<vmem>>, vector<256x384xf32>,
      %cst_22 = arith.constant 0.000000e+00 : f32
      %38 = vector.broadcast %cst_22 : f32 to vector<256x32xf32>
      %c0_23 = arith.constant 0 : index
      %c0_24 = arith.constant 0 : index
      %39 = vector.load %arg7[%c0_23, %c0_24] : memref<256x32xf32, #tpu.memory_space<vmem>>, vector<256x32xf32>
      tpu.vector_store %arg7[%c0_23, %c0_24], %38 {strides = array<i32>} : memref<256x32xf32, #tpu.memory_space<vmem>>, vector<256x32xf32>,
    } else {
    }
    %c0 = arith.constant 0 : index
    %c0_1 = arith.constant 0 : index
    %c0_2 = arith.constant 0 : index
    %c0_3 = arith.constant 0 : index
    %3 = vector.load %arg2[%c0, %c0_1, %c0_2, %c0_3] : memref<1x1x256x36xf32, #tpu.memory_space<vmem>>, vector<1x1x256x36xf32>
    %4 = vector.shape_cast %3 : vector<1x1x256x36xf32> to vector<256x36xf32>
    %c0_4 = arith.constant 0 : index
    %c288 = arith.constant 288 : index
    %5 = vector.load %arg6[%c0_4, %c288] : memref<256x384xf32, #tpu.memory_space<vmem>>, vector<256x36xf32>
    tpu.vector_store %arg6[%c0_4, %c288], %4 {strides = array<i32>} : memref<256x384xf32, #tpu.memory_space<vmem>>, vector<256x36xf32>,
    %c0_5 = arith.constant 0 : index
    %c0_6 = arith.constant 0 : index
    %6 = vector.load %arg6[%c0_5, %c0_6] : memref<256x384xf32, #tpu.memory_space<vmem>>, vector<256x384xf32>
    %c0_7 = arith.constant 0 : index
    %c0_8 = arith.constant 0 : index
    %7 = vector.load %arg3[%c0_7, %c0_8] : memref<384x128xf32, #tpu.memory_space<vmem>>, vector<384x128xf32>
    %cst = arith.constant dense<0.000000e+00> : vector<256x128xf32>
    %8 = tpu.matmul %6, %7, %cst {dimension_numbers = #tpu.dot_dimension_numbers<[1], [0], [0], [1], [0, 0, 1, 1], [], []>} : vector<256x384xf32>, vector<384x128xf32>, vector<256x128xf32> -> vector<256x128xf32>
    %c0_9 = arith.constant 0 : index
    %c0_10 = arith.constant 0 : index
    %9 = vector.load %arg4[%c0_9, %c0_10] : memref<1x128xf32, #tpu.memory_space<vmem>>, vector<1x128xf32>
    %10 = vector.broadcast %9 : vector<1x128xf32> to vector<256x128xf32>
    %11 = arith.addf %8, %10 : vector<256x128xf32>
    %12 = vector.extract_strided_slice %11 {offsets = [0, 0], sizes = [256, 96], strides = [1, 1]} : vector<256x128xf32> to vector<256x96xf32>
    %13 = arith.negf %12 : vector<256x96xf32>
    %14 = math.exp %13 : vector<256x96xf32>
    %cst_11 = arith.constant 1.000000e+00 : f32
    %15 = vector.broadcast %cst_11 : f32 to vector<256x96xf32>
    %16 = arith.addf %15, %14 : vector<256x96xf32>
    %17 = arith.divf %15, %16 : vector<256x96xf32>
    %18 = vector.extract_strided_slice %17 {offsets = [0, 0], sizes = [256, 32], strides = [1, 1]} : vector<256x96xf32> to vector<256x32xf32>
    %19 = vector.extract_strided_slice %17 {offsets = [0, 32], sizes = [256, 32], strides = [1, 1]} : vector<256x96xf32> to vector<256x32xf32>
    %20 = vector.extract_strided_slice %17 {offsets = [0, 64], sizes = [256, 32], strides = [1, 1]} : vector<256x96xf32> to vector<256x32xf32>
    %21 = vector.extract_strided_slice %11 {offsets = [0, 96], sizes = [256, 32], strides = [1, 1]} : vector<256x128xf32> to vector<256x32xf32>
    %22 = math.tanh %21 : vector<256x32xf32>
    %c0_12 = arith.constant 0 : index
    %c0_13 = arith.constant 0 : index
    %23 = vector.load %arg7[%c0_12, %c0_13] : memref<256x32xf32, #tpu.memory_space<vmem>>, vector<256x32xf32>
    %24 = arith.mulf %19, %23 : vector<256x32xf32>
    %25 = arith.mulf %18, %22 : vector<256x32xf32>
    %26 = arith.addf %24, %25 : vector<256x32xf32>
    %27 = math.tanh %26 : vector<256x32xf32>
    %28 = arith.mulf %20, %27 : vector<256x32xf32>
    %c0_14 = arith.constant 0 : index
    %c0_15 = arith.constant 0 : index
    %29 = vector.load %arg7[%c0_14, %c0_15] : memref<256x32xf32, #tpu.memory_space<vmem>>, vector<256x32xf32>
    tpu.vector_store %arg7[%c0_14, %c0_15], %26 {strides = array<i32>} : memref<256x32xf32, #tpu.memory_space<vmem>>, vector<256x32xf32>,
    %c7_i32 = arith.constant 7 : i32
    %30 = arith.cmpi eq, %arg1, %c7_i32 : i32
    %31 = arith.extui %30 : i1 to i32
    %c0_i32_16 = arith.constant 0 : i32
    %32 = arith.cmpi ne, %31, %c0_i32_16 : i32
    scf.if %32 {
      %c0_19 = arith.constant 0 : index
      %c0_20 = arith.constant 0 : index
      %c0_21 = arith.constant 0 : index
      %36 = vector.load %arg5[%c0_19, %c0_20, %c0_21] : memref<1x256x32xf32, #tpu.memory_space<vmem>>, vector<1x256x32xf32>
      %37 = vector.shape_cast %36 : vector<1x256x32xf32> to vector<256x32xf32>
      %38 = vector.shape_cast %28 : vector<256x32xf32> to vector<1x256x32xf32>
      tpu.vector_store %arg5[%c0_19, %c0_20, %c0_21], %38 {strides = array<i32>} : memref<1x256x32xf32, #tpu.memory_space<vmem>>, vector<1x256x32xf32>,
    } else {
    }
    %c7_i32_17 = arith.constant 7 : i32
    %33 = arith.cmpi slt, %arg1, %c7_i32_17 : i32
    %34 = arith.extui %33 : i1 to i32
    %c0_i32_18 = arith.constant 0 : i32
    %35 = arith.cmpi ne, %34, %c0_i32_18 : i32
    scf.if %35 {
      %36 = tpu.iota {dimensions = array<i32: 0>} : vector<256x1xi32>
      %c16_i32 = arith.constant 16 : i32
      %c0_i32_19 = arith.constant 0 : i32
      %37 = arith.cmpi eq, %c16_i32, %c0_i32_19 : i32
      %c1_i32 = arith.constant 1 : i32
      %38 = arith.select %37, %c1_i32, %c16_i32 : i32
      %39 = vector.broadcast %38 : i32 to vector<256x1xi32>
      %40 = arith.remsi %36, %39 : vector<256x1xi32>
      %c0_i32_20 = arith.constant 0 : i32
      %41 = vector.broadcast %c0_i32_20 : i32 to vector<256x1xi32>
      %42 = arith.cmpi ne, %40, %41 : vector<256x1xi32>
      %c0_i32_21 = arith.constant 0 : i32
      %43 = vector.broadcast %c0_i32_21 : i32 to vector<256x1xi32>
      %44 = arith.cmpi slt, %40, %43 : vector<256x1xi32>
      %c0_i32_22 = arith.constant 0 : i32
      %45 = arith.cmpi slt, %38, %c0_i32_22 : i32
      %46 = vector.broadcast %45 : i1 to vector<256x1xi1>
      %47 = vector.broadcast %46 : vector<256x1xi1> to vector<256x1xi1>
      %48 = arith.xori %44, %47 : vector<256x1xi1>
      %49 = arith.andi %48, %42 : vector<256x1xi1>
      %50 = vector.broadcast %38 : i32 to vector<256x1xi32>
      %51 = arith.addi %40, %50 : vector<256x1xi32>
      %52 = arith.select %49, %51, %40 : vector<256x1xi1>, vector<256x1xi32>
      %53 = vector.extract_strided_slice %28 {offsets = [0, 0], sizes = [239, 32], strides = [1, 1]} : vector<256x32xf32> to vector<239x32xf32>
      %54 = vector.extract_strided_slice %52 {offsets = [17, 0], sizes = [239, 1], strides = [1, 1]} : vector<256x1xi32> to vector<239x1xi32>
      %c1_i32_23 = arith.constant 1 : i32
      %55 = vector.broadcast %c1_i32_23 : i32 to vector<239x1xi32>
      %56 = arith.cmpi sge, %54, %55 : vector<239x1xi32>
      %cst_24 = arith.constant 0.000000e+00 : f32
      %57 = vector.shape_cast %56 : vector<239x1xi1> to vector<239x1xi1>
      %58 = vector.broadcast %57 : vector<239x1xi1> to vector<239x32xi1>
      %59 = vector.broadcast %cst_24 : f32 to vector<239x32xf32>
      %60 = arith.select %58, %53, %59 : vector<239x32xi1>, vector<239x32xf32>
      %c17 = arith.constant 17 : index
      %c0_25 = arith.constant 0 : index
      %61 = vector.load %arg6[%c17, %c0_25] : memref<256x384xf32, #tpu.memory_space<vmem>>, vector<239x32xf32>
      tpu.vector_store %arg6[%c17, %c0_25], %60 {strides = array<i32>} : memref<256x384xf32, #tpu.memory_space<vmem>>, vector<239x32xf32>,
      %62 = vector.extract_strided_slice %28 {offsets = [0, 0], sizes = [240, 32], strides = [1, 1]} : vector<256x32xf32> to vector<240x32xf32>
      %c16 = arith.constant 16 : index
      %c32 = arith.constant 32 : index
      %63 = vector.load %arg6[%c16, %c32] : memref<256x384xf32, #tpu.memory_space<vmem>>, vector<240x32xf32>
      tpu.vector_store %arg6[%c16, %c32], %62 {strides = array<i32>} : memref<256x384xf32, #tpu.memory_space<vmem>>, vector<240x32xf32>,
      %64 = vector.extract_strided_slice %28 {offsets = [0, 0], sizes = [241, 32], strides = [1, 1]} : vector<256x32xf32> to vector<241x32xf32>
      %65 = vector.extract_strided_slice %52 {offsets = [15, 0], sizes = [241, 1], strides = [1, 1]} : vector<256x1xi32> to vector<241x1xi32>
      %c15_i32 = arith.constant 15 : i32
      %66 = vector.broadcast %c15_i32 : i32 to vector<241x1xi32>
      %67 = arith.cmpi slt, %65, %66 : vector<241x1xi32>
      %cst_26 = arith.constant 0.000000e+00 : f32
      %68 = vector.shape_cast %67 : vector<241x1xi1> to vector<241x1xi1>
      %69 = vector.broadcast %68 : vector<241x1xi1> to vector<241x32xi1>
      %70 = vector.broadcast %cst_26 : f32 to vector<241x32xf32>
      %71 = arith.select %69, %64, %70 : vector<241x32xi1>, vector<241x32xf32>
      %c15 = arith.constant 15 : index
      %c64 = arith.constant 64 : index
      %72 = vector.load %arg6[%c15, %c64] : memref<256x384xf32, #tpu.memory_space<vmem>>, vector<241x32xf32>
      tpu.vector_store %arg6[%c15, %c64], %71 {strides = array<i32>} : memref<256x384xf32, #tpu.memory_space<vmem>>, vector<241x32xf32>,
      %73 = vector.extract_strided_slice %28 {offsets = [0, 0], sizes = [255, 32], strides = [1, 1]} : vector<256x32xf32> to vector<255x32xf32>
      %74 = vector.extract_strided_slice %52 {offsets = [1, 0], sizes = [255, 1], strides = [1, 1]} : vector<256x1xi32> to vector<255x1xi32>
      %c1_i32_27 = arith.constant 1 : i32
      %75 = vector.broadcast %c1_i32_27 : i32 to vector<255x1xi32>
      %76 = arith.cmpi sge, %74, %75 : vector<255x1xi32>
      %cst_28 = arith.constant 0.000000e+00 : f32
      %77 = vector.shape_cast %76 : vector<255x1xi1> to vector<255x1xi1>
      %78 = vector.broadcast %77 : vector<255x1xi1> to vector<255x32xi1>
      %79 = vector.broadcast %cst_28 : f32 to vector<255x32xf32>
      %80 = arith.select %78, %73, %79 : vector<255x32xi1>, vector<255x32xf32>
      %c1 = arith.constant 1 : index
      %c96 = arith.constant 96 : index
      %81 = vector.load %arg6[%c1, %c96] : memref<256x384xf32, #tpu.memory_space<vmem>>, vector<255x32xf32>
      tpu.vector_store %arg6[%c1, %c96], %80 {strides = array<i32>} : memref<256x384xf32, #tpu.memory_space<vmem>>, vector<255x32xf32>,
      %c0_29 = arith.constant 0 : index
      %c128 = arith.constant 128 : index
      %82 = vector.load %arg6[%c0_29, %c128] : memref<256x384xf32, #tpu.memory_space<vmem>>, vector<256x32xf32>
      tpu.vector_store %arg6[%c0_29, %c128], %28 {strides = array<i32>} : memref<256x384xf32, #tpu.memory_space<vmem>>, vector<256x32xf32>,
      %83 = vector.extract_strided_slice %28 {offsets = [1, 0], sizes = [255, 32], strides = [1, 1]} : vector<256x32xf32> to vector<255x32xf32>
      %84 = vector.extract_strided_slice %52 {offsets = [0, 0], sizes = [255, 1], strides = [1, 1]} : vector<256x1xi32> to vector<255x1xi32>
      %c15_i32_30 = arith.constant 15 : i32
      %85 = vector.broadcast %c15_i32_30 : i32 to vector<255x1xi32>
      %86 = arith.cmpi slt, %84, %85 : vector<255x1xi32>
      %cst_31 = arith.constant 0.000000e+00 : f32
      %87 = vector.shape_cast %86 : vector<255x1xi1> to vector<255x1xi1>
      %88 = vector.broadcast %87 : vector<255x1xi1> to vector<255x32xi1>
      %89 = vector.broadcast %cst_31 : f32 to vector<255x32xf32>
      %90 = arith.select %88, %83, %89 : vector<255x32xi1>, vector<255x32xf32>
      %c0_32 = arith.constant 0 : index
      %c160 = arith.constant 160 : index
      %91 = vector.load %arg6[%c0_32, %c160] : memref<256x384xf32, #tpu.memory_space<vmem>>, vector<255x32xf32>
      tpu.vector_store %arg6[%c0_32, %c160], %90 {strides = array<i32>} : memref<256x384xf32, #tpu.memory_space<vmem>>, vector<255x32xf32>,
      %92 = vector.extract_strided_slice %28 {offsets = [15, 0], sizes = [241, 32], strides = [1, 1]} : vector<256x32xf32> to vector<241x32xf32>
      %93 = vector.extract_strided_slice %52 {offsets = [0, 0], sizes = [241, 1], strides = [1, 1]} : vector<256x1xi32> to vector<241x1xi32>
      %c1_i32_33 = arith.constant 1 : i32
      %94 = vector.broadcast %c1_i32_33 : i32 to vector<241x1xi32>
      %95 = arith.cmpi sge, %93, %94 : vector<241x1xi32>
      %cst_34 = arith.constant 0.000000e+00 : f32
      %96 = vector.shape_cast %95 : vector<241x1xi1> to vector<241x1xi1>
      %97 = vector.broadcast %96 : vector<241x1xi1> to vector<241x32xi1>
      %98 = vector.broadcast %cst_34 : f32 to vector<241x32xf32>
      %99 = arith.select %97, %92, %98 : vector<241x32xi1>, vector<241x32xf32>
      %c0_35 = arith.constant 0 : index
      %c192 = arith.constant 192 : index
      %100 = vector.load %arg6[%c0_35, %c192] : memref<256x384xf32, #tpu.memory_space<vmem>>, vector<241x32xf32>
      tpu.vector_store %arg6[%c0_35, %c192], %99 {strides = array<i32>} : memref<256x384xf32, #tpu.memory_space<vmem>>, vector<241x32xf32>,
      %101 = vector.extract_strided_slice %28 {offsets = [16, 0], sizes = [240, 32], strides = [1, 1]} : vector<256x32xf32> to vector<240x32xf32>
      %c0_36 = arith.constant 0 : index
      %c224 = arith.constant 224 : index
      %102 = vector.load %arg6[%c0_36, %c224] : memref<256x384xf32, #tpu.memory_space<vmem>>, vector<240x32xf32>
      tpu.vector_store %arg6[%c0_36, %c224], %101 {strides = array<i32>} : memref<256x384xf32, #tpu.memory_space<vmem>>, vector<240x32xf32>,
      %103 = vector.extract_strided_slice %28 {offsets = [17, 0], sizes = [239, 32], strides = [1, 1]} : vector<256x32xf32> to vector<239x32xf32>
      %104 = vector.extract_strided_slice %52 {offsets = [0, 0], sizes = [239, 1], strides = [1, 1]} : vector<256x1xi32> to vector<239x1xi32>
      %c15_i32_37 = arith.constant 15 : i32
      %105 = vector.broadcast %c15_i32_37 : i32 to vector<239x1xi32>
      %106 = arith.cmpi slt, %104, %105 : vector<239x1xi32>
      %cst_38 = arith.constant 0.000000e+00 : f32
      %107 = vector.shape_cast %106 : vector<239x1xi1> to vector<239x1xi1>
      %108 = vector.broadcast %107 : vector<239x1xi1> to vector<239x32xi1>
      %109 = vector.broadcast %cst_38 : f32 to vector<239x32xf32>
      %110 = arith.select %108, %103, %109 : vector<239x32xi1>, vector<239x32xf32>
      %c0_39 = arith.constant 0 : index
      %c256 = arith.constant 256 : index
      %111 = vector.load %arg6[%c0_39, %c256] : memref<256x384xf32, #tpu.memory_space<vmem>>, vector<239x32xf32>
      tpu.vector_store %arg6[%c0_39, %c256], %110 {strides = array<i32>} : memref<256x384xf32, #tpu.memory_space<vmem>>, vector<239x32xf32>,
    } else {
    }
    return
  }
  func.func @transform_0(%arg0: i32, %arg1: i32) -> (i32, i32, i32, i32) {
    %c0_i32 = arith.constant 0 : i32
    %c0_i32_0 = arith.constant 0 : i32
    %c0_i32_1 = arith.constant 0 : i32
    return %arg0, %arg1, %c0_i32, %c0_i32_0 : i32, i32, i32, i32
  }
  func.func @transform_1(%arg0: i32, %arg1: i32) -> (i32, i32) {
    %c0_i32 = arith.constant 0 : i32
    %c0_i32_0 = arith.constant 0 : i32
    %c0_i32_1 = arith.constant 0 : i32
    return %c0_i32, %c0_i32_0 : i32, i32
  }
  func.func @transform_2(%arg0: i32, %arg1: i32) -> (i32, i32) {
    %c0_i32 = arith.constant 0 : i32
    %c0_i32_0 = arith.constant 0 : i32
    %c0_i32_1 = arith.constant 0 : i32
    return %c0_i32, %c0_i32_0 : i32, i32
  }
  func.func @transform_3(%arg0: i32, %arg1: i32) -> (i32, i32, i32) {
    %c0_i32 = arith.constant 0 : i32
    %c0_i32_0 = arith.constant 0 : i32
    %c0_i32_1 = arith.constant 0 : i32
    return %arg0, %c0_i32, %c0_i32_0 : i32, i32, i32
  }
}

</mosaic_0001>

<bundles_post_ra>
// kernel: tpu_custom_call.1
= control target key start
LH: loop header
LB: loop body
LE: loop exit
PB: predicated region body
PF: predicated region fallthrough
CT: control target
= control target key end

     0   :  { %s5337_s12 = smov 0   ;;  %s5339_s13 = smov 0   ;;  %s8121_s0 = inlined_call_operand.vmem [shape: f32[2,8,256,36], index: 0, kind: input, shape index: {}]   ;;  %s8122_s1 = inlined_call_operand.vmem [shape: f32[384,128], index: 1, kind: input, shape index: {}]   ;;  %s8123_s2 = inlined_call_operand.vmem [shape: f32[1,128], index: 2, kind: input, shape index: {}]   ;;  %s8124_s3 = inlined_call_operand.vmem [shape: f32[2,256,32], index: 3, kind: output, shape index: {}]  }
   0x1   :  { %s5341_s14 = smov 0   ;;  %s5343_s15 = smov 0  }
   0x2   :  { %s5345_s16 = smov 0  }
   0x3 LB: > { %s22_s17 = sadd.s32 1, %s5299_s14  ;;  %s25_s18 = sadd.s32 1, %s5303_s15  ;;  %s5307_s16 = sphi %s5345_s16, %s13_s16   ;;  %s5303_s15 = sphi %s5343_s15, %s8680_s15   ;;  %s5299_s14 = sphi %s5341_s14, %s8679_s14   ;;  %s5295_s13 = sphi %s5339_s13, %s8678_s13   ;;  %s5291_s12 = sphi %s5337_s12, %s8677_s12  }
   0x4   : > { %p23_p0 = scmp.ge.s32.totalorder %s22_s17, 8  ;;  %p4680_p1 = scmp.ge.s32.totalorder %s5307_s16, 1 }
   0x5   : > { %p155_p2 = scmp.lt.s32.totalorder %s5307_s16, 17 }
   0x6   : > { %s8682_s17 = smov (%p23_p0, %s22_s17), 0  ;;  %s8684_s18 = smov (!%p23_p0, %s25_s18), %s5303_s15 }
   0x7   : > { %p156_p3 = pnand %p4680_p1, %p155_p2  ;;  %p27_p4 = scmp.ge.s32.totalorder %s8684_s18, 2 }
   0x9   : > { %s8686_s18 = smov (%p27_p4, %s8684_s18), 0  ;;  %159 = sbr.rel (%p156_p3) target bundleno = 1927 (0x787), region = 32 }
  0x10   : > { %p183_p5 = scmp.lt.s32.totalorder %s5295_s13, 1  ;;  %p185_p6 = scmp.lt.s32.totalorder %s5291_s12, 7 }
  0x11   : > { %p4686_p7 = scmp.ne.s32.totalorder %s5291_s12, 0 }
  0x12   : > { %s8688_s13 = smov (!%p183_p5, %s5295_s13), 1  ;;  %vm297_vm0 = vcmask (!%p4686_p7), 261120   ;;  %v5309_v0 = vmov (!%p4686_p7), 0.0  }
  0x13   : > { %s186_s19 = scalar_select %p185_p6, %s5291_s12, 7 }
  0x14   : > { %s4682_s20 = sshll.u32 %s8688_s13, 8  ;;  %200 = sbr.rel (%p4686_p7) target bundleno = 84 (0x54), region = 36  ;;  %201 = vst [vmem:[#allocation2] sm:$0xff] (!%p4686_p7), %v5309_v0  ;;  %202 = vst [vmem:[#allocation2 + $0x8] sm:$0xff] (!%p4686_p7), %v5309_v0 }
  0x15   : > { %s4681_s21 = sshll.u32 %s186_s19, 5  ;;  %s5374_s24 = scalar_lea.vmem %s8124_s3, %s4682_s20  ;;  %203 = vst [vmem:[#allocation2 + $0x10] sm:$0xff] (!%p4686_p7), %v5309_v0  ;;  %204 = vst [vmem:[#allocation2 + $0x18] sm:$0xff] (!%p4686_p7), %v5309_v0 }
  0x16   : > { %s189_s25 = sadd.s32 %s4682_s20, %s4681_s21  ;;  %205 = vst [vmem:[#allocation2 + $0x20] sm:$0xff] (!%p4686_p7), %v5309_v0  ;;  %206 = vst [vmem:[#allocation2 + $0x28] sm:$0xff] (!%p4686_p7), %v5309_v0 }
  0x17   : > { %s4683_s26 = sshll.u32 %s189_s25, 3  ;;  %207 = vst [vmem:[#allocation2 + $0x30] sm:$0xff] (!%p4686_p7), %v5309_v0  ;;  %208 = vst [vmem:[#allocation2 + $0x38] sm:$0xff] (!%p4686_p7), %v5309_v0 }
  0x18   : > { %s5379_s29 = scalar_lea.vmem %s8121_s0, %s4683_s26  ;;  %209 = vst [vmem:[#allocation2 + $0x40] sm:$0xff] (!%p4686_p7), %v5309_v0  ;;  %210 = vst [vmem:[#allocation2 + $0x48] sm:$0xff] (!%p4686_p7), %v5309_v0 }
  0x19   : > { %211 = vst [vmem:[#allocation2 + $0x50] sm:$0xff] (!%p4686_p7), %v5309_v0  ;;  %212 = vst [vmem:[#allocation2 + $0x58] sm:$0xff] (!%p4686_p7), %v5309_v0 }
  0x1a   : > { %213 = vst [vmem:[#allocation2 + $0x60] sm:$0xff] (!%p4686_p7), %v5309_v0  ;;  %214 = vst [vmem:[#allocation2 + $0x68] sm:$0xff] (!%p4686_p7), %v5309_v0 }
  0x1b   : > { %215 = vst [vmem:[#allocation2 + $0x70] sm:$0xff] %v5309_v0  ;;  %216 = vst [vmem:[#allocation2 + $0x78] sm:$0xff] %v5309_v0 }
  0x1c   : > { %217 = vst [vmem:[#allocation2 + $0x80] sm:$0xff] %v5309_v0  ;;  %218 = vst [vmem:[#allocation2 + $0x88] sm:$0xff] %v5309_v0 }
  0x1d   : > { %219 = vst [vmem:[#allocation2 + $0x90] sm:$0xff] %v5309_v0  ;;  %220 = vst [vmem:[#allocation2 + $0x98] sm:$0xff] %v5309_v0 }
  0x1e   : > { %221 = vst [vmem:[#allocation2 + $0xa0] sm:$0xff] %v5309_v0  ;;  %222 = vst [vmem:[#allocation2 + $0xa8] sm:$0xff] %v5309_v0 }
  0x1f   : > { %223 = vst [vmem:[#allocation2 + $0xb0] sm:$0xff] %v5309_v0  ;;  %224 = vst [vmem:[#allocation2 + $0xb8] sm:$0xff] %v5309_v0 }
  0x20   : > { %225 = vst [vmem:[#allocation2 + $0xc0] sm:$0xff] %v5309_v0  ;;  %226 = vst [vmem:[#allocation2 + $0xc8] sm:$0xff] %v5309_v0 }
  0x21   : > { %227 = vst [vmem:[#allocation2 + $0xd0] sm:$0xff] %v5309_v0  ;;  %228 = vst [vmem:[#allocation2 + $0xd8] sm:$0xff] %v5309_v0 }
  0x22   : > { %229 = vst [vmem:[#allocation2 + $0xe0] sm:$0xff] %v5309_v0  ;;  %230 = vst [vmem:[#allocation2 + $0xe8] sm:$0xff] %v5309_v0 }
  0x23   : > { %231 = vst [vmem:[#allocation2 + $0xf0] sm:$0xff] %v5309_v0  ;;  %232 = vst [vmem:[#allocation2 + $0xf8] sm:$0xff] %v5309_v0 }
  0x24   : > { %233 = vst [vmem:[#allocation2 + $0x100] sm:$0xff] %v5309_v0  ;;  %234 = vst [vmem:[#allocation2 + $0x108] sm:$0xff] %v5309_v0 }
  0x25   : > { %235 = vst [vmem:[#allocation2 + $0x110] sm:$0xff] %v5309_v0  ;;  %236 = vst [vmem:[#allocation2 + $0x118] sm:$0xff] %v5309_v0 }
  0x26   : > { %237 = vst [vmem:[#allocation2 + $0x120] sm:$0xff] %v5309_v0  ;;  %238 = vst [vmem:[#allocation2 + $0x128] sm:$0xff] %v5309_v0 }
  0x27   : > { %239 = vst [vmem:[#allocation2 + $0x130] sm:$0xff] %v5309_v0  ;;  %240 = vst [vmem:[#allocation2 + $0x138] sm:$0xff] %v5309_v0 }
  0x28   : > { %241 = vst [vmem:[#allocation2 + $0x140] sm:$0xff] %v5309_v0  ;;  %242 = vst [vmem:[#allocation2 + $0x148] sm:$0xff] %v5309_v0 }
  0x29   : > { %243 = vst [vmem:[#allocation2 + $0x150] sm:$0xff] %v5309_v0  ;;  %244 = vst [vmem:[#allocation2 + $0x158] sm:$0xff] %v5309_v0 }
  0x2a   : > { %245 = vst [vmem:[#allocation2 + $0x160] sm:$0xff] %v5309_v0  ;;  %246 = vst [vmem:[#allocation2 + $0x168] sm:$0xff] %v5309_v0 }
  0x2b   : > { %247 = vst [vmem:[#allocation2 + $0x170] sm:$0xff] %v5309_v0  ;;  %248 = vst [vmem:[#allocation2 + $0x178] sm:$0xff] %v5309_v0 }
  0x2c   : > { %249 = vst [vmem:[#allocation2 + $0x180] sm:$0xff] %v5309_v0  ;;  %250 = vst [vmem:[#allocation2 + $0x188] sm:$0xff] %v5309_v0 }
  0x2d   : > { %251 = vst [vmem:[#allocation2 + $0x190] sm:$0xff] %v5309_v0  ;;  %252 = vst [vmem:[#allocation2 + $0x198] sm:$0xff] %v5309_v0 }
  0x2e   : > { %253 = vst [vmem:[#allocation2 + $0x1a0] sm:$0xff] %v5309_v0  ;;  %254 = vst [vmem:[#allocation2 + $0x1a8] sm:$0xff] %v5309_v0 }
  0x2f   : > { %255 = vst [vmem:[#allocation2 + $0x1b0] sm:$0xff] %v5309_v0  ;;  %256 = vst [vmem:[#allocation2 + $0x1b8] sm:$0xff] %v5309_v0 }
  0x30   : > { %257 = vst [vmem:[#allocation2 + $0x1c0] sm:$0xff] %v5309_v0  ;;  %258 = vst [vmem:[#allocation2 + $0x1c8] sm:$0xff] %v5309_v0 }
  0x31   : > { %259 = vst [vmem:[#allocation2 + $0x1d0] sm:$0xff] %v5309_v0  ;;  %260 = vst [vmem:[#allocation2 + $0x1d8] sm:$0xff] %v5309_v0 }
  0x32   : > { %261 = vst [vmem:[#allocation2 + $0x1e0] sm:$0xff] %v5309_v0  ;;  %262 = vst [vmem:[#allocation2 + $0x1e8] sm:$0xff] %v5309_v0 }
  0x33   : > { %263 = vst [vmem:[#allocation2 + $0x1f0] sm:$0xff] %v5309_v0  ;;  %264 = vst [vmem:[#allocation2 + $0x1f8] sm:$0xff] %v5309_v0 }
  0x34   : > { %265 = vst [vmem:[#allocation2 + $0x200] sm:$0xff] %v5309_v0  ;;  %266 = vst [vmem:[#allocation2 + $0x208] sm:$0xff] %v5309_v0 }
  0x35   : > { %267 = vst [vmem:[#allocation2 + $0x210] sm:$0xff] %v5309_v0  ;;  %268 = vst [vmem:[#allocation2 + $0x218] sm:$0xff] %v5309_v0 }
  0x36   : > { %269 = vst [vmem:[#allocation2 + $0x220] sm:$0xff] %v5309_v0  ;;  %270 = vst [vmem:[#allocation2 + $0x228] sm:$0xff] %v5309_v0 }
  0x37   : > { %271 = vst [vmem:[#allocation2 + $0x230] sm:$0xff] %v5309_v0  ;;  %272 = vst [vmem:[#allocation2 + $0x238] sm:$0xff] %v5309_v0 }
  0x38   : > { %273 = vst [vmem:[#allocation2 + $0x240] sm:$0xff] %v5309_v0  ;;  %274 = vst [vmem:[#allocation2 + $0x248] sm:$0xff] %v5309_v0 }
  0x39   : > { %275 = vst [vmem:[#allocation2 + $0x250] sm:$0xff] %v5309_v0  ;;  %276 = vst [vmem:[#allocation2 + $0x258] sm:$0xff] %v5309_v0 }
  0x3a   : > { %277 = vst [vmem:[#allocation2 + $0x260] sm:$0xff] %v5309_v0  ;;  %278 = vst [vmem:[#allocation2 + $0x268] sm:$0xff] %v5309_v0 }
  0x3b   : > { %279 = vst [vmem:[#allocation2 + $0x270] sm:$0xff] %v5309_v0  ;;  %280 = vst [vmem:[#allocation2 + $0x278] sm:$0xff] %v5309_v0 }
  0x3c   : > { %281 = vst [vmem:[#allocation2 + $0x280] sm:$0xff] %v5309_v0  ;;  %282 = vst [vmem:[#allocation2 + $0x288] sm:$0xff] %v5309_v0 }
  0x3d   : > { %283 = vst [vmem:[#allocation2 + $0x290] sm:$0xff] %v5309_v0  ;;  %284 = vst [vmem:[#allocation2 + $0x298] sm:$0xff] %v5309_v0 }
  0x3e   : > { %285 = vst [vmem:[#allocation2 + $0x2a0] sm:$0xff] %v5309_v0  ;;  %286 = vst [vmem:[#allocation2 + $0x2a8] sm:$0xff] %v5309_v0 }
  0x3f   : > { %287 = vst [vmem:[#allocation2 + $0x2b0] sm:$0xff] %v5309_v0  ;;  %288 = vst [vmem:[#allocation2 + $0x2b8] sm:$0xff] %v5309_v0 }
  0x40   : > { %289 = vst [vmem:[#allocation2 + $0x2c0] sm:$0xff] %v5309_v0  ;;  %290 = vst [vmem:[#allocation2 + $0x2c8] sm:$0xff] %v5309_v0 }
  0x41   : > { %291 = vst [vmem:[#allocation2 + $0x2d0] sm:$0xff] %v5309_v0  ;;  %292 = vst [vmem:[#allocation2 + $0x2d8] sm:$0xff] %v5309_v0 }
  0x42   : > { %293 = vst [vmem:[#allocation2 + $0x2e0] sm:$0xff] %v5309_v0  ;;  %294 = vst [vmem:[#allocation2 + $0x2e8] sm:$0xff] %v5309_v0 }
  0x43   : > { %295 = vst [vmem:[#allocation2 + $0x2f0] sm:$0xff] %v5309_v0  ;;  %296 = vst [vmem:[#allocation2 + $0x2f8] sm:$0xff] %v5309_v0 }
  0x44   : > { %298 = vst.msk [vmem:[#allocation3] sm:$0xff] %vm297_vm0, %v5309_v0  ;;  %299 = vst.msk [vmem:[#allocation3 + $0x8] sm:$0xff] %vm297_vm0, %v5309_v0 }
  0x45   : > { %300 = vst.msk [vmem:[#allocation3 + $0x10] sm:$0xff] %vm297_vm0, %v5309_v0  ;;  %301 = vst.msk [vmem:[#allocation3 + $0x18] sm:$0xff] %vm297_vm0, %v5309_v0 }
  0x46   : > { %302 = vst.msk [vmem:[#allocation3 + $0x20] sm:$0xff] %vm297_vm0, %v5309_v0  ;;  %303 = vst.msk [vmem:[#allocation3 + $0x28] sm:$0xff] %vm297_vm0, %v5309_v0 }
  0x47   : > { %304 = vst.msk [vmem:[#allocation3 + $0x30] sm:$0xff] %vm297_vm0, %v5309_v0  ;;  %305 = vst.msk [vmem:[#allocation3 + $0x38] sm:$0xff] %vm297_vm0, %v5309_v0 }
  0x48   : > { %306 = vst.msk [vmem:[#allocation3 + $0x40] sm:$0xff] %vm297_vm0, %v5309_v0  ;;  %307 = vst.msk [vmem:[#allocation3 + $0x48] sm:$0xff] %vm297_vm0, %v5309_v0 }
  0x49   : > { %308 = vst.msk [vmem:[#allocation3 + $0x50] sm:$0xff] %vm297_vm0, %v5309_v0  ;;  %309 = vst.msk [vmem:[#allocation3 + $0x58] sm:$0xff] %vm297_vm0, %v5309_v0 }
  0x4a   : > { %310 = vst.msk [vmem:[#allocation3 + $0x60] sm:$0xff] %vm297_vm0, %v5309_v0  ;;  %311 = vst.msk [vmem:[#allocation3 + $0x68] sm:$0xff] %vm297_vm0, %v5309_v0 }
  0x4b   : > { %312 = vst.msk [vmem:[#allocation3 + $0x70] sm:$0xff] %vm297_vm0, %v5309_v0  ;;  %313 = vst.msk [vmem:[#allocation3 + $0x78] sm:$0xff] %vm297_vm0, %v5309_v0 }
  0x4c   : > { %314 = vst.msk [vmem:[#allocation3 + $0x80] sm:$0xff] %vm297_vm0, %v5309_v0  ;;  %315 = vst.msk [vmem:[#allocation3 + $0x88] sm:$0xff] %vm297_vm0, %v5309_v0 }
  0x4d   : > { %316 = vst.msk [vmem:[#allocation3 + $0x90] sm:$0xff] %vm297_vm0, %v5309_v0  ;;  %317 = vst.msk [vmem:[#allocation3 + $0x98] sm:$0xff] %vm297_vm0, %v5309_v0 }
  0x4e   : > { %318 = vst.msk [vmem:[#allocation3 + $0xa0] sm:$0xff] %vm297_vm0, %v5309_v0  ;;  %319 = vst.msk [vmem:[#allocation3 + $0xa8] sm:$0xff] %vm297_vm0, %v5309_v0 }
  0x4f   : > { %320 = vst.msk [vmem:[#allocation3 + $0xb0] sm:$0xff] %vm297_vm0, %v5309_v0  ;;  %321 = vst.msk [vmem:[#allocation3 + $0xb8] sm:$0xff] %vm297_vm0, %v5309_v0 }
  0x50   : > { %322 = vst.msk [vmem:[#allocation3 + $0xc0] sm:$0xff] %vm297_vm0, %v5309_v0  ;;  %323 = vst.msk [vmem:[#allocation3 + $0xc8] sm:$0xff] %vm297_vm0, %v5309_v0 }
  0x51   : > { %324 = vst.msk [vmem:[#allocation3 + $0xd0] sm:$0xff] %vm297_vm0, %v5309_v0  ;;  %325 = vst.msk [vmem:[#allocation3 + $0xd8] sm:$0xff] %vm297_vm0, %v5309_v0 }
  0x52   : > { %326 = vst.msk [vmem:[#allocation3 + $0xe0] sm:$0xff] %vm297_vm0, %v5309_v0  ;;  %327 = vst.msk [vmem:[#allocation3 + $0xe8] sm:$0xff] %vm297_vm0, %v5309_v0 }
  0x53   : > { %328 = vst.msk [vmem:[#allocation3 + $0xf0] sm:$0xff] %vm297_vm0, %v5309_v0  ;;  %329 = vst.msk [vmem:[#allocation3 + $0xf8] sm:$0xff] %vm297_vm0, %v5309_v0 }
  0x54 PF: > { %v330_v1 = vld [vmem:[%s5379_s29] sm:$0xff]  ;;  %v332_v2 = vld [vmem:[%s5379_s29 + $0x10] sm:$0xff]  ;;  %s5310_s30 = smov 32   ;;  %v331_v3 = vld [vmem:[%s5379_s29 + $0x8] sm:$0xff]  ;;  %v5311_v6 = vmov 0.0|0.0   ;;  %vm490_vm1 = vcmask 556288  }
  0x55   : > { %394 = vrot.lane.b32.xlu0 %v330_v1, %s5310_s30  ;;  %398 = vrot.lane.b32.xlu1 %v332_v2, %s5310_s30  ;;  %v524_v4 = vld [vmem:[#allocation2 + $0x8] sm:$0xff]  ;;  %v333_v5 = vld [vmem:[%s5379_s29 + $0x18] sm:$0xff]  ;;  %v619_v7 = vld [vmem:[%s8122_s1] sm:$0xff]  ;;  %s5312_s10 = smov 96   ;;  %vm8187_vm2 = vcmask 261120   ;;  %p4720_p8 = scmp.ne.s32.totalorder %s5291_s12, 7 }
  0x56   : > { %4853 = vmatprep.subr.bf16.mxu0 %v5311_v6  ;;  %v620_v8 = vld [vmem:[%s8122_s1 + $0x8] sm:$0xff]  ;;  %4933 = vmatprep.subr.bf16.mxu1 %v5311_v6  ;;  %v621_v10 = vld [vmem:[%s8122_s1 + $0x10] sm:$0xff]  ;;  %v622_v11 = vld [vmem:[%s8122_s1 + $0x18] sm:$0xff] }
  0x57   : > { %v4854_v9 = vpack.c.bf16 %v620_v8, %v619_v7  ;;  %738 = vmatprep.mubr.f32.mxu0 %v524_v4  ;;  %v334_v12 = vld [vmem:[%s5379_s29 + $0x20] sm:$0xff]  ;;  %v335_v13 = vld [vmem:[%s5379_s29 + $0x28] sm:$0xff]  ;;  %v4857_v14 = vpack.c.bf16 %v622_v11, %v621_v10  ;;  %v336_v17 = vld [vmem:[%s5379_s29 + $0x30] sm:$0xff] }
  0x58   : > { %v623_v15 = vld [vmem:[%s8122_s1 + $0x20] sm:$0xff]  ;;  %v624_v16 = vld [vmem:[%s8122_s1 + $0x28] sm:$0xff]  ;;  %v337_v18 = vld [vmem:[%s5379_s29 + $0x38] sm:$0xff] }
  0x59   : > { %396 = vrot.lane.b32.xlu0 %v331_v3, %s5310_s30  ;;  %400 = vrot.lane.b32.xlu1 %v333_v5, %s5310_s30  ;;  %v4860_v19 = vpack.c.bf16 %v624_v16, %v623_v15  ;;  %v625_v20 = vld [vmem:[%s8122_s1 + $0x30] sm:$0xff]  ;;  %v626_v21 = vld [vmem:[%s8122_s1 + $0x38] sm:$0xff]  ;;  %v596_v37 = vld [vmem:[#allocation2 + $0x248] sm:$0xff] }
  0x5a   : > { %4855 = vmatpush1.bf16.msra.mxu0 %v4854_v9  ;;  %4949 = vmatpush1.bf16.msra.mxu1 %v4854_v9  ;;  %v338_v22 = vld [vmem:[%s5379_s29 + $0x40] sm:$0xff]  ;;  %v339_v23 = vld [vmem:[%s5379_s29 + $0x48] sm:$0xff]  ;;  %v4863_v24 = vpack.c.bf16 %v626_v21, %v625_v20  ;;  %v340_v27 = vld [vmem:[%s5379_s29 + $0x50] sm:$0xff] }
  0x5b   : > { %4856 = vmatprep.subr.bf16.mxu0 %v5311_v6  ;;  %4934 = vmatprep.subr.bf16.mxu1 %v5311_v6  ;;  %v627_v25 = vld [vmem:[%s8122_s1 + $0x40] sm:$0xff]  ;;  %v628_v26 = vld [vmem:[%s8122_s1 + $0x48] sm:$0xff]  ;;  %v341_v28 = vld [vmem:[%s5379_s29 + $0x58] sm:$0xff] }
  0x5c   : > { %v4866_v29 = vpack.c.bf16 %v628_v26, %v627_v25  ;;  %v629_v30 = vld [vmem:[%s8122_s1 + $0x50] sm:$0xff]  ;;  %v630_v31 = vld [vmem:[%s8122_s1 + $0x58] sm:$0xff]  ;;  %v342_v32 = vld [vmem:[%s5379_s29 + $0x60] sm:$0xff]  ;;  %858 = vmatprep.mubr.f32.mxu1 %v596_v37 }
  0x5d   : > { %402 = vrot.lane.b32.xlu0 %v334_v12, %s5310_s30  ;;  %404 = vrot.lane.b32.xlu1 %v335_v13, %s5310_s30  ;;  %v343_v33 = vld [vmem:[%s5379_s29 + $0x68] sm:$0xff]  ;;  %v4869_v34 = vpack.c.bf16 %v630_v31, %v629_v30  ;;  %v631_v35 = vld [vmem:[%s8122_s1 + $0x60] sm:$0xff]  ;;  %v598_v37 = vld [vmem:[#allocation2 + $0x258] sm:$0xff] }
  0x5e   : > { %4858 = vmatpush1.bf16.msra.mxu0 %v4857_v14  ;;  %4950 = vmatpush1.bf16.msra.mxu1 %v4857_v14  ;;  %v632_v36 = vld [vmem:[%s8122_s1 + $0x68] sm:$0xff]  ;;  %v344_v38 = vld [vmem:[%s5379_s29 + $0x70] sm:$0xff]  ;;  %v345_v39 = vld [vmem:[%s5379_s29 + $0x78] sm:$0xff] }
  0x5f   : > { %4859 = vmatprep.subr.bf16.mxu0 %v5311_v6  ;;  %4935 = vmatprep.subr.bf16.mxu1 %v5311_v6  ;;  %v4872_v40 = vpack.c.bf16 %v632_v36, %v631_v35  ;;  %v633_v41 = vld [vmem:[%s8122_s1 + $0x70] sm:$0xff]  ;;  %v634_v42 = vld [vmem:[%s8122_s1 + $0x78] sm:$0xff]  ;;  %v346_v43 = vld [vmem:[%s5379_s29 + $0x80] sm:$0xff] }
  0x60   : > { %v347_v44 = vld [vmem:[%s5379_s29 + $0x88] sm:$0xff]  ;;  %v4875_v45 = vpack.c.bf16 %v634_v42, %v633_v41  ;;  %v635_v46 = vld [vmem:[%s8122_s1 + $0x80] sm:$0xff]  ;;  %v348_v48 = vld [vmem:[%s5379_s29 + $0x90] sm:$0xff] }
  0x61   : > { %406 = vrot.lane.b32.xlu0 %v336_v17, %s5310_s30  ;;  %408 = vrot.lane.b32.xlu1 %v337_v18, %s5310_s30  ;;  %v636_v47 = vld [vmem:[%s8122_s1 + $0x88] sm:$0xff]  ;;  %v349_v49 = vld [vmem:[%s5379_s29 + $0x98] sm:$0xff]  ;;  %v527_v30 = vld [vmem:[#allocation2 + $0x20] sm:$0xff] }
  0x62   : > { %4861 = vmatpush1.bf16.msra.mxu0 %v4860_v19  ;;  %4951 = vmatpush1.bf16.msra.mxu1 %v4860_v19  ;;  %v4878_v50 = vpack.c.bf16 %v636_v47, %v635_v46  ;;  %v637_v51 = vld [vmem:[%s8122_s1 + $0x90] sm:$0xff]  ;;  %v638_v52 = vld [vmem:[%s8122_s1 + $0x98] sm:$0xff]  ;;  %v350_v53 = vld [vmem:[%s5379_s29 + $0xa0] sm:$0xff] }
  0x63   : > { %4862 = vmatprep.subr.bf16.mxu0 %v5311_v6  ;;  %4936 = vmatprep.subr.bf16.mxu1 %v5311_v6  ;;  %v351_v54 = vld [vmem:[%s5379_s29 + $0xa8] sm:$0xff]  ;;  %v4881_v55 = vpack.c.bf16 %v638_v52, %v637_v51  ;;  %v639_v56 = vld [vmem:[%s8122_s1 + $0xa0] sm:$0xff]  ;;  %v352_v58 = vld [vmem:[%s5379_s29 + $0xb0] sm:$0xff] }
  0x64   : > { %v640_v57 = vld [vmem:[%s8122_s1 + $0xa8] sm:$0xff]  ;;  %v353_v59 = vld [vmem:[%s5379_s29 + $0xb8] sm:$0xff]  ;;  %v641_v61 = vld [vmem:[%s8122_s1 + $0xb0] sm:$0xff] }
  0x65   : > { %410 = vrot.lane.b32.xlu0 %v338_v22, %s5310_s30  ;;  %412 = vrot.lane.b32.xlu1 %v339_v23, %s5310_s30  ;;  %v4884_v60 = vpack.c.bf16 %v640_v57, %v639_v56  ;;  %v642_v62 = vld [vmem:[%s8122_s1 + $0xb8] sm:$0xff]  ;;  %v354_v63 = vld [vmem:[%s5379_s29 + $0xc0] sm:$0xff]  ;;  %v1349_v23 = vld [vmem:[#allocation3 + $0x8] sm:$0xff] }
  0x66   : > { %4864 = vmatpush1.bf16.msra.mxu0 %v4863_v24  ;;  %4952 = vmatpush1.bf16.msra.mxu1 %v4863_v24  ;;  %v355_v0 = vld [vmem:[%s5379_s29 + $0xc8] sm:$0xff]  ;;  %v4887_v1 = vpack.c.bf16 %v642_v62, %v641_v61  ;;  %v643_v2 = vld [vmem:[%s8122_s1 + $0xc0] sm:$0xff]  ;;  %v356_v4 = vld [vmem:[%s5379_s29 + $0xd0] sm:$0xff] }
  0x67   : > { %4865 = vmatprep.subr.bf16.mxu0 %v5311_v6  ;;  %4937 = vmatprep.subr.bf16.mxu1 %v5311_v6  ;;  %v644_v3 = vld [vmem:[%s8122_s1 + $0xc8] sm:$0xff]  ;;  %v357_v5 = vld [vmem:[%s5379_s29 + $0xd8] sm:$0xff]  ;;  %v645_v8 = vld [vmem:[%s8122_s1 + $0xd0] sm:$0xff] }
  0x68   : > { %v4890_v7 = vpack.c.bf16 %v644_v3, %v643_v2  ;;  %v646_v9 = vld [vmem:[%s8122_s1 + $0xd8] sm:$0xff]  ;;  %v358_v10 = vld [vmem:[%s5379_s29 + $0xe0] sm:$0xff]  ;;  %v359_v11 = vld [vmem:[%s5379_s29 + $0xe8] sm:$0xff] }
  0x69   : > { %414 = vrot.lane.b32.xlu0 %v340_v27, %s5310_s30  ;;  %416 = vrot.lane.b32.xlu1 %v341_v28, %s5310_s30  ;;  %v4893_v12 = vpack.c.bf16 %v646_v9, %v645_v8  ;;  %v647_v13 = vld [vmem:[%s8122_s1 + $0xe0] sm:$0xff]  ;;  %v648_v14 = vld [vmem:[%s8122_s1 + $0xe8] sm:$0xff]  ;;  %v1350_v35 = vld [vmem:[#allocation3 + $0x10] sm:$0xff] }
  0x6a   : > { %4867 = vmatpush1.bf16.msra.mxu0 %v4866_v29  ;;  %4953 = vmatpush1.bf16.msra.mxu1 %v4866_v29  ;;  %v360_v15 = vld [vmem:[%s5379_s29 + $0xf0] sm:$0xff]  ;;  %v361_v16 = vld [vmem:[%s5379_s29 + $0xf8] sm:$0xff]  ;;  %v4896_v17 = vpack.c.bf16 %v648_v14, %v647_v13  ;;  %v651_v20 = vld [vmem:[%s8122_s1 + $0x100] sm:$0xff] }
  0x6b   : > { %4868 = vmatprep.subr.bf16.mxu0 %v5311_v6  ;;  %4938 = vmatprep.subr.bf16.mxu1 %v5311_v6  ;;  %v649_v18 = vld [vmem:[%s8122_s1 + $0xf0] sm:$0xff]  ;;  %v650_v19 = vld [vmem:[%s8122_s1 + $0xf8] sm:$0xff]  ;;  %v652_v21 = vld [vmem:[%s8122_s1 + $0x108] sm:$0xff] }
  0x6c   : > { %v4899_v22 = vpack.c.bf16 %v650_v19, %v649_v18  ;;  %v1348_v24 = vld [vmem:[#allocation3] sm:$0xff]  ;;  %v4901_v25 = vpack.c.bf16 %v652_v21, %v651_v20  ;;  %v653_v26 = vld [vmem:[%s8122_s1 + $0x110] sm:$0xff]  ;;  %v654_v27 = vld [vmem:[%s8122_s1 + $0x118] sm:$0xff] }
  0x6d   : > { %418 = vrot.lane.b32.xlu0 %v342_v32, %s5310_s30  ;;  %420 = vrot.lane.b32.xlu1 %v343_v33, %s5310_s30  ;;  %v523_v28 = vld [vmem:[#allocation2] sm:$0xff]  ;;  %v656_v33 = vld [vmem:[%s8122_s1 + $0x128] sm:$0xff]  ;;  %v526_v36 = vld [vmem:[#allocation2 + $0x18] sm:$0xff] }
  0x6e   : > { %4870 = vmatpush1.bf16.msra.mxu0 %v4869_v34  ;;  %4954 = vmatpush1.bf16.msra.mxu1 %v4869_v34  ;;  %v595_v29 = vld [vmem:[#allocation2 + $0x240] sm:$0xff]  ;;  %v1351_v34 = vld [vmem:[#allocation3 + $0x18] sm:$0xff]  ;;  %v657_v41 = vld [vmem:[%s8122_s1 + $0x130] sm:$0xff] }
  0x6f   : > { %4871 = vmatprep.subr.bf16.mxu0 %v5311_v6  ;;  %4939 = vmatprep.subr.bf16.mxu1 %v5311_v6  ;;  %v599_v31 = vld [vmem:[#allocation2 + $0x260] sm:$0xff]  ;;  %v658_v42 = vld [vmem:[%s8122_s1 + $0x138] sm:$0xff]  ;;  %v601_v46 = vld [vmem:[#allocation2 + $0x270] sm:$0xff] }
  0x70   : > { %v655_v32 = vld [vmem:[%s8122_s1 + $0x120] sm:$0xff]  ;;  %v533_v47 = vld [vmem:[#allocation2 + $0x50] sm:$0xff]  ;;  %v660_v51 = vld [vmem:[%s8122_s1 + $0x148] sm:$0xff] }
  0x71   : > { %422 = vrot.lane.b32.xlu0 %v344_v38, %s5310_s30  ;;  %424 = vrot.lane.b32.xlu1 %v345_v39, %s5310_s30  ;;  %v530_v38 = vld [vmem:[#allocation2 + $0x38] sm:$0xff]  ;;  %v4909_v39 = vpack.c.bf16 %v656_v33, %v655_v32  ;;  %v536_v56 = vld [vmem:[#allocation2 + $0x68] sm:$0xff]  ;;  %v1356_v62 = vld [vmem:[#allocation3 + $0x40] sm:$0xff] }
  0x72   : > { %4873 = vmatpush1.bf16.msra.mxu0 %v4872_v40  ;;  %4955 = vmatpush1.bf16.msra.mxu1 %v4872_v40  ;;  %v602_v40 = vld [vmem:[#allocation2 + $0x278] sm:$0xff]  ;;  %v1357_v61 = vld [vmem:[#allocation3 + $0x48] sm:$0xff]  ;;  %v611_v3 = vld [vmem:[#allocation2 + $0x2c0] sm:$0xff] }
  0x73   : > { %4874 = vmatprep.subr.bf16.mxu0 %v5311_v6  ;;  %4940 = vmatprep.subr.bf16.mxu1 %v5311_v6  ;;  %v1355_v52 = vld [vmem:[#allocation3 + $0x38] sm:$0xff]  ;;  %v1358_v8 = vld [vmem:[#allocation3 + $0x50] sm:$0xff] }
  0x74   : > { %v538_v9 = vld [vmem:[#allocation2 + $0x78] sm:$0xff]  ;;  %v665_v14 = vld [vmem:[%s8122_s1 + $0x170] sm:$0xff] }
  0x75   : > { %426 = vrot.lane.b32.xlu0 %v346_v43, %s5310_s30  ;;  %428 = vrot.lane.b32.xlu1 %v347_v44, %s5310_s30  ;;  %v1353_v43 = vld [vmem:[#allocation3 + $0x28] sm:$0xff]  ;;  %v1352_v44 = vld [vmem:[#allocation3 + $0x20] sm:$0xff]  ;;  %v614_v13 = vld [vmem:[#allocation2 + $0x2d8] sm:$0xff] }
  0x76   : > { %4876 = vmatpush1.bf16.msra.mxu0 %v4875_v45  ;;  %4956 = vmatpush1.bf16.msra.mxu1 %v4875_v45  ;;  %v529_v45 = vld [vmem:[#allocation2 + $0x30] sm:$0xff]  ;;  %v550_v33 = vld [vmem:[#allocation2 + $0xd8] sm:$0xff] }
  0x77   : > { %4877 = vmatprep.subr.bf16.mxu0 %v5311_v6  ;;  %4941 = vmatprep.subr.bf16.mxu1 %v5311_v6  ;;  %v541_v18 = vld [vmem:[#allocation2 + $0x90] sm:$0xff] }
  0x78   : > { %v613_v19 = vld [vmem:[#allocation2 + $0x2d0] sm:$0xff] }
  0x79   : > { %430 = vrot.lane.b32.xlu0 %v348_v48, %s5310_s30  ;;  %432 = vrot.lane.b32.xlu1 %v349_v49, %s5310_s30  ;;  %v4913_v48 = vpack.c.bf16 %v658_v42, %v657_v41  ;;  %v605_v49 = vld [vmem:[#allocation2 + $0x290] sm:$0xff]  ;;  %v556_v41 = vld [vmem:[#allocation2 + $0x108] sm:$0xff] }
  0x7a   : > { %4879 = vmatpush1.bf16.msra.mxu0 %v4878_v50  ;;  %4957 = vmatpush1.bf16.msra.mxu1 %v4878_v50  ;;  %v659_v50 = vld [vmem:[%s8122_s1 + $0x140] sm:$0xff]  ;;  %v545_v20 = vld [vmem:[#allocation2 + $0xb0] sm:$0xff]  ;;  %v560_v42 = vld [vmem:[#allocation2 + $0x128] sm:$0xff] }
  0x7b   : > { %4880 = vmatprep.subr.bf16.mxu0 %v5311_v6  ;;  %4942 = vmatprep.subr.bf16.mxu1 %v5311_v6  ;;  %v4917_v57 = vpack.c.bf16 %v660_v51, %v659_v50  ;;  %v1366_v32 = vld [vmem:[#allocation3 + $0x90] sm:$0xff]  ;;  %v562_v50 = vld [vmem:[#allocation2 + $0x138] sm:$0xff] }
  0x7d   : > { %434 = vrot.lane.b32.xlu0 %v350_v53, %s5310_s30  ;;  %436 = vrot.lane.b32.xlu1 %v351_v54, %s5310_s30  ;;  %v1354_v53 = vld [vmem:[#allocation3 + $0x30] sm:$0xff]  ;;  %v532_v54 = vld [vmem:[#allocation2 + $0x48] sm:$0xff] }
  0x7e   : > { %4882 = vmatpush1.bf16.msra.mxu0 %v4881_v55  ;;  %4958 = vmatpush1.bf16.msra.mxu1 %v4881_v55  ;;  %v604_v55 = vld [vmem:[#allocation2 + $0x288] sm:$0xff] }
  0x7f   : > { %4883 = vmatprep.subr.bf16.mxu0 %v5311_v6  ;;  %4943 = vmatprep.subr.bf16.mxu1 %v5311_v6 }
  0x81   : > { %438 = vrot.lane.b32.xlu0 %v352_v58, %s5310_s30  ;;  %440 = vrot.lane.b32.xlu1 %v353_v59, %s5310_s30  ;;  %v608_v58 = vld [vmem:[#allocation2 + $0x2a8] sm:$0xff]  ;;  %v661_v59 = vld [vmem:[%s8122_s1 + $0x150] sm:$0xff] }
  0x82   : > { %4885 = vmatpush1.bf16.msra.mxu0 %v4884_v60  ;;  %4959 = vmatpush1.bf16.msra.mxu1 %v4884_v60  ;;  %v662_v60 = vld [vmem:[%s8122_s1 + $0x158] sm:$0xff] }
  0x83   : > { %4886 = vmatprep.subr.bf16.mxu0 %v5311_v6  ;;  %4944 = vmatprep.subr.bf16.mxu1 %v5311_v6  ;;  %v4921_v2 = vpack.c.bf16 %v662_v60, %v661_v59  ;;  %v568_v60 = vld [vmem:[#allocation2 + $0x168] sm:$0xff] }
  0x85   : > { %442 = vrot.lane.b32.xlu0 %v354_v63, %s5310_s30  ;;  %444 = vrot.lane.b32.xlu1 %v355_v0, %s5310_s30  ;;  %v535_v63 = vld [vmem:[#allocation2 + $0x60] sm:$0xff] }
  0x86   : > { %4888 = vmatpush1.bf16.msra.mxu0 %v4887_v1  ;;  %4960 = vmatpush1.bf16.msra.mxu1 %v4887_v1  ;;  %v607_v0 = vld [vmem:[#allocation2 + $0x2a0] sm:$0xff] }
  0x87   : > { %4889 = vmatprep.subr.bf16.mxu0 %v5311_v6  ;;  %4945 = vmatprep.subr.bf16.mxu1 %v5311_v6  ;;  %v539_v1 = vld [vmem:[#allocation2 + $0x80] sm:$0xff] }
  0x89   : > { %446 = vrot.lane.b32.xlu0 %v356_v4, %s5310_s30  ;;  %448 = vrot.lane.b32.xlu1 %v357_v5, %s5310_s30  ;;  %v663_v4 = vld [vmem:[%s8122_s1 + $0x160] sm:$0xff]  ;;  %v664_v5 = vld [vmem:[%s8122_s1 + $0x168] sm:$0xff] }
  0x8a   : > { %4891 = vmatpush1.bf16.msra.mxu0 %v4890_v7  ;;  %4961 = vmatpush1.bf16.msra.mxu1 %v4890_v7  ;;  %v1359_v7 = vld [vmem:[#allocation3 + $0x58] sm:$0xff] }
  0x8b   : > { %4892 = vmatprep.subr.bf16.mxu0 %v5311_v6  ;;  %4946 = vmatprep.subr.bf16.mxu1 %v5311_v6 }
  0x8d   : > { %450 = vrot.lane.b32.xlu0 %v358_v10, %s5310_s30  ;;  %452 = vrot.lane.b32.xlu1 %v359_v11, %s5310_s30  ;;  %v610_v10 = vld [vmem:[#allocation2 + $0x2b8] sm:$0xff] }
  0x8e   : > { %4894 = vmatpush1.bf16.msra.mxu0 %v4893_v12  ;;  %4962 = vmatpush1.bf16.msra.mxu1 %v4893_v12  ;;  %v542_v11 = vld [vmem:[#allocation2 + $0x98] sm:$0xff]  ;;  %v4925_v12 = vpack.c.bf16 %v664_v5, %v663_v4 }
  0x8f   : > { %4895 = vmatprep.subr.bf16.mxu0 %v5311_v6  ;;  %4947 = vmatprep.subr.bf16.mxu1 %v5311_v6 }
  0x91   : > { %454 = vrot.lane.b32.xlu0 %v360_v15, %s5310_s30  ;;  %456 = vrot.lane.b32.xlu1 %v361_v16, %s5310_s30  ;;  %v666_v15 = vld [vmem:[%s8122_s1 + $0x178] sm:$0xff]  ;;  %v1361_v16 = vld [vmem:[#allocation3 + $0x68] sm:$0xff] }
  0x92   : > { %4897 = vmatpush1.bf16.msra.mxu0 %v4896_v17  ;;  %4963 = vmatpush1.bf16.msra.mxu1 %v4896_v17  ;;  %v1360_v17 = vld [vmem:[#allocation3 + $0x60] sm:$0xff]  ;;  %v4929_v21 = vpack.c.bf16 %v666_v15, %v665_v14  ;;  %v577_v15 = vld [vmem:[#allocation2 + $0x1b0] sm:$0xff] }
  0x93   : > { %4898 = vmatprep.subr.bf16.mxu0 %v5311_v6  ;;  %4948 = vmatprep.subr.bf16.mxu1 %v5311_v6  ;;  %v4905_v6 = vpack.c.bf16 %v654_v27, %v653_v26  ;;  %v616_v26 = vld [vmem:[#allocation2 + $0x2e8] sm:$0xff] }
  0x94   : > { %v548_v27 = vld [vmem:[#allocation2 + $0xc8] sm:$0xff] }
  0x95   : > { %1414 = vrot.lane.b32.xlu1 %v1349_v23, %s5310_s30  ;;  %1412 = vrot.lane.b32.xlu0 %v1348_v24, %s5310_s30  ;;  %v1363_v23 = vld [vmem:[#allocation3 + $0x78] sm:$0xff]  ;;  %v1362_v24 = vld [vmem:[#allocation3 + $0x70] sm:$0xff] }
  0x96   : > { %4900 = vmatpush1.bf16.msra.mxu0 %v4899_v22  ;;  %4964 = vmatpush1.bf16.msra.mxu1 %v4899_v22  ;;  %v617_v22 = vld [vmem:[#allocation2 + $0x2f0] sm:$0xff] }
  0x97   : > { %4902 = vmatprep.subr.bf16.mxu1 %v4901_v25 }
  0x99   : > { %739 = vmatmul.mubr.f32.vlgmr.msra.gmra.mrb[0].mxu0 %v523_v28  ;;  %859 = vmatmul.mubr.f32.vlgmr.msra.gmra.mrb[0].mxu1 %v595_v29  ;;  %v1365_v28 = vld [vmem:[#allocation3 + $0x88] sm:$0xff]  ;;  %v1364_v29 = vld [vmem:[#allocation3 + $0x80] sm:$0xff] }
  0x9a   : > { %743 = vmatprep.mubr.f32.mxu0 %v527_v30  ;;  %4904 = vmatpush3.bf16.msra.mxu1 %v4901_v25  ;;  %v544_v25 = vld [vmem:[#allocation2 + $0xa8] sm:$0xff]  ;;  %v547_v30 = vld [vmem:[#allocation2 + $0xc0] sm:$0xff] }
  0x9b   : > { %863 = vmatprep.mubr.f32.mxu1 %v599_v31  ;;  %4906 = vmatprep.subr.bf16.mxu1 %v4905_v6  ;;  %v1367_v31 = vld [vmem:[#allocation3 + $0x98] sm:$0xff] }
  0x9c   : > { %1418 = vrot.lane.b32.xlu1 %v1351_v34, %s5310_s30  ;;  %1416 = vrot.lane.b32.xlu0 %v1350_v35, %s5310_s30  ;;  %v554_v34 = vld [vmem:[#allocation2 + $0xf8] sm:$0xff]  ;;  %v1369_v35 = vld [vmem:[#allocation3 + $0xa8] sm:$0xff] }
  0x9d   : > { %744 = vmatmul.mubr.f32.gmra.mrb[2].mxu0 %v526_v36  ;;  %864 = vmatmul.mubr.f32.gmra.mrb[2].mxu1 %v598_v37  ;;  %v1368_v36 = vld [vmem:[#allocation3 + $0xa0] sm:$0xff]  ;;  %v553_v37 = vld [vmem:[#allocation2 + $0xf0] sm:$0xff] }
  0x9e   : > { %748 = vmatprep.mubr.f32.mxu0 %v530_v38  ;;  %4908 = vmatpush3.bf16.msra.mxu1 %v4905_v6  ;;  %v551_v6 = vld [vmem:[#allocation2 + $0xe0] sm:$0xff]  ;;  %v557_v38 = vld [vmem:[#allocation2 + $0x110] sm:$0xff] }
  0x9f   : > { %868 = vmatprep.mubr.f32.mxu1 %v602_v40  ;;  %4910 = vmatprep.subr.bf16.mxu1 %v4909_v39  ;;  %v1370_v40 = vld [vmem:[#allocation3 + $0xb0] sm:$0xff] }
  0xa0   : > { %1422 = vrot.lane.b32.xlu1 %v1353_v43, %s5310_s30  ;;  %1420 = vrot.lane.b32.xlu0 %v1352_v44, %s5310_s30  ;;  %v1373_v43 = vld [vmem:[#allocation3 + $0xc8] sm:$0xff]  ;;  %v1372_v44 = vld [vmem:[#allocation3 + $0xc0] sm:$0xff] }
  0xa1   : > { %749 = vmatmul.mubr.f32.gmra.mrb[4].mxu0 %v529_v45  ;;  %869 = vmatmul.mubr.f32.gmra.mrb[4].mxu1 %v601_v46  ;;  %v559_v45 = vld [vmem:[#allocation2 + $0x120] sm:$0xff] }
  0xa2   : > { %753 = vmatprep.mubr.f32.mxu0 %v533_v47  ;;  %4912 = vmatpush3.bf16.msra.mxu1 %v4909_v39  ;;  %v1371_v39 = vld [vmem:[#allocation3 + $0xb8] sm:$0xff] }
  0xa3   : > { %873 = vmatprep.mubr.f32.mxu1 %v605_v49  ;;  %4914 = vmatprep.subr.bf16.mxu1 %v4913_v48  ;;  %v1375_v49 = vld [vmem:[#allocation3 + $0xd8] sm:$0xff] }
  0xa4   : > { %1426 = vrot.lane.b32.xlu1 %v1355_v52, %s5310_s30  ;;  %1424 = vrot.lane.b32.xlu0 %v1354_v53, %s5310_s30  ;;  %v566_v53 = vld [vmem:[#allocation2 + $0x158] sm:$0xff] }
  0xa5   : > { %754 = vmatmul.mubr.f32.gmra.mrb[6].mxu0 %v532_v54  ;;  %874 = vmatmul.mubr.f32.gmra.mrb[6].mxu1 %v604_v55  ;;  %v565_v54 = vld [vmem:[#allocation2 + $0x150] sm:$0xff] }
  0xa6   : > { %758 = vmatprep.mubr.f32.mxu0 %v536_v56  ;;  %4916 = vmatpush3.bf16.msra.mxu1 %v4913_v48  ;;  %v563_v48 = vld [vmem:[#allocation2 + $0x140] sm:$0xff] }
  0xa7   : > { %878 = vmatprep.mubr.f32.mxu1 %v608_v58  ;;  %4918 = vmatprep.subr.bf16.mxu1 %v4917_v57  ;;  %v569_v58 = vld [vmem:[#allocation2 + $0x170] sm:$0xff] }
  0xa8   : > { %1430 = vrot.lane.b32.xlu1 %v1357_v61, %s5310_s30  ;;  %1428 = vrot.lane.b32.xlu0 %v1356_v62, %s5310_s30 }
  0xa9   : > { %759 = vmatmul.mubr.f32.gmra.mrb[8].mxu0 %v535_v63  ;;  %879 = vmatmul.mubr.f32.gmra.mrb[8].mxu1 %v607_v0  ;;  %v572_v0 = vld [vmem:[#allocation2 + $0x188] sm:$0xff] }
  0xaa   : > { %763 = vmatprep.mubr.f32.mxu0 %v539_v1  ;;  %4920 = vmatpush3.bf16.msra.mxu1 %v4917_v57 }
  0xab   : > { %883 = vmatprep.mubr.f32.mxu1 %v611_v3  ;;  %4922 = vmatprep.subr.bf16.mxu1 %v4921_v2 }
  0xac   : > { %1434 = vrot.lane.b32.xlu1 %v1359_v7, %s5310_s30  ;;  %1432 = vrot.lane.b32.xlu0 %v1358_v8, %s5310_s30  ;;  %v575_v7 = vld [vmem:[#allocation2 + $0x1a0] sm:$0xff] }
  0xad   : > { %764 = vmatmul.mubr.f32.gmra.mrb[10].mxu0 %v538_v9  ;;  %884 = vmatmul.mubr.f32.gmra.mrb[10].mxu1 %v610_v10  ;;  %v574_v9 = vld [vmem:[#allocation2 + $0x198] sm:$0xff] }
  0xae   : > { %768 = vmatprep.mubr.f32.mxu0 %v542_v11  ;;  %4924 = vmatpush3.bf16.msra.mxu1 %v4921_v2  ;;  %v571_v2 = vld [vmem:[#allocation2 + $0x180] sm:$0xff] }
  0xaf   : > { %888 = vmatprep.mubr.f32.mxu1 %v614_v13  ;;  %4926 = vmatprep.subr.bf16.mxu1 %v4925_v12  ;;  %v578_v13 = vld [vmem:[#allocation2 + $0x1b8] sm:$0xff] }
  0xb0   : > { %1438 = vrot.lane.b32.xlu1 %v1361_v16, %s5310_s30  ;;  %1436 = vrot.lane.b32.xlu0 %v1360_v17, %s5310_s30 }
  0xb1   : > { %769 = vmatmul.mubr.f32.gmra.mrb[12].mxu0 %v541_v18  ;;  %889 = vmatmul.mubr.f32.gmra.mrb[12].mxu1 %v613_v19  ;;  %v581_v19 = vld [vmem:[#allocation2 + $0x1d0] sm:$0xff] }
  0xb2   : > { %773 = vmatprep.mubr.f32.mxu0 %v545_v20  ;;  %4928 = vmatpush3.bf16.msra.mxu1 %v4925_v12 }
  0xb3   : > { %893 = vmatprep.mubr.f32.mxu1 %v617_v22  ;;  %4930 = vmatprep.subr.bf16.mxu1 %v4929_v21 }
  0xb4   : > { %1442 = vrot.lane.b32.xlu1 %v1363_v23, %s5310_s30  ;;  %1440 = vrot.lane.b32.xlu0 %v1362_v24, %s5310_s30 }
  0xb5   : > { %774 = vmatmul.mubr.f32.gmra.mrb[14].mxu0 %v544_v25  ;;  %894 = vmatmul.mubr.f32.gmra.mrb[14].mxu1 %v616_v26  ;;  %v584_v25 = vld [vmem:[#allocation2 + $0x1e8] sm:$0xff] }
  0xb6   : > { %778 = vmatprep.mubr.f32.mxu0 %v548_v27  ;;  %4932 = vmatpush3.bf16.msra.mxu1 %v4929_v21  ;;  %v580_v21 = vld [vmem:[#allocation2 + $0x1c8] sm:$0xff]  ;;  %v583_v27 = vld [vmem:[#allocation2 + $0x1e0] sm:$0xff] }
  0xb8   : > { %1446 = vrot.lane.b32.xlu1 %v1365_v28, %s5310_s30  ;;  %1444 = vrot.lane.b32.xlu0 %v1364_v29, %s5310_s30 }
  0xb9   : > { %779 = vmatmul.mubr.f32.gmra.mrb[16].mxu0 %v547_v30 }
  0xba   : > { %783 = vmatprep.mubr.f32.mxu0 %v551_v6  ;;  %v587_v6 = vld [vmem:[#allocation2 + $0x200] sm:$0xff] }
  0xbc   : > { %1450 = vrot.lane.b32.xlu1 %v1367_v31, %s5310_s30  ;;  %1448 = vrot.lane.b32.xlu0 %v1366_v32, %s5310_s30  ;;  %v586_v32 = vld [vmem:[#allocation2 + $0x1f8] sm:$0xff] }
  0xbd   : > { %784 = vmatmul.mubr.f32.gmra.mrb[18].mxu0 %v550_v33 }
  0xbe   : > { %788 = vmatprep.mubr.f32.mxu0 %v554_v34 }
  0xc0   : > { %1454 = vrot.lane.b32.xlu1 %v1369_v35, %s5310_s30  ;;  %1452 = vrot.lane.b32.xlu0 %v1368_v36, %s5310_s30  ;;  %v590_v36 = vld [vmem:[#allocation2 + $0x218] sm:$0xff] }
  0xc1   : > { %789 = vmatmul.mubr.f32.gmra.mrb[20].mxu0 %v553_v37 }
  0xc2   : > { %793 = vmatprep.mubr.f32.mxu0 %v557_v38  ;;  %v1374_v38 = vld [vmem:[#allocation3 + $0xd0] sm:$0xff] }
  0xc4   : > { %1458 = vrot.lane.b32.xlu1 %v1371_v39, %s5310_s30  ;;  %1456 = vrot.lane.b32.xlu0 %v1370_v40, %s5310_s30  ;;  %v1377_v39 = vld [vmem:[#allocation3 + $0xe8] sm:$0xff]  ;;  %v589_v40 = vld [vmem:[#allocation2 + $0x210] sm:$0xff] }
  0xc5   : > { %794 = vmatmul.mubr.f32.gmra.mrb[22].mxu0 %v556_v41 }
  0xc6   : > { %798 = vmatprep.mubr.f32.mxu0 %v560_v42 }
  0xc7   : > { %v395_v46 = vpop.permute.xlu0 %394  ;;  %v399_v47 = vpop.permute.xlu1 %398 }
  0xc8   : > { %491 = vst.msk [vmem:[#allocation2 + $0x10] sm:$0xff] %vm490_vm1, %v395_v46  ;;  %493 = vst.msk [vmem:[#allocation2 + $0x40] sm:$0xff] %vm490_vm1, %v399_v47  ;;  %1462 = vrot.lane.b32.xlu1 %v1373_v43, %s5310_s30  ;;  %1460 = vrot.lane.b32.xlu0 %v1372_v44, %s5310_s30  ;;  %v593_v44 = vld [vmem:[#allocation2 + $0x230] sm:$0xff]  ;;  %v1376_v46 = vld [vmem:[#allocation3 + $0xe0] sm:$0xff] }
  0xc9   : > { %799 = vmatmul.mubr.f32.gmra.mrb[24].mxu0 %v559_v45  ;;  %v1379_v47 = vld [vmem:[#allocation3 + $0xf8] sm:$0xff] }
  0xca   : > { %803 = vmatprep.mubr.f32.mxu0 %v563_v48  ;;  %v592_v48 = vld [vmem:[#allocation2 + $0x228] sm:$0xff] }
  0xcb   : > { %v397_v51 = vpop.permute.xlu0 %396  ;;  %v401_v52 = vpop.permute.xlu1 %400 }
  0xcc   : > { %492 = vst.msk [vmem:[#allocation2 + $0x28] sm:$0xff] %vm490_vm1, %v397_v51  ;;  %494 = vst.msk [vmem:[#allocation2 + $0x58] sm:$0xff] %vm490_vm1, %v401_v52  ;;  %1466 = vrot.lane.b32.xlu1 %v1375_v49, %s5310_s30  ;;  %1464 = vrot.lane.b32.xlu0 %v1374_v38, %s5310_s30 }
  0xcd   : > { %804 = vmatmul.mubr.f32.gmra.mrb[26].mxu0 %v562_v50 }
  0xce   : > { %808 = vmatprep.mubr.f32.mxu0 %v566_v53  ;;  %v1378_v53 = vld [vmem:[#allocation3 + $0xf0] sm:$0xff] }
  0xcf   : > { %v525_v55 = vld [vmem:[#allocation2 + $0x10] sm:$0xff]  ;;  %v403_v56 = vpop.permute.xlu0 %402  ;;  %v405_v57 = vpop.permute.xlu1 %404  ;;  %v531_v59 = vld [vmem:[#allocation2 + $0x40] sm:$0xff] }
  0xd0   : > { %4805 = vmatprep.mubr.f32.mxu1 %v525_v55  ;;  %495 = vst.msk [vmem:[#allocation2 + $0x70] sm:$0xff] %vm490_vm1, %v403_v56  ;;  %496 = vst.msk [vmem:[#allocation2 + $0x88] sm:$0xff] %vm490_vm1, %v405_v57  ;;  %1470 = vrot.lane.b32.xlu1 %v1377_v39, %s5310_s30 }
  0xd1   : > { %809 = vmatmul.mubr.f32.gmra.mrb[28].mxu0 %v565_v54  ;;  %1468 = vrot.lane.b32.xlu0 %v1376_v46, %s5310_s30 }
  0xd2   : > { %813 = vmatprep.mubr.f32.mxu0 %v569_v58 }
  0xd3   : > { %v528_v61 = vld [vmem:[#allocation2 + $0x28] sm:$0xff]  ;;  %v407_v62 = vpop.permute.xlu0 %406  ;;  %v409_v63 = vpop.permute.xlu1 %408  ;;  %v534_v1 = vld [vmem:[#allocation2 + $0x58] sm:$0xff] }
  0xd4   : > { %4806 = vmatmul.mubr.f32.vlgmr.msra.gmra.mrb[16].mxu1 %v528_v61  ;;  %497 = vst.msk [vmem:[#allocation2 + $0xa0] sm:$0xff] %vm490_vm1, %v407_v62  ;;  %498 = vst.msk [vmem:[#allocation2 + $0xb8] sm:$0xff] %vm490_vm1, %v409_v63  ;;  %1474 = vrot.lane.b32.xlu1 %v1379_v47, %s5310_s30 }
  0xd5   : > { %4808 = vmatprep.mubr.f32.mxu1 %v531_v59  ;;  %814 = vmatmul.mubr.f32.gmra.mrb[30].mxu0 %v568_v60 }
  0xd6   : > { %818 = vmatprep.mubr.f32.mxu0 %v572_v0  ;;  %1472 = vrot.lane.b32.xlu0 %v1378_v53, %s5310_s30 }
  0xd7   : > { %v411_v3 = vpop.permute.xlu0 %410  ;;  %v413_v4 = vpop.permute.xlu1 %412  ;;  %v537_v5 = vld [vmem:[#allocation2 + $0x70] sm:$0xff]  ;;  %v540_v8 = vld [vmem:[#allocation2 + $0x88] sm:$0xff] }
  0xd8   : > { %4809 = vmatmul.mubr.f32.gmra.mrb[18].mxu1 %v534_v1  ;;  %499 = vst.msk [vmem:[#allocation2 + $0xd0] sm:$0xff] %vm490_vm1, %v411_v3  ;;  %500 = vst.msk [vmem:[#allocation2 + $0xe8] sm:$0xff] %vm490_vm1, %v413_v4 }
  0xd9   : > { %4811 = vmatprep.mubr.f32.mxu1 %v537_v5  ;;  %819 = vmatmul.mubr.f32.gmra.mrb[32].mxu0 %v571_v2 }
  0xda   : > { %823 = vmatprep.mubr.f32.mxu0 %v575_v7 }
  0xdb   : > { %v415_v10 = vpop.permute.xlu0 %414  ;;  %v417_v11 = vpop.permute.xlu1 %416  ;;  %v543_v12 = vld [vmem:[#allocation2 + $0xa0] sm:$0xff]  ;;  %v546_v14 = vld [vmem:[#allocation2 + $0xb8] sm:$0xff] }
  0xdc   : > { %4812 = vmatmul.mubr.f32.gmra.mrb[20].mxu1 %v540_v8  ;;  %501 = vst.msk [vmem:[#allocation2 + $0x100] sm:$0xff] %vm490_vm1, %v415_v10  ;;  %502 = vst.msk [vmem:[#allocation2 + $0x118] sm:$0xff] %vm490_vm1, %v417_v11 }
  0xdd   : > { %4814 = vmatprep.mubr.f32.mxu1 %v543_v12  ;;  %824 = vmatmul.mubr.f32.gmra.mrb[34].mxu0 %v574_v9 }
  0xde   : > { %828 = vmatprep.mubr.f32.mxu0 %v578_v13 }
  0xdf   : > { %v419_v16 = vpop.permute.xlu0 %418  ;;  %v421_v17 = vpop.permute.xlu1 %420  ;;  %v549_v18 = vld [vmem:[#allocation2 + $0xd0] sm:$0xff]  ;;  %v552_v20 = vld [vmem:[#allocation2 + $0xe8] sm:$0xff] }
  0xe0   : > { %4815 = vmatmul.mubr.f32.gmra.mrb[22].mxu1 %v546_v14  ;;  %503 = vst.msk [vmem:[#allocation2 + $0x130] sm:$0xff] %vm490_vm1, %v419_v16  ;;  %504 = vst.msk [vmem:[#allocation2 + $0x148] sm:$0xff] %vm490_vm1, %v421_v17 }
  0xe1   : > { %4817 = vmatprep.mubr.f32.mxu1 %v549_v18  ;;  %829 = vmatmul.mubr.f32.gmra.mrb[36].mxu0 %v577_v15 }
  0xe2   : > { %833 = vmatprep.mubr.f32.mxu0 %v581_v19 }
  0xe3   : > { %v423_v22 = vpop.permute.xlu0 %422  ;;  %v425_v23 = vpop.permute.xlu1 %424  ;;  %v555_v24 = vld [vmem:[#allocation2 + $0x100] sm:$0xff]  ;;  %v558_v26 = vld [vmem:[#allocation2 + $0x118] sm:$0xff] }
  0xe4   : > { %4818 = vmatmul.mubr.f32.gmra.mrb[24].mxu1 %v552_v20  ;;  %505 = vst.msk [vmem:[#allocation2 + $0x160] sm:$0xff] %vm490_vm1, %v423_v22  ;;  %506 = vst.msk [vmem:[#allocation2 + $0x178] sm:$0xff] %vm490_vm1, %v425_v23 }
  0xe5   : > { %4820 = vmatprep.mubr.f32.mxu1 %v555_v24  ;;  %834 = vmatmul.mubr.f32.gmra.mrb[38].mxu0 %v580_v21 }
  0xe6   : > { %838 = vmatprep.mubr.f32.mxu0 %v584_v25 }
  0xe7   : > { %v427_v28 = vpop.permute.xlu0 %426  ;;  %v429_v29 = vpop.permute.xlu1 %428  ;;  %v561_v30 = vld [vmem:[#allocation2 + $0x130] sm:$0xff]  ;;  %v564_v31 = vld [vmem:[#allocation2 + $0x148] sm:$0xff] }
  0xe8   : > { %4821 = vmatmul.mubr.f32.gmra.mrb[26].mxu1 %v558_v26  ;;  %507 = vst.msk [vmem:[#allocation2 + $0x190] sm:$0xff] %vm490_vm1, %v427_v28  ;;  %508 = vst.msk [vmem:[#allocation2 + $0x1a8] sm:$0xff] %vm490_vm1, %v429_v29 }
  0xe9   : > { %4823 = vmatprep.mubr.f32.mxu1 %v561_v30  ;;  %839 = vmatmul.mubr.f32.gmra.mrb[40].mxu0 %v583_v27 }
  0xea   : > { %843 = vmatprep.mubr.f32.mxu0 %v587_v6 }
  0xeb   : > { %v431_v33 = vpop.permute.xlu0 %430  ;;  %v433_v34 = vpop.permute.xlu1 %432  ;;  %v567_v35 = vld [vmem:[#allocation2 + $0x160] sm:$0xff]  ;;  %v570_v37 = vld [vmem:[#allocation2 + $0x178] sm:$0xff] }
  0xec   : > { %4824 = vmatmul.mubr.f32.gmra.mrb[28].mxu1 %v564_v31  ;;  %509 = vst.msk [vmem:[#allocation2 + $0x1c0] sm:$0xff] %vm490_vm1, %v431_v33  ;;  %510 = vst.msk [vmem:[#allocation2 + $0x1d8] sm:$0xff] %vm490_vm1, %v433_v34 }
  0xed   : > { %4826 = vmatprep.mubr.f32.mxu1 %v567_v35  ;;  %844 = vmatmul.mubr.f32.gmra.mrb[42].mxu0 %v586_v32 }
  0xee   : > { %848 = vmatprep.mubr.f32.mxu0 %v590_v36 }
  0xef   : > { %v435_v41 = vpop.permute.xlu0 %434  ;;  %v437_v42 = vpop.permute.xlu1 %436  ;;  %v573_v43 = vld [vmem:[#allocation2 + $0x190] sm:$0xff]  ;;  %v576_v45 = vld [vmem:[#allocation2 + $0x1a8] sm:$0xff] }
  0xf0   : > { %4827 = vmatmul.mubr.f32.gmra.mrb[30].mxu1 %v570_v37  ;;  %511 = vst.msk [vmem:[#allocation2 + $0x1f0] sm:$0xff] %vm490_vm1, %v435_v41  ;;  %512 = vst.msk [vmem:[#allocation2 + $0x208] sm:$0xff] %vm490_vm1, %v437_v42 }
  0xf1   : > { %4829 = vmatprep.mubr.f32.mxu1 %v573_v43  ;;  %849 = vmatmul.mubr.f32.gmra.mrb[44].mxu0 %v589_v40 }
  0xf2   : > { %853 = vmatprep.mubr.f32.mxu0 %v593_v44 }
  0xf3   : > { %v439_v49 = vpop.permute.xlu0 %438  ;;  %v441_v50 = vpop.permute.xlu1 %440  ;;  %v579_v51 = vld [vmem:[#allocation2 + $0x1c0] sm:$0xff]  ;;  %v582_v52 = vld [vmem:[#allocation2 + $0x1d8] sm:$0xff] }
  0xf4   : > { %4830 = vmatmul.mubr.f32.gmra.mrb[32].mxu1 %v576_v45  ;;  %513 = vst.msk [vmem:[#allocation2 + $0x220] sm:$0xff] %vm490_vm1, %v439_v49  ;;  %514 = vst.msk [vmem:[#allocation2 + $0x238] sm:$0xff] %vm490_vm1, %v441_v50 }
  0xf5   : > { %4832 = vmatprep.mubr.f32.mxu1 %v579_v51  ;;  %854 = vmatmul.mubr.f32.gmra.mrb[46].mxu0 %v592_v48 }
  0xf7   : > { %v443_v54 = vpop.permute.xlu0 %442  ;;  %v445_v55 = vpop.permute.xlu1 %444  ;;  %v585_v56 = vld [vmem:[#allocation2 + $0x1f0] sm:$0xff]  ;;  %v588_v57 = vld [vmem:[#allocation2 + $0x208] sm:$0xff] }
  0xf8   : > { %4833 = vmatmul.mubr.f32.gmra.mrb[34].mxu1 %v582_v52  ;;  %515 = vst.msk [vmem:[#allocation2 + $0x250] sm:$0xff] %vm490_vm1, %v443_v54  ;;  %516 = vst.msk [vmem:[#allocation2 + $0x268] sm:$0xff] %vm490_vm1, %v445_v55  ;;  %v5873_v55 = vld [vmem:[%s8123_s2] ss:$0 sm:$0xff] }
  0xf9   : > { %4835 = vmatprep.mubr.f32.mxu1 %v585_v56 }
  0xfb   : > { %v447_v58 = vpop.permute.xlu0 %446  ;;  %v449_v59 = vpop.permute.xlu1 %448  ;;  %v591_v60 = vld [vmem:[#allocation2 + $0x220] sm:$0xff]  ;;  %v594_v61 = vld [vmem:[#allocation2 + $0x238] sm:$0xff] }
  0xfc   : > { %4836 = vmatmul.mubr.f32.gmra.mrb[36].mxu1 %v588_v57  ;;  %517 = vst.msk [vmem:[#allocation2 + $0x280] sm:$0xff] %vm490_vm1, %v447_v58  ;;  %518 = vst.msk [vmem:[#allocation2 + $0x298] sm:$0xff] %vm490_vm1, %v449_v59 }
  0xfd   : > { %4838 = vmatprep.mubr.f32.mxu1 %v591_v60 }
  0xff   : > { %v451_v62 = vpop.permute.xlu0 %450  ;;  %v453_v63 = vpop.permute.xlu1 %452  ;;  %v597_v0 = vld [vmem:[#allocation2 + $0x250] sm:$0xff]  ;;  %v600_v1 = vld [vmem:[#allocation2 + $0x268] sm:$0xff] }
 0x100   : > { %4839 = vmatmul.mubr.f32.gmra.mrb[38].mxu1 %v594_v61  ;;  %519 = vst.msk [vmem:[#allocation2 + $0x2b0] sm:$0xff] %vm490_vm1, %v451_v62  ;;  %520 = vst.msk [vmem:[#allocation2 + $0x2c8] sm:$0xff] %vm490_vm1, %v453_v63 }
 0x101   : > { %4841 = vmatprep.mubr.f32.mxu1 %v597_v0 }
 0x103   : > { %v455_v2 = vpop.permute.xlu0 %454  ;;  %v457_v3 = vpop.permute.xlu1 %456  ;;  %v603_v4 = vld [vmem:[#allocation2 + $0x280] sm:$0xff]  ;;  %v606_v5 = vld [vmem:[#allocation2 + $0x298] sm:$0xff] }
 0x104   : > { %4842 = vmatmul.mubr.f32.gmra.mrb[40].mxu1 %v600_v1  ;;  %521 = vst.msk [vmem:[#allocation2 + $0x2e0] sm:$0xff] %vm490_vm1, %v455_v2  ;;  %522 = vst.msk [vmem:[#allocation2 + $0x2f8] sm:$0xff] %vm490_vm1, %v457_v3 }
 0x105   : > { %4844 = vmatprep.mubr.f32.mxu1 %v603_v4 }
 0x107   : > { %v609_v7 = vld [vmem:[#allocation2 + $0x2b0] sm:$0xff]  ;;  %v612_v8 = vld [vmem:[#allocation2 + $0x2c8] sm:$0xff] }
 0x108   : > { %4845 = vmatmul.mubr.f32.gmra.mrb[42].mxu1 %v606_v5 }
 0x109   : > { %4847 = vmatprep.mubr.f32.mxu1 %v609_v7 }
 0x10b   : > { %v615_v9 = vld [vmem:[#allocation2 + $0x2e0] sm:$0xff]  ;;  %v618_v10 = vld [vmem:[#allocation2 + $0x2f8] sm:$0xff] }
 0x10c   : > { %4848 = vmatmul.mubr.f32.gmra.mrb[44].mxu1 %v612_v8 }
 0x10d   : > { %4850 = vmatprep.mubr.f32.mxu1 %v615_v9 }
 0x110   : > { %4851 = vmatmul.mubr.f32.gmra.mrb[46].mxu1 %v618_v10 }
 0x16c   : > { %v5846_v11 = vpop.f32.mrb[0].mxu1  ;;  %v740_v12 = vpop.f32.mrb[0].mxu0 }
 0x16d   : > { %v862_v13 = vpop.f32.mrb[1].mxu1  ;;  %v742_v14 = vpop.f32.mrb[1].mxu0  ;;  %v741_v58 = vadd.f32 %v5873_v55, %v740_v12 }
 0x170   : > { %v5848_v15 = vpop.f32.mrb[2].mxu1  ;;  %v745_v16 = vpop.f32.mrb[2].mxu0 }
 0x171   : > { %v867_v17 = vpop.f32.mrb[3].mxu1  ;;  %v747_v18 = vpop.f32.mrb[3].mxu0  ;;  %v746_v57 = vadd.f32 %v5873_v55, %v745_v16 }
 0x174   : > { %v5850_v19 = vpop.f32.mrb[4].mxu1  ;;  %v750_v20 = vpop.f32.mrb[4].mxu0 }
 0x175   : > { %v872_v21 = vpop.f32.mrb[5].mxu1  ;;  %v752_v22 = vpop.f32.mrb[5].mxu0  ;;  %v751_v2 = vadd.f32 %v5873_v55, %v750_v20 }
 0x178   : > { %v5852_v23 = vpop.f32.mrb[6].mxu1  ;;  %v755_v24 = vpop.f32.mrb[6].mxu0 }
 0x179   : > { %v877_v25 = vpop.f32.mrb[7].mxu1  ;;  %v757_v26 = vpop.f32.mrb[7].mxu0  ;;  %v756_v1 = vadd.f32 %v5873_v55, %v755_v24 }
 0x17c   : > { %v5854_v27 = vpop.f32.mrb[8].mxu1  ;;  %v760_v28 = vpop.f32.mrb[8].mxu0 }
 0x17d   : > { %v882_v29 = vpop.f32.mrb[9].mxu1  ;;  %v762_v30 = vpop.f32.mrb[9].mxu0  ;;  %v761_v12 = vadd.f32 %v5873_v55, %v760_v28 }
 0x180   : > { %v5856_v6 = vpop.f32.mrb[10].mxu1  ;;  %v765_v31 = vpop.f32.mrb[10].mxu0 }
 0x181   : > { %v887_v32 = vpop.f32.mrb[11].mxu1  ;;  %v767_v33 = vpop.f32.mrb[11].mxu0  ;;  %v766_v7 = vadd.f32 %v5873_v55, %v765_v31 }
 0x184   : > { %v5858_v34 = vpop.f32.mrb[12].mxu1  ;;  %v770_v35 = vpop.f32.mrb[12].mxu0 }
 0x185   : > { %v892_v36 = vpop.f32.mrb[13].mxu1  ;;  %v772_v37 = vpop.f32.mrb[13].mxu0  ;;  %v771_v20 = vadd.f32 %v5873_v55, %v770_v35 }
 0x188   : > { %v5860_v38 = vpop.f32.mrb[14].mxu1  ;;  %v775_v39 = vpop.f32.mrb[14].mxu0 }
 0x189   : > { %v897_v40 = vpop.f32.mrb[15].mxu1  ;;  %v777_v41 = vpop.f32.mrb[15].mxu0  ;;  %v776_v17 = vadd.f32 %v5873_v55, %v775_v39 }
 0x18c   : > { %v780_v42 = vpop.f32.mrb[16].mxu0 }
 0x18d   : > { %v782_v43 = vpop.f32.mrb[17].mxu0  ;;  %v781_v32 = vadd.f32 %v5873_v55, %v780_v42 }
 0x190   : > { %v785_v44 = vpop.f32.mrb[18].mxu0 }
 0x191   : > { %v787_v45 = vpop.f32.mrb[19].mxu0  ;;  %v786_v29 = vadd.f32 %v5873_v55, %v785_v44 }
 0x194   : > { %v5862_v46 = vpop.f32.mrb[20].mxu0 }
 0x195   : > { %v792_v47 = vpop.f32.mrb[21].mxu0  ;;  %v791_v44 = vadd.f32 %v5873_v55, %v5862_v46 }
 0x198   : > { %v795_v48 = vpop.f32.mrb[22].mxu0 }
 0x199   : > { %v797_v49 = vpop.f32.mrb[23].mxu0  ;;  %v796_v41 = vadd.f32 %v5873_v55, %v795_v48 }
 0x19c   : > { %v5864_v50 = vpop.f32.mrb[24].mxu0 }
 0x19d   : > { %v802_v51 = vpop.f32.mrb[25].mxu0  ;;  %v801_v46 = vadd.f32 %v5873_v55, %v5864_v50 }
 0x1a0   : > { %v5866_v52 = vpop.f32.mrb[26].mxu0 }
 0x1a1   : > { %v807_v53 = vpop.f32.mrb[27].mxu0  ;;  %v806_v48 = vadd.f32 %v5873_v55, %v5866_v52 }
 0x1a4   : > { %v5868_v54 = vpop.f32.mrb[28].mxu0 }
 0x1a5   : > { %v812_v56 = vpop.f32.mrb[29].mxu0  ;;  %v811_v50 = vadd.f32 %v5873_v55, %v5868_v54 }
 0x1a7   : > { %v4807_v59 = vpop.f32.mrb[16].mxu1 }
 0x1a8   : > { %v5877_v60 = vadd.f32 %v4807_v59, %v746_v57  ;;  %v965_v61 = vpop.f32.mrb[17].mxu1  ;;  %v5879_v62 = vpop.f32.mrb[30].mxu0 }
 0x1a9   : > { %v5881_v63 = vadd.f32 %v965_v61, %v741_v58  ;;  %v817_v0 = vpop.f32.mrb[31].mxu0  ;;  %v816_v52 = vadd.f32 %v5873_v55, %v5879_v62 }
 0x1aa   : > { %5013 = vtanh.f32 %v5877_v60 }
 0x1ab   : > { %5015 = vtanh.f32 %v5881_v63  ;;  %v4810_v3 = vpop.f32.mrb[18].mxu1 }
 0x1ac   : > { %v5887_v4 = vadd.f32 %v4810_v3, %v756_v1  ;;  %v975_v5 = vpop.f32.mrb[19].mxu1  ;;  %v5890_v8 = vpop.f32.mrb[32].mxu0 }
 0x1ad   : > { %v5892_v9 = vadd.f32 %v975_v5, %v751_v2  ;;  %v822_v10 = vpop.f32.mrb[33].mxu0 }
 0x1ae   : > { %5017 = vtanh.f32 %v5887_v4 }
 0x1af   : > { %5019 = vtanh.f32 %v5892_v9  ;;  %v4813_v13 = vpop.f32.mrb[20].mxu1 }
 0x1b0   : > { %v5897_v14 = vadd.f32 %v4813_v13, %v766_v7  ;;  %v985_v16 = vpop.f32.mrb[21].mxu1  ;;  %v825_v18 = vpop.f32.mrb[34].mxu0 }
 0x1b1   : > { %v5901_v21 = vadd.f32 %v985_v16, %v761_v12  ;;  %v827_v22 = vpop.f32.mrb[35].mxu0  ;;  %v826_v62 = vadd.f32 %v5873_v55, %v825_v18 }
 0x1b2   : > { %5021 = vtanh.f32 %v5897_v14  ;;  %v821_v22 = vadd.f32 %v5873_v55, %v5890_v8 }
 0x1b3   : > { %5023 = vtanh.f32 %v5901_v21  ;;  %v4816_v24 = vpop.f32.mrb[22].mxu1 }
 0x1b4   : > { %v5014_v25 = vpop.eup %5013  ;;  %v5905_v26 = vadd.f32 %v4816_v24, %v776_v17  ;;  %v995_v28 = vpop.f32.mrb[23].mxu1 }
 0x1b5   : > { %v5908_v30 = vpop.f32.mrb[36].mxu0  ;;  %v5016_v31 = vpop.eup %5015  ;;  %v5911_v33 = vadd.f32 %v995_v28, %v771_v20  ;;  %1574 = vrot.lane.b32.xlu1 %v5014_v25, %s5310_s30 }
 0x1b6   : > { %v832_v35 = vpop.f32.mrb[37].mxu0  ;;  %5025 = vtanh.f32 %v5905_v26  ;;  %1572 = vrot.lane.b32.xlu0 %v5016_v31, %s5310_s30  ;;  %v831_v18 = vadd.f32 %v5873_v55, %v5908_v30 }
 0x1b7   : > { %5027 = vtanh.f32 %v5911_v33  ;;  %v4819_v36 = vpop.f32.mrb[24].mxu1 }
 0x1b8   : > { %v5018_v37 = vpop.eup %5017  ;;  %v5917_v39 = vadd.f32 %v4819_v36, %v786_v29  ;;  %v1005_v40 = vpop.f32.mrb[25].mxu1 }
 0x1b9   : > { %v835_v43 = vpop.f32.mrb[38].mxu0  ;;  %v5020_v42 = vpop.eup %5019  ;;  %v5922_v45 = vadd.f32 %v1005_v40, %v781_v32  ;;  %1578 = vrot.lane.b32.xlu1 %v5018_v37, %s5310_s30 }
 0x1ba   : > { %v837_v47 = vpop.f32.mrb[39].mxu0  ;;  %1576 = vrot.lane.b32.xlu0 %v5020_v42, %s5310_s30  ;;  %5029 = vtanh.f32 %v5917_v39  ;;  %v836_v31 = vadd.f32 %v5873_v55, %v835_v43  ;;  %v5959_v36 = vpop.permute.xlu1 %1414 }
 0x1bb   : > { %v4822_v49 = vpop.f32.mrb[26].mxu1  ;;  %5031 = vtanh.f32 %v5922_v45  ;;  %v5966_v40 = vpop.permute.xlu0 %1412 }
 0x1bc   : > { %v5022_v51 = vpop.eup %5021  ;;  %v5926_v53 = vadd.f32 %v4822_v49, %v796_v41  ;;  %v1015_v56 = vpop.f32.mrb[27].mxu1 }
 0x1bd   : > { %v840_v57 = vpop.f32.mrb[40].mxu0  ;;  %v5024_v58 = vpop.eup %5023  ;;  %v5932_v59 = vadd.f32 %v1015_v56, %v791_v44  ;;  %1582 = vrot.lane.b32.xlu1 %v5022_v51, %s5310_s30 }
 0x1be   : > { %v842_v61 = vpop.f32.mrb[41].mxu0  ;;  %1580 = vrot.lane.b32.xlu0 %v5024_v58, %s5310_s30  ;;  %5033 = vtanh.f32 %v5926_v53  ;;  %v841_v30 = vadd.f32 %v5873_v55, %v840_v57  ;;  %v5978_v51 = vpop.permute.xlu1 %1418 }
 0x1bf   : > { %v4825_v0 = vpop.f32.mrb[28].mxu1  ;;  %5035 = vtanh.f32 %v5932_v59  ;;  %v5980_v58 = vpop.permute.xlu0 %1416 }
 0x1c0   : > { %v5026_v1 = vpop.eup %5025  ;;  %v5937_v2 = vadd.f32 %v4825_v0, %v806_v48  ;;  %v1025_v3 = vpop.f32.mrb[29].mxu1 }
 0x1c1   : > { %v845_v5 = vpop.f32.mrb[42].mxu0  ;;  %v5028_v7 = vpop.eup %5027  ;;  %v5943_v10 = vadd.f32 %v1025_v3, %v801_v46  ;;  %1586 = vrot.lane.b32.xlu1 %v5026_v1, %s5310_s30 }
 0x1c2   : > { %v847_v12 = vpop.f32.mrb[43].mxu0  ;;  %1584 = vrot.lane.b32.xlu0 %v5028_v7, %s5310_s30  ;;  %5037 = vtanh.f32 %v5937_v2  ;;  %v846_v44 = vadd.f32 %v5873_v55, %v845_v5 }
 0x1c3   : > { %v4828_v13 = vpop.f32.mrb[30].mxu1  ;;  %5039 = vtanh.f32 %v5943_v10 }
 0x1c4   : > { %v5948_v16 = vadd.f32 %v4828_v13, %v816_v52  ;;  %v1035_v17 = vpop.f32.mrb[31].mxu1  ;;  %v850_v20 = vpop.f32.mrb[44].mxu0 }
 0x1c5   : > { %v5953_v54 = vadd.f32 %v1035_v17, %v811_v50  ;;  %v852_v24 = vpop.f32.mrb[45].mxu0  ;;  %v5030_v35 = vpop.eup %5029  ;;  %v851_v57 = vadd.f32 %v5873_v55, %v850_v20  ;;  %v866_v17 = vadd.f32 %v5873_v55, %v5848_v15  ;;  %v861_v20 = vadd.f32 %v5873_v55, %v5846_v11 }
 0x1c6   : > { %1590 = vrot.lane.b32.xlu1 %v5030_v35, %s5310_s30  ;;  %v5032_v47 = vpop.eup %5031  ;;  %5041 = vtanh.f32 %v5948_v16  ;;  %v5994_v50 = vpop.permute.xlu1 %1422  ;;  %v871_v11 = vadd.f32 %v5873_v55, %v5850_v19  ;;  %v881_v19 = vadd.f32 %v5873_v55, %v5854_v27  ;;  %v891_v27 = vadd.f32 %v5873_v55, %v5858_v34 }
 0x1c7   : > { %v4831_v25 = vpop.f32.mrb[32].mxu1  ;;  %1588 = vrot.lane.b32.xlu0 %v5032_v47, %s5310_s30  ;;  %5043 = vtanh.f32 %v5953_v54 }
 0x1c8   : > { %v5956_v28 = vadd.f32 %v4831_v25, %v826_v62  ;;  %v1045_v29 = vpop.f32.mrb[33].mxu1  ;;  %v855_v32 = vpop.f32.mrb[46].mxu0 }
 0x1c9   : > { %v5963_v37 = vadd.f32 %v1045_v29, %v821_v22  ;;  %v857_v8 = vpop.f32.mrb[47].mxu0  ;;  %v5034_v48 = vpop.eup %5033  ;;  %v856_v0 = vadd.f32 %v5873_v55, %v855_v32  ;;  %v876_v32 = vadd.f32 %v5873_v55, %v5852_v23  ;;  %v886_v23 = vadd.f32 %v5873_v55, %v5856_v6 }
 0x1ca   : > { %1594 = vrot.lane.b32.xlu1 %v5034_v48, %s5310_s30  ;;  %v5036_v52 = vpop.eup %5035  ;;  %v6000_v62 = vpop.permute.xlu0 %1420  ;;  %5045 = vtanh.f32 %v5956_v28  ;;  %v896_v6 = vadd.f32 %v5873_v55, %v5860_v38 }
 0x1cb   : > { %v4834_v41 = vpop.f32.mrb[34].mxu1  ;;  %1592 = vrot.lane.b32.xlu0 %v5036_v52, %s5310_s30  ;;  %5047 = vtanh.f32 %v5963_v37  ;;  %v6016_v15 = vpop.permute.xlu1 %1426 }
 0x1cc   : > { %v5970_v43 = vadd.f32 %v4834_v41, %v836_v31  ;;  %v1055_v42 = vpop.f32.mrb[35].mxu1  ;;  %v5038_v13 = vpop.eup %5037 }
 0x1cd   : > { %v5974_v49 = vadd.f32 %v1055_v42, %v831_v18  ;;  %v5040_v29 = vpop.eup %5039 }
 0x1ce   : > { %1598 = vrot.lane.b32.xlu1 %v5038_v13, %s5310_s30  ;;  %v6018_v8 = vpop.permute.xlu0 %1424  ;;  %5049 = vtanh.f32 %v5970_v43 }
 0x1cf   : > { %v4837_v56 = vpop.f32.mrb[36].mxu1  ;;  %1596 = vrot.lane.b32.xlu0 %v5040_v29, %s5310_s30  ;;  %5051 = vtanh.f32 %v5974_v49 }
 0x1d0   : > { %v5982_v46 = vadd.f32 %v4837_v56, %v846_v44  ;;  %v1065_v61 = vpop.f32.mrb[37].mxu1  ;;  %v5042_v18 = vpop.eup %5041 }
 0x1d1   : > { %v5987_v1 = vadd.f32 %v1065_v61, %v841_v30  ;;  %v5044_v47 = vpop.eup %5043 }
 0x1d2   : > { %1602 = vrot.lane.b32.xlu1 %v5042_v18, %s5310_s30  ;;  %5053 = vtanh.f32 %v5982_v46 }
 0x1d3   : > { %v4840_v3 = vpop.f32.mrb[38].mxu1  ;;  %1600 = vrot.lane.b32.xlu0 %v5044_v47, %s5310_s30  ;;  %5055 = vtanh.f32 %v5987_v1 }
 0x1d4   : > { %v5990_v5 = vadd.f32 %v4840_v3, %v856_v0  ;;  %v1075_v7 = vpop.f32.mrb[39].mxu1  ;;  %v5046_v61 = vpop.eup %5045 }
 0x1d5   : > { %v5996_v12 = vadd.f32 %v1075_v7, %v851_v57  ;;  %v6034_v0 = vpop.permute.xlu1 %1430  ;;  %v6040_v3 = vpop.permute.xlu0 %1428 }
 0x1d6   : > { %1606 = vrot.lane.b32.xlu1 %v5046_v61, %s5310_s30  ;;  %v5048_v7 = vpop.eup %5047  ;;  %5057 = vtanh.f32 %v5990_v5 }
 0x1d7   : > { %v4843_v22 = vpop.f32.mrb[40].mxu1  ;;  %1604 = vrot.lane.b32.xlu0 %v5048_v7, %s5310_s30  ;;  %5059 = vtanh.f32 %v5996_v12 }
 0x1d8   : > { %v6006_v24 = vadd.f32 %v4843_v22, %v866_v17  ;;  %v1085_v25 = vpop.f32.mrb[41].mxu1  ;;  %v5050_v22 = vpop.eup %5049 }
 0x1d9   : > { %v6008_v31 = vadd.f32 %v1085_v25, %v861_v20  ;;  %v6052_v38 = vpop.permute.xlu1 %1434  ;;  %v6054_v25 = vpop.permute.xlu0 %1432 }
 0x1da   : > { %1610 = vrot.lane.b32.xlu1 %v5050_v22, %s5310_s30  ;;  %v5052_v34 = vpop.eup %5051  ;;  %5061 = vtanh.f32 %v6006_v24 }
 0x1db   : > { %v4846_v35 = vpop.f32.mrb[42].mxu1  ;;  %1608 = vrot.lane.b32.xlu0 %v5052_v34, %s5310_s30  ;;  %5063 = vtanh.f32 %v6008_v31  ;;  %v4689_v34 = vmul.f32 -1.442695, %v5877_v60  ;;  %v4693_v60 = vmul.f32 -1.442695, %v5897_v14 }
 0x1dc   : > { %v6020_v41 = vadd.f32 %v4846_v35, %v876_v32  ;;  %v1095_v42 = vpop.f32.mrb[43].mxu1  ;;  %v5054_v29 = vpop.eup %5053 }
 0x1dd   : > { %v6023_v44 = vadd.f32 %v1095_v42, %v871_v11  ;;  %v6060_v55 = vpop.permute.xlu1 %1438  ;;  %v6062_v32 = vpop.permute.xlu0 %1436 }
 0x1de   : > { %1614 = vrot.lane.b32.xlu1 %v5054_v29, %s5310_s30  ;;  %v5056_v11 = vpop.eup %5055  ;;  %5065 = vtanh.f32 %v6020_v41 }
 0x1df   : > { %v4849_v30 = vpop.f32.mrb[44].mxu1  ;;  %1612 = vrot.lane.b32.xlu0 %v5056_v11, %s5310_s30  ;;  %5067 = vtanh.f32 %v6023_v44  ;;  %v4688_v11 = vmul.f32 -1.442695, %v5881_v63  ;;  %v4692_v63 = vmul.f32 -1.442695, %v5901_v21 }
 0x1e0   : > { %v6031_v56 = vadd.f32 %v4849_v30, %v886_v23  ;;  %v1105_v48 = vpop.f32.mrb[45].mxu1  ;;  %v5058_v18 = vpop.eup %5057 }
 0x1e1   : > { %v6036_v57 = vadd.f32 %v1105_v48, %v881_v19  ;;  %v6068_v35 = vpop.permute.xlu1 %1442  ;;  %v6070_v42 = vpop.permute.xlu0 %1440 }
 0x1e2   : > { %1618 = vrot.lane.b32.xlu1 %v5058_v18, %s5310_s30  ;;  %v5060_v23 = vpop.eup %5059  ;;  %5069 = vtanh.f32 %v6031_v56 }
 0x1e3   : > { %v4852_v52 = vpop.f32.mrb[46].mxu1  ;;  %1616 = vrot.lane.b32.xlu0 %v5060_v23, %s5310_s30  ;;  %5071 = vtanh.f32 %v6036_v57 }
 0x1e4   : > { %v6046_v13 = vadd.f32 %v4852_v52, %v896_v6  ;;  %v1115_v17 = vpop.f32.mrb[47].mxu1  ;;  %v5062_v19 = vpop.eup %5061 }
 0x1e5   : > { %v6049_v20 = vadd.f32 %v1115_v17, %v891_v27  ;;  %v6076_v47 = vpop.permute.xlu1 %1446  ;;  %v6078_v30 = vpop.permute.xlu0 %1444 }
 0x1e6   : > { %1622 = vrot.lane.b32.xlu1 %v5062_v19, %s5310_s30  ;;  %v5064_v48 = vpop.eup %5063  ;;  %5073 = vtanh.f32 %v6046_v13  ;;  %v4691_v19 = vmul.f32 -1.442695, %v5887_v4  ;;  %v4695_v4 = vmul.f32 -1.442695, %v5905_v26 }
 0x1e7   : > { %1620 = vrot.lane.b32.xlu0 %v5064_v48, %s5310_s30  ;;  %5075 = vtanh.f32 %v6049_v20 }
 0x1e8   : > { %v5066_v6 = vpop.eup %5065  ;;  %5077 = vpow2.f32 %v4689_v34 }
 0x1e9   : > { %v6084_v61 = vpop.permute.xlu1 %1450  ;;  %v6086_v27 = vpop.permute.xlu0 %1448  ;;  %5079 = vpow2.f32 %v4688_v11 }
 0x1ea   : > { %1626 = vrot.lane.b32.xlu1 %v5066_v6, %s5310_s30  ;;  %v5068_v52 = vpop.eup %5067  ;;  %v4690_v6 = vmul.f32 -1.442695, %v5892_v9  ;;  %5081 = vpow2.f32 %v4691_v19  ;;  %v4694_v9 = vmul.f32 -1.442695, %v5911_v33 }
 0x1eb   : > { %1624 = vrot.lane.b32.xlu0 %v5068_v52, %s5310_s30 }
 0x1ec   : > { %v5070_v17 = vpop.eup %5069  ;;  %5083 = vpow2.f32 %v4690_v6 }
 0x1ed   : > { %v6092_v7 = vpop.permute.xlu1 %1454  ;;  %v6094_v22 = vpop.permute.xlu0 %1452  ;;  %5085 = vpow2.f32 %v4693_v60 }
 0x1ee   : > { %1630 = vrot.lane.b32.xlu1 %v5070_v17, %s5310_s30  ;;  %v5072_v29 = vpop.eup %5071  ;;  %5087 = vpow2.f32 %v4692_v63 }
 0x1ef   : > { %1628 = vrot.lane.b32.xlu0 %v5072_v29, %s5310_s30  ;;  %5089 = vpow2.f32 %v4695_v4  ;;  %v4696_v4 = vmul.f32 -1.442695, %v5922_v45 }
 0x1f0   : > { %v5074_v23 = vpop.eup %5073  ;;  %5091 = vpow2.f32 %v4694_v9 }
 0x1f1   : > { %v6100_v18 = vpop.permute.xlu1 %1458  ;;  %v6103_v48 = vpop.permute.xlu0 %1456 }
 0x1f2   : > { %1634 = vrot.lane.b32.xlu1 %v5074_v23, %s5310_s30  ;;  %v5076_v52 = vpop.eup %5075 }
 0x1f3   : > { %1632 = vrot.lane.b32.xlu0 %v5076_v52, %s5310_s30  ;;  %v5078_v29 = vpop.eup %5077 }
 0x1f4   : > { %v5080_v11 = vpop.eup %5079  ;;  %v1221_v19 = vadd.f32 1.0, %v5078_v29 }
 0x1f5   : > { %v6110_v17 = vpop.permute.xlu1 %1462  ;;  %v6112_v34 = vpop.permute.xlu0 %1460  ;;  %v1220_v6 = vadd.f32 1.0, %v5080_v11 }
 0x1f6   : > { %8263 = vst [vmem:[#allocation4_spill] sm:$0xff] %v6110_v17  ;;  %8264 = vst [vmem:[#allocation5_spill] sm:$0xff] %v6112_v34  ;;  %v5082_v21 = vpop.eup %5081  ;;  %v4697_v34 = vmul.f32 -1.442695, %v5917_v39  ;;  %5093 = vrcp.f32 %v1221_v19  ;;  %v4699_v39 = vmul.f32 -1.442695, %v5926_v53 }
 0x1f7   : > { %v5084_v52 = vpop.eup %5083  ;;  %v1223_v60 = vadd.f32 1.0, %v5082_v21  ;;  %5095 = vrcp.f32 %v1220_v6 }
 0x1f8   : > { %v5086_v63 = vpop.eup %5085  ;;  %v1222_v33 = vadd.f32 1.0, %v5084_v52  ;;  %5097 = vpow2.f32 %v4697_v34 }
 0x1f9   : > { %v6116_v23 = vpop.permute.xlu1 %1466  ;;  %v6118_v14 = vpop.permute.xlu0 %1464  ;;  %5099 = vrcp.f32 %v1223_v60  ;;  %v1225_v9 = vadd.f32 1.0, %v5086_v63 }
 0x1fa   : > { %8265 = vst [vmem:[#allocation6_spill] sm:$0xff] %v6116_v23  ;;  %8266 = vst [vmem:[#allocation7_spill] sm:$0xff] %v6118_v14  ;;  %v5088_v23 = vpop.eup %5087  ;;  %5101 = vrcp.f32 %v1222_v33 }
 0x1fb   : > { %v5090_v29 = vpop.eup %5089  ;;  %v1224_v11 = vadd.f32 1.0, %v5088_v23  ;;  %5103 = vpow2.f32 %v4696_v4  ;;  %v4698_v23 = vmul.f32 -1.442695, %v5932_v59 }
 0x1fc   : > { %v5092_v14 = vpop.eup %5091  ;;  %5105 = vrcp.f32 %v1225_v9  ;;  %v1227_v6 = vadd.f32 1.0, %v5090_v29  ;;  %v4701_v9 = vmul.f32 -1.442695, %v5937_v2 }
 0x1fd   : > { %v6121_v26 = vpop.permute.xlu1 %1470  ;;  %v6123_v17 = vpop.permute.xlu0 %1468  ;;  %5107 = vrcp.f32 %v1224_v11  ;;  %v1226_v52 = vadd.f32 1.0, %v5092_v14 }
 0x1fe   : > { %8267 = vst [vmem:[#allocation8_spill] sm:$0xff] %v6121_v26  ;;  %8268 = vst [vmem:[#allocation9_spill] sm:$0xff] %v6123_v17  ;;  %5109 = vpow2.f32 %v4699_v39 }
 0x1ff   : > { %5111 = vrcp.f32 %v1227_v6  ;;  %v4700_v6 = vmul.f32 -1.442695, %v5943_v10 }
 0x200   : > { %v6131_v34 = vpop.eup %5093  ;;  %5113 = vrcp.f32 %v1226_v52 }
 0x201   : > { %v6127_v19 = vpop.permute.xlu1 %1474  ;;  %v6129_v21 = vpop.permute.xlu0 %1472  ;;  %5115 = vpow2.f32 %v4698_v23  ;;  %v4703_v23 = vmul.f32 -1.442695, %v5948_v16 }
 0x202   : > { %8269 = vst [vmem:[#allocation10_spill] sm:$0xff] %v6127_v19  ;;  %8270 = vst [vmem:[#allocation11_spill] sm:$0xff] %v6129_v21  ;;  %v6133_v60 = vpop.eup %5095  ;;  %5117 = vpow2.f32 %v4701_v9 }
 0x203   : > { %v5098_v4 = vpop.eup %5097  ;;  %5119 = vpow2.f32 %v4700_v6 }
 0x204   : > { %v6140_v14 = vpop.eup %5099 }
 0x205   : > { %v6143_v11 = vpop.eup %5101 }
 0x206   : > { %v5104_v52 = vpop.eup %5103 }
 0x207   : > { %v6149_v2 = vpop.eup %5105 }
 0x227   : > { %v1575_v45 = vpop.permute.xlu1 %1574 }
 0x228   : > { %v1669_v63 = vmul.f32 %v6131_v34, %v1575_v45  ;;  %v1573_v53 = vpop.permute.xlu0 %1572 }
 0x229   : > { %v1668_v33 = vmul.f32 %v6133_v60, %v1573_v53  ;;  %v1229_v53 = vadd.f32 1.0, %v5098_v4  ;;  %v1228_v4 = vadd.f32 1.0, %v5104_v52 }
 0x22a   : > { %1734 = vrot.lane.b32.xlu1 %v1669_v63, %s5310_s30 }
 0x22b   : > { %v1579_v29 = vpop.permute.xlu1 %1578  ;;  %1732 = vrot.lane.b32.xlu0 %v1668_v33, %s5310_s30  ;;  %v6152_v33 = vpop.eup %5107  ;;  %5121 = vrcp.f32 %v1229_v53 }
 0x22c   : > { %v1671_v59 = vmul.f32 %v6140_v14, %v1579_v29  ;;  %v1577_v39 = vpop.permute.xlu0 %1576  ;;  %v5110_v10 = vpop.eup %5109  ;;  %5123 = vpow2.f32 %v4703_v23 }
 0x22d   : > { %v1670_v45 = vmul.f32 %v6143_v11, %v1577_v39  ;;  %v6158_v9 = vpop.eup %5111  ;;  %v1231_v16 = vadd.f32 1.0, %v5110_v10  ;;  %5125 = vrcp.f32 %v1228_v4 }
 0x22e   : > { %1738 = vrot.lane.b32.xlu1 %v1671_v59, %s5310_s30  ;;  %v4702_v59 = vmul.f32 -1.442695, %v5953_v54  ;;  %v6162_v19 = vpop.eup %5113 }
 0x22f   : > { %v1583_v63 = vpop.permute.xlu1 %1582  ;;  %1736 = vrot.lane.b32.xlu0 %v1670_v45, %s5310_s30  ;;  %v5116_v53 = vpop.eup %5115 }
 0x230   : > { %v1673_v29 = vmul.f32 %v6149_v2, %v1583_v63  ;;  %v1581_v21 = vpop.permute.xlu0 %1580  ;;  %5127 = vpow2.f32 %v4702_v59  ;;  %v5118_v54 = vpop.eup %5117  ;;  %v1230_v10 = vadd.f32 1.0, %v5116_v53 }
 0x231   : > { %v1672_v39 = vmul.f32 %v6152_v33, %v1581_v21  ;;  %v4705_v21 = vmul.f32 -1.442695, %v5956_v28  ;;  %5129 = vrcp.f32 %v1231_v16  ;;  %v5120_v23 = vpop.eup %5119  ;;  %v4707_v28 = vmul.f32 -1.442695, %v5970_v43 }
 0x232   : > { %1742 = vrot.lane.b32.xlu1 %v1673_v29, %s5310_s30  ;;  %v4704_v29 = vmul.f32 -1.442695, %v5963_v37  ;;  %v4706_v16 = vmul.f32 -1.442695, %v5974_v49 }
 0x233   : > { %v1587_v45 = vpop.permute.xlu1 %1586  ;;  %1740 = vrot.lane.b32.xlu0 %v1672_v39, %s5310_s30  ;;  %5131 = vpow2.f32 %v4705_v21  ;;  %v1233_v39 = vadd.f32 1.0, %v5118_v54 }
 0x234   : > { %v1675_v63 = vmul.f32 %v6158_v9, %v1587_v45  ;;  %v1585_v6 = vpop.permute.xlu0 %1584  ;;  %5133 = vpow2.f32 %v4704_v29  ;;  %v4709_v29 = vmul.f32 -1.442695, %v5982_v46  ;;  %v4711_v46 = vmul.f32 -1.442695, %v5990_v5 }
 0x235   : > { %v1674_v52 = vmul.f32 %v6162_v19, %v1585_v6  ;;  %v6170_v45 = vpop.eup %5121  ;;  %5135 = vrcp.f32 %v1230_v10 }
 0x236   : > { %1746 = vrot.lane.b32.xlu1 %v1675_v63, %s5310_s30  ;;  %v5124_v59 = vpop.eup %5123  ;;  %v1232_v63 = vadd.f32 1.0, %v5120_v23  ;;  %5137 = vrcp.f32 %v1233_v39 }
 0x237   : > { %1744 = vrot.lane.b32.xlu0 %v1674_v52, %s5310_s30  ;;  %v6176_v37 = vpop.eup %5125  ;;  %5139 = vpow2.f32 %v4707_v28  ;;  %v1235_v53 = vadd.f32 1.0, %v5124_v59  ;;  %v4708_v28 = vmul.f32 -1.442695, %v5987_v1 }
 0x238   : > { %v1591_v6 = vpop.permute.xlu1 %1590  ;;  %5141 = vrcp.f32 %v1232_v63 }
 0x239   : > { %v1677_v4 = vmul.f32 %v6170_v45, %v1591_v6  ;;  %v1589_v21 = vpop.permute.xlu0 %1588  ;;  %5143 = vpow2.f32 %v4706_v16 }
 0x23a   : > { %v5128_v52 = vpop.eup %5127  ;;  %v1676_v54 = vmul.f32 %v6176_v37, %v1589_v21  ;;  %5145 = vrcp.f32 %v1235_v53 }
 0x23b   : > { %1750 = vrot.lane.b32.xlu1 %v1677_v4, %s5310_s30  ;;  %v6179_v43 = vpop.eup %5129  ;;  %v1234_v49 = vadd.f32 1.0, %v5128_v52  ;;  %5147 = vpow2.f32 %v4709_v29  ;;  %v4710_v29 = vmul.f32 -1.442695, %v5996_v12 }
 0x23c   : > { %v1595_v23 = vpop.permute.xlu1 %1594  ;;  %1748 = vrot.lane.b32.xlu0 %v1676_v54, %s5310_s30 }
 0x23d   : > { %v5132_v10 = vpop.eup %5131  ;;  %v1679_v39 = vmul.f32 %v6179_v43, %v1595_v23  ;;  %v1593_v63 = vpop.permute.xlu0 %1592  ;;  %5149 = vrcp.f32 %v1234_v49 }
 0x23e   : > { %v5134_v6 = vpop.eup %5133  ;;  %v1237_v4 = vadd.f32 1.0, %v5132_v10  ;;  %5151 = vpow2.f32 %v4708_v28  ;;  %v4713_v28 = vmul.f32 -1.442695, %v6006_v24 }
 0x23f   : > { %1754 = vrot.lane.b32.xlu1 %v1679_v39, %s5310_s30  ;;  %v6186_v59 = vpop.eup %5135  ;;  %v1236_v52 = vadd.f32 1.0, %v5134_v6 }
 0x240   : > { %v1678_v16 = vmul.f32 %v6186_v59, %v1593_v63  ;;  %v6190_v21 = vpop.eup %5137  ;;  %v1599_v53 = vpop.permute.xlu1 %1598  ;;  %5153 = vrcp.f32 %v1237_v4 }
 0x241   : > { %v5140_v54 = vpop.eup %5139  ;;  %v1681_v1 = vmul.f32 %v6190_v21, %v1599_v53  ;;  %5155 = vpow2.f32 %v4711_v46  ;;  %v1597_v23 = vpop.permute.xlu0 %1596 }
 0x242   : > { %1752 = vrot.lane.b32.xlu0 %v1678_v16, %s5310_s30  ;;  %v6195_v10 = vpop.eup %5141  ;;  %5157 = vrcp.f32 %v1236_v52  ;;  %v1239_v49 = vadd.f32 1.0, %v5140_v54  ;;  %v4712_v16 = vmul.f32 -1.442695, %v6008_v31 }
 0x243   : > { %1758 = vrot.lane.b32.xlu1 %v1681_v1, %s5310_s30  ;;  %v5144_v5 = vpop.eup %5143  ;;  %v1680_v39 = vmul.f32 %v6195_v10, %v1597_v23  ;;  %5159 = vpow2.f32 %v4710_v29  ;;  %v4715_v23 = vmul.f32 -1.442695, %v6020_v41 }
 0x244   : > { %v6200_v6 = vpop.eup %5145  ;;  %v1603_v4 = vpop.permute.xlu1 %1602  ;;  %v1238_v63 = vadd.f32 1.0, %v5144_v5  ;;  %5161 = vrcp.f32 %v1239_v49 }
 0x245   : > { %v5148_v12 = vpop.eup %5147  ;;  %v1683_v46 = vmul.f32 %v6200_v6, %v1603_v4  ;;  %5163 = vpow2.f32 %v4713_v28  ;;  %v1601_v52 = vpop.permute.xlu0 %1600  ;;  %v4714_v4 = vmul.f32 -1.442695, %v6023_v44 }
 0x246   : > { %1756 = vrot.lane.b32.xlu0 %v1680_v39, %s5310_s30  ;;  %v1241_v54 = vadd.f32 1.0, %v5148_v12  ;;  %5165 = vrcp.f32 %v1238_v63 }
 0x247   : > { %v6205_v53 = vpop.eup %5149  ;;  %1762 = vrot.lane.b32.xlu1 %v1683_v46, %s5310_s30  ;;  %5167 = vpow2.f32 %v4712_v16  ;;  %v4717_v16 = vmul.f32 -1.442695, %v6031_v56 }
 0x248   : > { %v5152_v24 = vpop.eup %5151  ;;  %v1682_v1 = vmul.f32 %v6205_v53, %v1601_v52  ;;  %v1607_v5 = vpop.permute.xlu1 %1606  ;;  %5169 = vrcp.f32 %v1241_v54 }
 0x249   : > { %v1240_v39 = vadd.f32 1.0, %v5152_v24  ;;  %v1605_v12 = vpop.permute.xlu0 %1604  ;;  %5171 = vpow2.f32 %v4715_v23  ;;  %v4716_v23 = vmul.f32 -1.442695, %v6036_v57 }
 0x24a   : > { %v6209_v29 = vpop.eup %5153  ;;  %1760 = vrot.lane.b32.xlu0 %v1682_v1, %s5310_s30 }
 0x24b   : > { %v1685_v49 = vmul.f32 %v6209_v29, %v1607_v5  ;;  %v5156_v31 = vpop.eup %5155  ;;  %5173 = vrcp.f32 %v1240_v39 }
 0x24c   : > { %v6214_v28 = vpop.eup %5157  ;;  %v1243_v46 = vadd.f32 1.0, %v5156_v31  ;;  %5175 = vpow2.f32 %v4714_v4  ;;  %v1611_v24 = vpop.permute.xlu1 %1610  ;;  %v4719_v4 = vmul.f32 -1.442695, %v6046_v13 }
 0x24d   : > { %1766 = vrot.lane.b32.xlu1 %v1685_v49, %s5310_s30  ;;  %v1684_v63 = vmul.f32 %v6214_v28, %v1605_v12  ;;  %v5160_v41 = vpop.eup %5159  ;;  %v1609_v49 = vpop.permute.xlu0 %1608 }
 0x24e   : > { %v6221_v52 = vpop.eup %5161  ;;  %v1242_v1 = vadd.f32 1.0, %v5160_v41  ;;  %5177 = vrcp.f32 %v1243_v46 }
 0x24f   : > { %1764 = vrot.lane.b32.xlu0 %v1684_v63, %s5310_s30  ;;  %v5164_v54 = vpop.eup %5163  ;;  %v1687_v44 = vmul.f32 %v6221_v52, %v1611_v24  ;;  %5179 = vpow2.f32 %v4717_v16  ;;  %v4718_v16 = vmul.f32 -1.442695, %v6049_v20 }
 0x250   : > { %v6225_v5 = vpop.eup %5165  ;;  %v1245_v31 = vadd.f32 1.0, %v5164_v54  ;;  %5181 = vrcp.f32 %v1242_v1  ;;  %v1615_v63 = vpop.permute.xlu1 %1614 }
 0x251   : > { %1770 = vrot.lane.b32.xlu1 %v1687_v44, %s5310_s30  ;;  %v5168_v56 = vpop.eup %5167  ;;  %v1686_v39 = vmul.f32 %v6225_v5, %v1609_v49  ;;  %5183 = vpow2.f32 %v4716_v23  ;;  %v1613_v54 = vpop.permute.xlu0 %1612 }
 0x252   : > { %v6230_v12 = vpop.eup %5169  ;;  %v1244_v41 = vadd.f32 1.0, %v5168_v56  ;;  %5185 = vrcp.f32 %v1245_v31 }
 0x253   : > { %1768 = vrot.lane.b32.xlu0 %v1686_v39, %s5310_s30  ;;  %v5172_v57 = vpop.eup %5171  ;;  %v1689_v46 = vmul.f32 %v6230_v12, %v1615_v63  ;;  %5187 = vpow2.f32 %v4719_v4 }
 0x254   : > { %v1247_v1 = vadd.f32 1.0, %v5172_v57  ;;  %5189 = vrcp.f32 %v1244_v41  ;;  %v1619_v49 = vpop.permute.xlu1 %1618 }
 0x255   : > { %v6235_v24 = vpop.eup %5173  ;;  %1774 = vrot.lane.b32.xlu1 %v1689_v46, %s5310_s30  ;;  %5191 = vpow2.f32 %v4718_v16  ;;  %v1617_v4 = vpop.permute.xlu0 %1616 }
 0x256   : > { %v5176_v13 = vpop.eup %5175  ;;  %v1688_v44 = vmul.f32 %v6235_v24, %v1613_v54  ;;  %5193 = vrcp.f32 %v1247_v1 }
 0x257   : > { %v1246_v31 = vadd.f32 1.0, %v5176_v13 }
 0x258   : > { %v6239_v23 = vpop.eup %5177  ;;  %1772 = vrot.lane.b32.xlu0 %v1688_v44, %s5310_s30  ;;  %v1623_v16 = vpop.permute.xlu1 %1622 }
 0x259   : > { %v5180_v56 = vpop.eup %5179  ;;  %v1691_v20 = vmul.f32 %v6239_v23, %v1619_v49  ;;  %5195 = vrcp.f32 %v1246_v31  ;;  %v1621_v49 = vpop.permute.xlu0 %1620 }
 0x25a   : > { %v6243_v39 = vpop.eup %5181  ;;  %v1249_v57 = vadd.f32 1.0, %v5180_v56 }
 0x25b   : > { %1778 = vrot.lane.b32.xlu1 %v1691_v20, %s5310_s30  ;;  %v5184_v63 = vpop.eup %5183  ;;  %v1690_v41 = vmul.f32 %v6243_v39, %v1617_v4 }
 0x25c   : > { %v6247_v46 = vpop.eup %5185  ;;  %v1248_v13 = vadd.f32 1.0, %v5184_v63  ;;  %5197 = vrcp.f32 %v1249_v57  ;;  %v1627_v17 = vpop.permute.xlu1 %1626 }
 0x25d   : > { %1776 = vrot.lane.b32.xlu0 %v1690_v41, %s5310_s30  ;;  %v5188_v54 = vpop.eup %5187  ;;  %v1693_v44 = vmul.f32 %v6247_v46, %v1623_v16  ;;  %v1625_v16 = vpop.permute.xlu0 %1624 }
 0x25e   : > { %v6251_v1 = vpop.eup %5189  ;;  %v1251_v56 = vadd.f32 1.0, %v5188_v54  ;;  %5199 = vrcp.f32 %v1248_v13 }
 0x25f   : > { %1782 = vrot.lane.b32.xlu1 %v1693_v44, %s5310_s30  ;;  %v5192_v20 = vpop.eup %5191  ;;  %v1692_v4 = vmul.f32 %v6251_v1, %v1621_v49 }
 0x260   : > { %v6255_v31 = vpop.eup %5193  ;;  %v1250_v41 = vadd.f32 1.0, %v5192_v20  ;;  %5201 = vrcp.f32 %v1251_v56  ;;  %v1631_v13 = vpop.permute.xlu1 %1630 }
 0x261   : > { %1780 = vrot.lane.b32.xlu0 %v1692_v4, %s5310_s30  ;;  %v1695_v63 = vmul.f32 %v6255_v31, %v1627_v17  ;;  %v1629_v20 = vpop.permute.xlu0 %1628 }
 0x262   : > { %5203 = vrcp.f32 %v1250_v41 }
 0x263   : > { %v6259_v57 = vpop.eup %5195  ;;  %1786 = vrot.lane.b32.xlu1 %v1695_v63, %s5310_s30 }
 0x264   : > { %v1694_v44 = vmul.f32 %v6259_v57, %v1625_v16  ;;  %v1635_v63 = vpop.permute.xlu1 %1634 }
 0x265   : > { %v1633_v26 = vpop.permute.xlu0 %1632 }
 0x266   : > { %v6263_v54 = vpop.eup %5197  ;;  %1784 = vrot.lane.b32.xlu0 %v1694_v44, %s5310_s30 }
 0x267   : > { %8271 = vst [vmem:[#allocation12_spill] sm:$0xff] %v6263_v54  ;;  %v1697_v49 = vmul.f32 %v6263_v54, %v1631_v13  ;;  %v1509_v13 = vmul.f32 %v6131_v34, %v5959_v36 }
 0x268   : > { %v6267_v4 = vpop.eup %5199 }
 0x269   : > { %8272 = vst [vmem:[#allocation13_spill] sm:$0xff] %v6267_v4  ;;  %1790 = vrot.lane.b32.xlu1 %v1697_v49, %s5310_s30  ;;  %v1696_v17 = vmul.f32 %v6267_v4, %v1629_v20  ;;  %v1508_v49 = vmul.f32 %v6133_v60, %v5966_v40 }
 0x26a   : > { %v6271_v56 = vpop.eup %5201 }
 0x26b   : > { %1788 = vrot.lane.b32.xlu0 %v1696_v17, %s5310_s30  ;;  %v1699_v41 = vmul.f32 %v6271_v56, %v1635_v63  ;;  %v1511_v63 = vmul.f32 %v6140_v14, %v5978_v51  ;;  %v1512_v51 = vmul.f32 %v6152_v33, %v6000_v62  ;;  %v1514_v62 = vmul.f32 %v6162_v19, %v6018_v8 }
 0x26c   : > { %v6275_v16 = vpop.eup %5203  ;;  %v1516_v8 = vmul.f32 %v6176_v37, %v6040_v3  ;;  %v1518_v3 = vmul.f32 %v6186_v59, %v6054_v25  ;;  %v1520_v25 = vmul.f32 %v6195_v10, %v6062_v32  ;;  %v1522_v32 = vmul.f32 %v6205_v53, %v6070_v42 }
 0x26d   : > { %1794 = vrot.lane.b32.xlu1 %v1699_v41, %s5310_s30  ;;  %v1698_v44 = vmul.f32 %v6275_v16, %v1633_v26  ;;  %v1510_v26 = vmul.f32 %v6143_v11, %v5980_v58  ;;  %v1524_v42 = vmul.f32 %v6214_v28, %v6078_v30  ;;  %v1526_v30 = vmul.f32 %v6225_v5, %v6086_v27 }
 0x26e   : > { %v1528_v27 = vmul.f32 %v6235_v24, %v6094_v22  ;;  %v1530_v22 = vmul.f32 %v6243_v39, %v6103_v48  ;;  %v8274_v48 = vld [vmem:[#allocation5_spill] sm:$0xff] }
 0x26f   : > { %1792 = vrot.lane.b32.xlu0 %v1698_v44, %s5310_s30 }
 0x29c   : > { %v1735_v20 = vpop.permute.xlu1 %1734 }
 0x29d   : > { %v1829_v4 = vadd.f32 %v1735_v20, %v1509_v13  ;;  %v1733_v17 = vpop.permute.xlu0 %1732  ;;  %v1513_v13 = vmul.f32 %v6149_v2, %v5994_v50 }
 0x29e   : > { %v1828_v54 = vadd.f32 %v1733_v17, %v1508_v49 }
 0x29f   : > { %5205 = vtanh.f32 %v1829_v4  ;;  %2086 = vrot.lane.b32.xlu1 %v1829_v4, %s5312_s10 }
 0x2a0   : > { %5207 = vtanh.f32 %v1828_v54  ;;  %v1739_v41 = vpop.permute.xlu1 %1738  ;;  %2084 = vrot.lane.b32.xlu0 %v1828_v54, %s5312_s10 }
 0x2a1   : > { %v1831_v36 = vadd.f32 %v1739_v41, %v1511_v63  ;;  %v1737_v40 = vpop.permute.xlu0 %1736  ;;  %v1515_v63 = vmul.f32 %v6158_v9, %v6016_v15  ;;  %v1517_v15 = vmul.f32 %v6170_v45, %v6034_v0  ;;  %v1519_v0 = vmul.f32 %v6179_v43, %v6052_v38 }
 0x2a2   : > { %v1830_v44 = vadd.f32 %v1737_v40, %v1510_v26  ;;  %v1521_v38 = vmul.f32 %v6190_v21, %v6060_v55  ;;  %v1523_v55 = vmul.f32 %v6200_v6, %v6068_v35  ;;  %v1525_v35 = vmul.f32 %v6209_v29, %v6076_v47 }
 0x2a3   : > { %2090 = vrot.lane.b32.xlu1 %v1831_v36, %s5312_s10  ;;  %5209 = vtanh.f32 %v1831_v36  ;;  %v1527_v47 = vmul.f32 %v6221_v52, %v6084_v61  ;;  %v1529_v61 = vmul.f32 %v6230_v12, %v6092_v7  ;;  %v1531_v7 = vmul.f32 %v6239_v23, %v6100_v18  ;;  %v8273_v18 = vld [vmem:[#allocation4_spill] sm:$0xff] }
 0x2a4   : > { %v1743_v49 = vpop.permute.xlu1 %1742  ;;  %2088 = vrot.lane.b32.xlu0 %v1830_v44, %s5312_s10  ;;  %5211 = vtanh.f32 %v1830_v44 }
 0x2a5   : > { %v1833_v4 = vadd.f32 %v1743_v49, %v1513_v13  ;;  %v1741_v58 = vpop.permute.xlu0 %1740 }
 0x2a6   : > { %v1832_v20 = vadd.f32 %v1741_v58, %v1512_v51 }
 0x2a7   : > { %2094 = vrot.lane.b32.xlu1 %v1833_v4, %s5312_s10  ;;  %5213 = vtanh.f32 %v1833_v4 }
 0x2a8   : > { %2092 = vrot.lane.b32.xlu0 %v1832_v20, %s5312_s10  ;;  %v1747_v50 = vpop.permute.xlu1 %1746  ;;  %5215 = vtanh.f32 %v1832_v20 }
 0x2a9   : > { %v5206_v54 = vpop.eup %5205  ;;  %v1745_v26 = vpop.permute.xlu0 %1744  ;;  %v1835_v41 = vadd.f32 %v1747_v50, %v1515_v63 }
 0x2aa   : > { %v5208_v17 = vpop.eup %5207  ;;  %v1834_v40 = vadd.f32 %v1745_v26, %v1514_v62 }
 0x2ab   : > { %1926 = vrot.lane.b32.xlu1 %v5206_v54, %s5310_s30  ;;  %5217 = vtanh.f32 %v1835_v41 }
 0x2ac   : > { %1924 = vrot.lane.b32.xlu0 %v5208_v17, %s5310_s30  ;;  %5219 = vtanh.f32 %v1834_v40 }
 0x2ad   : > { %v5210_v36 = vpop.eup %5209  ;;  %v1751_v44 = vpop.permute.xlu1 %1750 }
 0x2ae   : > { %v5212_v13 = vpop.eup %5211  ;;  %v1837_v51 = vadd.f32 %v1751_v44, %v1517_v15  ;;  %v1749_v49 = vpop.permute.xlu0 %1748 }
 0x2af   : > { %2098 = vrot.lane.b32.xlu1 %v1835_v41, %s5312_s10  ;;  %v1836_v58 = vadd.f32 %v1749_v49, %v1516_v8 }
 0x2b0   : > { %2096 = vrot.lane.b32.xlu0 %v1834_v40, %s5312_s10  ;;  %5221 = vtanh.f32 %v1837_v51 }
 0x2b1   : > { %v5214_v4 = vpop.eup %5213  ;;  %v1755_v20 = vpop.permute.xlu1 %1754  ;;  %5223 = vtanh.f32 %v1836_v58 }
 0x2b2   : > { %v5216_v54 = vpop.eup %5215  ;;  %v1839_v50 = vadd.f32 %v1755_v20, %v1519_v0 }
 0x2b3   : > { %1930 = vrot.lane.b32.xlu1 %v5210_v36, %s5310_s30 }
 0x2b4   : > { %1928 = vrot.lane.b32.xlu0 %v5212_v13, %s5310_s30  ;;  %v1753_v17 = vpop.permute.xlu0 %1752  ;;  %5225 = vtanh.f32 %v1839_v50 }
 0x2b5   : > { %v1838_v63 = vadd.f32 %v1753_v17, %v1518_v3  ;;  %v5218_v26 = vpop.eup %5217  ;;  %v1759_v62 = vpop.permute.xlu1 %1758 }
 0x2b6   : > { %v5220_v41 = vpop.eup %5219  ;;  %v1841_v36 = vadd.f32 %v1759_v62, %v1521_v38 }
 0x2b7   : > { %2102 = vrot.lane.b32.xlu1 %v1837_v51, %s5312_s10  ;;  %5227 = vtanh.f32 %v1838_v63 }
 0x2b8   : > { %2100 = vrot.lane.b32.xlu0 %v1836_v58, %s5312_s10  ;;  %v1757_v40 = vpop.permute.xlu0 %1756  ;;  %5229 = vtanh.f32 %v1841_v36 }
 0x2b9   : > { %v1840_v44 = vadd.f32 %v1757_v40, %v1520_v25  ;;  %v1763_v15 = vpop.permute.xlu1 %1762 }
 0x2ba   : > { %v5222_v13 = vpop.eup %5221  ;;  %v1843_v49 = vadd.f32 %v1763_v15, %v1523_v55 }
 0x2bb   : > { %1934 = vrot.lane.b32.xlu1 %v5214_v4, %s5310_s30  ;;  %v5224_v8 = vpop.eup %5223  ;;  %5231 = vtanh.f32 %v1840_v44 }
 0x2bc   : > { %1932 = vrot.lane.b32.xlu0 %v5216_v54, %s5310_s30  ;;  %v1761_v51 = vpop.permute.xlu0 %1760  ;;  %5233 = vtanh.f32 %v1843_v49 }
 0x2bd   : > { %v1842_v58 = vadd.f32 %v1761_v51, %v1522_v32 }
 0x2be   : > { %v5226_v4 = vpop.eup %5225 }
 0x2bf   : > { %2106 = vrot.lane.b32.xlu1 %v1839_v50, %s5312_s10  ;;  %v1767_v20 = vpop.permute.xlu1 %1766  ;;  %5235 = vtanh.f32 %v1842_v58 }
 0x2c0   : > { %2104 = vrot.lane.b32.xlu0 %v1838_v63, %s5312_s10  ;;  %v1845_v3 = vadd.f32 %v1767_v20, %v1525_v35  ;;  %v1533_v35 = vmul.f32 %v6247_v46, %v8273_v18 }
 0x2c1   : > { %v5228_v54 = vpop.eup %5227  ;;  %v1765_v0 = vpop.permute.xlu0 %1764 }
 0x2c2   : > { %v1844_v17 = vadd.f32 %v1765_v0, %v1524_v42  ;;  %v5230_v50 = vpop.eup %5229  ;;  %5237 = vtanh.f32 %v1845_v3  ;;  %v1532_v42 = vmul.f32 %v6251_v1, %v8274_v48 }
 0x2c3   : > { %1938 = vrot.lane.b32.xlu1 %v5218_v26, %s5310_s30  ;;  %v1771_v63 = vpop.permute.xlu1 %1770 }
 0x2c4   : > { %1936 = vrot.lane.b32.xlu0 %v5220_v41, %s5310_s30  ;;  %v1847_v41 = vadd.f32 %v1771_v63, %v1527_v47  ;;  %5239 = vtanh.f32 %v1844_v17 }
 0x2c5   : > { %v5232_v26 = vpop.eup %5231  ;;  %v1769_v62 = vpop.permute.xlu0 %1768 }
 0x2c6   : > { %v1846_v38 = vadd.f32 %v1769_v62, %v1526_v30  ;;  %v5234_v40 = vpop.eup %5233  ;;  %5241 = vtanh.f32 %v1847_v41  ;;  %v8275_v62 = vld [vmem:[#allocation6_spill] sm:$0xff] }
 0x2c7   : > { %2110 = vrot.lane.b32.xlu1 %v1841_v36, %s5312_s10  ;;  %v1775_v25 = vpop.permute.xlu1 %1774  ;;  %v1535_v30 = vmul.f32 %v6255_v31, %v8275_v62 }
 0x2c8   : > { %2108 = vrot.lane.b32.xlu0 %v1840_v44, %s5312_s10  ;;  %5243 = vtanh.f32 %v1846_v38 }
 0x2c9   : > { %v5236_v36 = vpop.eup %5235 }
 0x2ca   : > { %v1773_v44 = vpop.permute.xlu0 %1772 }
 0x2cb   : > { %1942 = vrot.lane.b32.xlu1 %v5222_v13, %s5310_s30  ;;  %v1849_v13 = vadd.f32 %v1775_v25, %v1529_v61  ;;  %v1848_v15 = vadd.f32 %v1773_v44, %v1528_v27  ;;  %v8277_v27 = vld [vmem:[#allocation8_spill] sm:$0xff] }
 0x2cc   : > { %1940 = vrot.lane.b32.xlu0 %v5224_v8, %s5310_s30  ;;  %v5238_v8 = vpop.eup %5237 }
 0x2cd   : > { %v1779_v55 = vpop.permute.xlu1 %1778  ;;  %5245 = vtanh.f32 %v1849_v13 }
 0x2ce   : > { %v5240_v51 = vpop.eup %5239  ;;  %5247 = vtanh.f32 %v1848_v15 }
 0x2cf   : > { %2114 = vrot.lane.b32.xlu1 %v1843_v49, %s5312_s10  ;;  %v1777_v32 = vpop.permute.xlu0 %1776  ;;  %v1851_v49 = vadd.f32 %v1779_v55, %v1531_v7  ;;  %v8279_v55 = vld [vmem:[#allocation9_spill] sm:$0xff] }
 0x2d0   : > { %2112 = vrot.lane.b32.xlu0 %v1842_v58, %s5312_s10  ;;  %v1850_v58 = vadd.f32 %v1777_v32, %v1530_v22 }
 0x2d1   : > { %v1783_v20 = vpop.permute.xlu1 %1782  ;;  %5249 = vtanh.f32 %v1851_v49 }
 0x2d2   : > { %5251 = vtanh.f32 %v1850_v58 }
 0x2d3   : > { %1946 = vrot.lane.b32.xlu1 %v5226_v4, %s5310_s30  ;;  %v5242_v4 = vpop.eup %5241  ;;  %v1781_v0 = vpop.permute.xlu0 %1780 }
 0x2d4   : > { %1944 = vrot.lane.b32.xlu0 %v5228_v54, %s5310_s30  ;;  %v5244_v54 = vpop.eup %5243 }
 0x2d7   : > { %2118 = vrot.lane.b32.xlu1 %v1845_v3, %s5312_s10  ;;  %v1853_v3 = vadd.f32 %v1783_v20, %v1533_v35  ;;  %v5246_v63 = vpop.eup %5245 }
 0x2d8   : > { %2116 = vrot.lane.b32.xlu0 %v1844_v17, %s5312_s10  ;;  %v1852_v17 = vadd.f32 %v1781_v0, %v1532_v42  ;;  %v5248_v47 = vpop.eup %5247 }
 0x2d9   : > { %5253 = vtanh.f32 %v1853_v3 }
 0x2da   : > { %5255 = vtanh.f32 %v1852_v17 }
 0x2db   : > { %1950 = vrot.lane.b32.xlu1 %v5230_v50, %s5310_s30  ;;  %v1787_v50 = vpop.permute.xlu1 %1786  ;;  %v5250_v44 = vpop.eup %5249 }
 0x2dc   : > { %1948 = vrot.lane.b32.xlu0 %v5232_v26, %s5310_s30  ;;  %v1785_v26 = vpop.permute.xlu0 %1784 }
 0x2df   : > { %2122 = vrot.lane.b32.xlu1 %v1847_v41, %s5312_s10  ;;  %v8276_v41 = vld [vmem:[#allocation7_spill] sm:$0xff] }
 0x2e0   : > { %2120 = vrot.lane.b32.xlu0 %v1846_v38, %s5312_s10  ;;  %v1534_v38 = vmul.f32 %v6259_v57, %v8276_v41  ;;  %v1789_v61 = vpop.permute.xlu0 %1788 }
 0x2e2   : > { %v1854_v25 = vadd.f32 %v1785_v26, %v1534_v38 }
 0x2e3   : > { %1954 = vrot.lane.b32.xlu1 %v5234_v40, %s5310_s30  ;;  %v1855_v40 = vadd.f32 %v1787_v50, %v1535_v30 }
 0x2e4   : > { %1952 = vrot.lane.b32.xlu0 %v5236_v36, %s5310_s30  ;;  %v1791_v36 = vpop.permute.xlu1 %1790  ;;  %v1793_v20 = vpop.permute.xlu0 %1792 }
 0x2e5   : > { %5257 = vtanh.f32 %v1855_v40 }
 0x2e6   : > { %5259 = vtanh.f32 %v1854_v25 }
 0x2e7   : > { %2126 = vrot.lane.b32.xlu1 %v1849_v13, %s5312_s10  ;;  %v8278_v13 = vld [vmem:[#allocation12_spill] sm:$0xff] }
 0x2e8   : > { %2124 = vrot.lane.b32.xlu0 %v1848_v15, %s5312_s10  ;;  %v1537_v15 = vmul.f32 %v8278_v13, %v8277_v27 }
 0x2ea   : > { %v1857_v32 = vadd.f32 %v1791_v36, %v1537_v15 }
 0x2eb   : > { %1958 = vrot.lane.b32.xlu1 %v5238_v8, %s5310_s30  ;;  %v5252_v8 = vpop.eup %5251 }
 0x2ec   : > { %1956 = vrot.lane.b32.xlu0 %v5240_v51, %s5310_s30  ;;  %v8280_v51 = vld [vmem:[#allocation13_spill] sm:$0xff]  ;;  %5261 = vtanh.f32 %v1857_v32  ;;  %v5254_v48 = vpop.eup %5253 }
 0x2ed   : > { %v1536_v7 = vmul.f32 %v8280_v51, %v8279_v55  ;;  %v5256_v42 = vpop.eup %5255 }
 0x2ef   : > { %2130 = vrot.lane.b32.xlu1 %v1851_v49, %s5312_s10  ;;  %v1856_v22 = vadd.f32 %v1789_v61, %v1536_v7  ;;  %v1795_v49 = vpop.permute.xlu1 %1794 }
 0x2f0   : > { %2128 = vrot.lane.b32.xlu0 %v1850_v58, %s5312_s10  ;;  %v8281_v58 = vld [vmem:[#allocation10_spill] sm:$0xff] }
 0x2f1   : > { %5263 = vtanh.f32 %v1856_v22 }
 0x2f3   : > { %1962 = vrot.lane.b32.xlu1 %v5242_v4, %s5310_s30  ;;  %v1539_v4 = vmul.f32 %v6271_v56, %v8281_v58 }
 0x2f4   : > { %1960 = vrot.lane.b32.xlu0 %v5244_v54, %s5310_s30  ;;  %v8282_v54 = vld [vmem:[#allocation11_spill] sm:$0xff] }
 0x2f5   : > { %v1538_v18 = vmul.f32 %v6275_v16, %v8282_v54  ;;  %v1859_v35 = vadd.f32 %v1795_v49, %v1539_v4 }
 0x2f7   : > { %2134 = vrot.lane.b32.xlu1 %v1853_v3, %s5312_s10  ;;  %v1858_v0 = vadd.f32 %v1793_v20, %v1538_v18  ;;  %5265 = vtanh.f32 %v1859_v35  ;;  %v5258_v3 = vpop.eup %5257 }
 0x2f8   : > { %2132 = vrot.lane.b32.xlu0 %v1852_v17, %s5312_s10  ;;  %v5260_v17 = vpop.eup %5259 }
 0x2f9   : > { %5267 = vtanh.f32 %v1858_v0 }
 0x2fb   : > { %1966 = vrot.lane.b32.xlu1 %v5246_v63, %s5310_s30  ;;  %v5262_v63 = vpop.eup %5261 }
 0x2fc   : > { %1964 = vrot.lane.b32.xlu0 %v5248_v47, %s5310_s30  ;;  %v5264_v47 = vpop.eup %5263 }
 0x2ff   : > { %2138 = vrot.lane.b32.xlu1 %v1855_v40, %s5312_s10 }
 0x300   : > { %2136 = vrot.lane.b32.xlu0 %v1854_v25, %s5312_s10 }
 0x301   : > { %v5266_v30 = vpop.eup %5265 }
 0x303   : > { %1970 = vrot.lane.b32.xlu1 %v5250_v44, %s5310_s30  ;;  %v5268_v38 = vpop.eup %5267 }
 0x304   : > { %1968 = vrot.lane.b32.xlu0 %v5252_v8, %s5310_s30 }
 0x307   : > { %2142 = vrot.lane.b32.xlu1 %v1857_v32, %s5312_s10 }
 0x308   : > { %2140 = vrot.lane.b32.xlu0 %v1856_v22, %s5312_s10 }
 0x30b   : > { %1974 = vrot.lane.b32.xlu1 %v5254_v48, %s5310_s30 }
 0x30c   : > { %1972 = vrot.lane.b32.xlu0 %v5256_v42, %s5310_s30 }
 0x30f   : > { %1978 = vrot.lane.b32.xlu1 %v5258_v3, %s5310_s30 }
 0x310   : > { %1976 = vrot.lane.b32.xlu0 %v5260_v17, %s5310_s30 }
 0x311   : > { %v2087_v50 = vpop.permute.xlu1 %2086 }
 0x312   : > { %2182 = vst.msk [vmem:[#allocation3 + $0x8] sm:$0xff] %vm8187_vm2, %v2087_v50  ;;  %v2085_v26 = vpop.permute.xlu0 %2084 }
 0x313   : > { %2181 = vst.msk [vmem:[#allocation3] sm:$0xff] %vm8187_vm2, %v2085_v26  ;;  %1982 = vrot.lane.b32.xlu1 %v5262_v63, %s5310_s30 }
 0x314   : > { %1980 = vrot.lane.b32.xlu0 %v5264_v47, %s5310_s30 }
 0x315   : > { %v2091_v62 = vpop.permute.xlu1 %2090 }
 0x316   : > { %2184 = vst.msk [vmem:[#allocation3 + $0x18] sm:$0xff] %vm8187_vm2, %v2091_v62  ;;  %v2089_v41 = vpop.permute.xlu0 %2088 }
 0x317   : > { %2183 = vst.msk [vmem:[#allocation3 + $0x10] sm:$0xff] %vm8187_vm2, %v2089_v41  ;;  %1986 = vrot.lane.b32.xlu1 %v5266_v30, %s5310_s30 }
 0x318   : > { %1984 = vrot.lane.b32.xlu0 %v5268_v38, %s5310_s30  ;;  %s5313_s30 = smov (!%p4720_p8), 64  }
 0x319   : > { %v2095_v40 = vpop.permute.xlu1 %2094 }
 0x31a   : > { %2186 = vst.msk [vmem:[#allocation3 + $0x28] sm:$0xff] %vm8187_vm2, %v2095_v40  ;;  %v2093_v25 = vpop.permute.xlu0 %2092 }
 0x31b   : > { %2185 = vst.msk [vmem:[#allocation3 + $0x20] sm:$0xff] %vm8187_vm2, %v2093_v25  ;;  %2146 = vrot.lane.b32.xlu1 %v1859_v35, %s5312_s10 }
 0x31c   : > { %2144 = vrot.lane.b32.xlu0 %v1858_v0, %s5312_s10 }
 0x31d   : > { %v1927_v36 = vpop.permute.xlu1 %1926 }
 0x31e   : > { %v6415_v61 = vmul.f32 %v6131_v34, %v1927_v36  ;;  %v1925_v44 = vpop.permute.xlu0 %1924 }
 0x31f   : > { %v6418_v27 = vmul.f32 %v6133_v60, %v1925_v44 }
 0x321   : > { %v2099_v15 = vpop.permute.xlu1 %2098  ;;  %2249 = vrot.lane.b32.xlu0 (!%p4720_p8), %v6418_v27, %s5313_s30 }
 0x322   : > { %2188 = vst.msk [vmem:[#allocation3 + $0x38] sm:$0xff] %vm8187_vm2, %v2099_v15  ;;  %v2097_v8 = vpop.permute.xlu0 %2096 }
 0x323   : > { %2187 = vst.msk [vmem:[#allocation3 + $0x30] sm:$0xff] %vm8187_vm2, %v2097_v8 }
 0x325   : > { %v1931_v55 = vpop.permute.xlu1 %1930  ;;  %2251 = vrot.lane.b32.xlu0 (!%p4720_p8), %v6415_v61, %s5313_s30 }
 0x326   : > { %v6423_v7 = vmul.f32 %v6140_v14, %v1931_v55  ;;  %v1929_v32 = vpop.permute.xlu0 %1928 }
 0x327   : > { %v6426_v22 = vmul.f32 %v6143_v11, %v1929_v32 }
 0x328   : > { %8283 = vst [vmem:[#allocation4_spill] sm:$0xff] %v6423_v7 }
 0x329   : > { %v2103_v34 = vpop.permute.xlu1 %2102  ;;  %2253 = vrot.lane.b32.xlu1 (!%p4720_p8), %v6426_v22, %s5313_s30 }
 0x32a   : > { %2190 = vst.msk [vmem:[#allocation3 + $0x48] sm:$0xff] %vm8187_vm2, %v2103_v34  ;;  %v2101_v49 = vpop.permute.xlu0 %2100 }
 0x32b   : > { %2189 = vst.msk [vmem:[#allocation3 + $0x40] sm:$0xff] %vm8187_vm2, %v2101_v49 }
 0x32d   : > { %v1935_v60 = vpop.permute.xlu1 %1934  ;;  %2255 = vrot.lane.b32.xlu1 (!%p4720_p8), %v6423_v7, %s5313_s30 }
 0x32e   : > { %v6431_v58 = vmul.f32 %v6149_v2, %v1935_v60  ;;  %v1933_v4 = vpop.permute.xlu0 %1932 }
 0x32f   : > { %v6434_v20 = vmul.f32 %v6152_v33, %v1933_v4 }
 0x330   : > { %8284 = vst [vmem:[#allocation5_spill] sm:$0xff] %v6431_v58 }
 0x331   : > { %8285 = vst [vmem:[#allocation6_spill] sm:$0xff] %v6434_v20  ;;  %v2107_v14 = vpop.permute.xlu1 %2106  ;;  %2259 = vrot.lane.b32.xlu1 (!%p4720_p8), %v6431_v58, %s5313_s30  ;;  %2257 = vrot.lane.b32.xlu0 (!%p4720_p8), %v6434_v20, %s5313_s30 }
 0x332   : > { %2192 = vst.msk [vmem:[#allocation3 + $0x58] sm:$0xff] %vm8187_vm2, %v2107_v14  ;;  %v2105_v54 = vpop.permute.xlu0 %2104 }
 0x333   : > { %2191 = vst.msk [vmem:[#allocation3 + $0x50] sm:$0xff] %vm8187_vm2, %v2105_v54 }
 0x335   : > { %v1939_v11 = vpop.permute.xlu1 %1938 }
 0x336   : > { %v6439_v18 = vmul.f32 %v6158_v9, %v1939_v11  ;;  %v1937_v35 = vpop.permute.xlu0 %1936 }
 0x337   : > { %v6442_v0 = vmul.f32 %v6162_v19, %v1937_v35 }
 0x338   : > { %8286 = vst [vmem:[#allocation7_spill] sm:$0xff] %v6439_v18  ;;  %2263 = vrot.lane.b32.xlu1 (!%p4720_p8), %v6439_v18, %s5313_s30 }
 0x339   : > { %8287 = vst [vmem:[#allocation8_spill] sm:$0xff] %v6442_v0  ;;  %v2111_v2 = vpop.permute.xlu1 %2110  ;;  %2261 = vrot.lane.b32.xlu0 (!%p4720_p8), %v6442_v0, %s5313_s30 }
 0x33a   : > { %2194 = vst.msk [vmem:[#allocation3 + $0x68] sm:$0xff] %vm8187_vm2, %v2111_v2  ;;  %v2109_v48 = vpop.permute.xlu0 %2108 }
 0x33b   : > { %2193 = vst.msk [vmem:[#allocation3 + $0x60] sm:$0xff] %vm8187_vm2, %v2109_v48 }
 0x33d   : > { %v1943_v33 = vpop.permute.xlu1 %1942 }
 0x33e   : > { %v6447_v42 = vmul.f32 %v6170_v45, %v1943_v33  ;;  %v1941_v3 = vpop.permute.xlu0 %1940 }
 0x33f   : > { %v6450_v17 = vmul.f32 %v6176_v37, %v1941_v3 }
 0x340   : > { %8288 = vst [vmem:[#allocation12_spill] sm:$0xff] %v6447_v42  ;;  %2267 = vrot.lane.b32.xlu1 (!%p4720_p8), %v6447_v42, %s5313_s30 }
 0x341   : > { %8289 = vst [vmem:[#allocation9_spill] sm:$0xff] %v6450_v17  ;;  %v2115_v9 = vpop.permute.xlu1 %2114  ;;  %2265 = vrot.lane.b32.xlu0 (!%p4720_p8), %v6450_v17, %s5313_s30 }
 0x342   : > { %2196 = vst.msk [vmem:[#allocation3 + $0x78] sm:$0xff] %vm8187_vm2, %v2115_v9  ;;  %v2113_v50 = vpop.permute.xlu0 %2112 }
 0x343   : > { %2195 = vst.msk [vmem:[#allocation3 + $0x70] sm:$0xff] %vm8187_vm2, %v2113_v50 }
 0x345   : > { %v1947_v19 = vpop.permute.xlu1 %1946 }
 0x346   : > { %v6455_v63 = vmul.f32 %v6179_v43, %v1947_v19  ;;  %v1945_v26 = vpop.permute.xlu0 %1944 }
 0x347   : > { %v6458_v47 = vmul.f32 %v6186_v59, %v1945_v26 }
 0x348   : > { %8290 = vst [vmem:[#allocation13_spill] sm:$0xff] %v6455_v63  ;;  %2271 = vrot.lane.b32.xlu1 (!%p4720_p8), %v6455_v63, %s5313_s30 }
 0x349   : > { %8291 = vst [vmem:[#allocation10_spill] sm:$0xff] %v6458_v47  ;;  %v2119_v45 = vpop.permute.xlu1 %2118  ;;  %2269 = vrot.lane.b32.xlu0 (!%p4720_p8), %v6458_v47, %s5313_s30 }
 0x34a   : > { %2198 = vst.msk [vmem:[#allocation3 + $0x88] sm:$0xff] %vm8187_vm2, %v2119_v45  ;;  %v2117_v62 = vpop.permute.xlu0 %2116 }
 0x34b   : > { %2197 = vst.msk [vmem:[#allocation3 + $0x80] sm:$0xff] %vm8187_vm2, %v2117_v62 }
 0x34d   : > { %v1951_v37 = vpop.permute.xlu1 %1950 }
 0x34e   : > { %v6463_v30 = vmul.f32 %v6190_v21, %v1951_v37  ;;  %v1949_v41 = vpop.permute.xlu0 %1948 }
 0x34f   : > { %v6466_v38 = vmul.f32 %v6195_v10, %v1949_v41 }
 0x350   : > { %8292 = vst [vmem:[#allocation11_spill] sm:$0xff] %v6463_v30  ;;  %2275 = vrot.lane.b32.xlu1 (!%p4720_p8), %v6463_v30, %s5313_s30 }
 0x351   : > { %8293 = vst [vmem:[#allocation14_spill] sm:$0xff] %v6466_v38  ;;  %v2123_v43 = vpop.permute.xlu1 %2122  ;;  %2273 = vrot.lane.b32.xlu0 (!%p4720_p8), %v6466_v38, %s5313_s30 }
 0x352   : > { %2200 = vst.msk [vmem:[#allocation3 + $0x98] sm:$0xff] %vm8187_vm2, %v2123_v43  ;;  %v2121_v40 = vpop.permute.xlu0 %2120 }
 0x353   : > { %2199 = vst.msk [vmem:[#allocation3 + $0x90] sm:$0xff] %vm8187_vm2, %v2121_v40 }
 0x355   : > { %v1955_v59 = vpop.permute.xlu1 %1954 }
 0x356   : > { %v6471_v25 = vmul.f32 %v6200_v6, %v1955_v59  ;;  %v1953_v36 = vpop.permute.xlu0 %1952 }
 0x357   : > { %v6474_v44 = vmul.f32 %v6205_v53, %v1953_v36 }
 0x358   : > { %8294 = vst [vmem:[#allocation15_spill] sm:$0xff] %v6471_v25  ;;  %2279 = vrot.lane.b32.xlu1 (!%p4720_p8), %v6471_v25, %s5313_s30 }
 0x359   : > { %8295 = vst [vmem:[#allocation16_spill] sm:$0xff] %v6474_v44  ;;  %v2127_v21 = vpop.permute.xlu1 %2126  ;;  %2277 = vrot.lane.b32.xlu0 (!%p4720_p8), %v6474_v44, %s5313_s30 }
 0x35a   : > { %2202 = vst.msk [vmem:[#allocation3 + $0xa8] sm:$0xff] %vm8187_vm2, %v2127_v21  ;;  %v2125_v15 = vpop.permute.xlu0 %2124 }
 0x35b   : > { %2201 = vst.msk [vmem:[#allocation3 + $0xa0] sm:$0xff] %vm8187_vm2, %v2125_v15 }
 0x35d   : > { %v1959_v10 = vpop.permute.xlu1 %1958 }
 0x35e   : > { %v6479_v8 = vmul.f32 %v6209_v29, %v1959_v10  ;;  %v1957_v55 = vpop.permute.xlu0 %1956 }
 0x35f   : > { %v6482_v32 = vmul.f32 %v6214_v28, %v1957_v55 }
 0x360   : > { %8296 = vst [vmem:[#allocation17_spill] sm:$0xff] %v6479_v8  ;;  %2283 = vrot.lane.b32.xlu1 (!%p4720_p8), %v6479_v8, %s5313_s30 }
 0x361   : > { %8297 = vst [vmem:[#allocation18_spill] sm:$0xff] %v6482_v32  ;;  %v2131_v6 = vpop.permute.xlu1 %2130  ;;  %2281 = vrot.lane.b32.xlu0 (!%p4720_p8), %v6482_v32, %s5313_s30 }
 0x362   : > { %2204 = vst.msk [vmem:[#allocation3 + $0xb8] sm:$0xff] %vm8187_vm2, %v2131_v6  ;;  %v2129_v34 = vpop.permute.xlu0 %2128 }
 0x363   : > { %2203 = vst.msk [vmem:[#allocation3 + $0xb0] sm:$0xff] %vm8187_vm2, %v2129_v34 }
 0x365   : > { %v1963_v53 = vpop.permute.xlu1 %1962 }
 0x366   : > { %v6487_v49 = vmul.f32 %v6221_v52, %v1963_v53  ;;  %v1961_v60 = vpop.permute.xlu0 %1960 }
 0x367   : > { %v6490_v4 = vmul.f32 %v6225_v5, %v1961_v60 }
 0x368   : > { %8298 = vst [vmem:[#allocation19_spill] sm:$0xff] %v6487_v49  ;;  %2287 = vrot.lane.b32.xlu1 (!%p4720_p8), %v6487_v49, %s5313_s30 }
 0x369   : > { %8299 = vst [vmem:[#allocation20_spill] sm:$0xff] %v6490_v4  ;;  %v2135_v29 = vpop.permute.xlu1 %2134  ;;  %2285 = vrot.lane.b32.xlu0 (!%p4720_p8), %v6490_v4, %s5313_s30 }
 0x36a   : > { %2206 = vst.msk [vmem:[#allocation3 + $0xc8] sm:$0xff] %vm8187_vm2, %v2135_v29  ;;  %v2133_v14 = vpop.permute.xlu0 %2132 }
 0x36b   : > { %2205 = vst.msk [vmem:[#allocation3 + $0xc0] sm:$0xff] %vm8187_vm2, %v2133_v14 }
 0x36d   : > { %v1967_v28 = vpop.permute.xlu1 %1966 }
 0x36e   : > { %v6495_v54 = vmul.f32 %v6230_v12, %v1967_v28  ;;  %v1965_v11 = vpop.permute.xlu0 %1964 }
 0x36f   : > { %v6498_v35 = vmul.f32 %v6235_v24, %v1965_v11 }
 0x370   : > { %8300 = vst [vmem:[#allocation21_spill] sm:$0xff] %v6495_v54  ;;  %2291 = vrot.lane.b32.xlu1 (!%p4720_p8), %v6495_v54, %s5313_s30 }
 0x371   : > { %8301 = vst [vmem:[#allocation22_spill] sm:$0xff] %v6498_v35  ;;  %v2139_v52 = vpop.permute.xlu1 %2138  ;;  %2289 = vrot.lane.b32.xlu0 (!%p4720_p8), %v6498_v35, %s5313_s30 }
 0x372   : > { %2208 = vst.msk [vmem:[#allocation3 + $0xd8] sm:$0xff] %vm8187_vm2, %v2139_v52  ;;  %v2137_v2 = vpop.permute.xlu0 %2136 }
 0x373   : > { %2207 = vst.msk [vmem:[#allocation3 + $0xd0] sm:$0xff] %vm8187_vm2, %v2137_v2 }
 0x375   : > { %v1971_v5 = vpop.permute.xlu1 %1970 }
 0x376   : > { %v6503_v48 = vmul.f32 %v6239_v23, %v1971_v5  ;;  %v1969_v33 = vpop.permute.xlu0 %1968 }
 0x377   : > { %v6506_v3 = vmul.f32 %v6243_v39, %v1969_v33 }
 0x378   : > { %8302 = vst [vmem:[#allocation23_spill] sm:$0xff] %v6503_v48  ;;  %2295 = vrot.lane.b32.xlu1 (!%p4720_p8), %v6503_v48, %s5313_s30 }
 0x379   : > { %8303 = vst [vmem:[#allocation24_spill] sm:$0xff] %v6506_v3  ;;  %v2143_v12 = vpop.permute.xlu1 %2142  ;;  %2293 = vrot.lane.b32.xlu0 (!%p4720_p8), %v6506_v3, %s5313_s30 }
 0x37a   : > { %2210 = vst.msk [vmem:[#allocation3 + $0xe8] sm:$0xff] %vm8187_vm2, %v2143_v12  ;;  %v2141_v9 = vpop.permute.xlu0 %2140 }
 0x37b   : > { %2209 = vst.msk [vmem:[#allocation3 + $0xe0] sm:$0xff] %vm8187_vm2, %v2141_v9 }
 0x37d   : > { %v1975_v24 = vpop.permute.xlu1 %1974 }
 0x37e   : > { %v6511_v50 = vmul.f32 %v6247_v46, %v1975_v24  ;;  %v1973_v19 = vpop.permute.xlu0 %1972 }
 0x37f   : > { %v6514_v26 = vmul.f32 %v6251_v1, %v1973_v19 }
 0x380   : > { %8304 = vst [vmem:[#allocation25_spill] sm:$0xff] %v6511_v50  ;;  %2299 = vrot.lane.b32.xlu1 (!%p4720_p8), %v6511_v50, %s5313_s30 }
 0x381   : > { %8305 = vst [vmem:[#allocation26_spill] sm:$0xff] %v6514_v26  ;;  %v1979_v23 = vpop.permute.xlu1 %1978  ;;  %2297 = vrot.lane.b32.xlu0 (!%p4720_p8), %v6514_v26, %s5313_s30 }
 0x382   : > { %v6517_v45 = vmul.f32 %v6255_v31, %v1979_v23  ;;  %v1977_v39 = vpop.permute.xlu0 %1976 }
 0x383   : > { %v6520_v62 = vmul.f32 %v6259_v57, %v1977_v39 }
 0x384   : > { %8306 = vst [vmem:[#allocation27_spill] sm:$0xff] %v6517_v45  ;;  %2303 = vrot.lane.b32.xlu1 (!%p4720_p8), %v6517_v45, %s5313_s30 }
 0x385   : > { %8307 = vst [vmem:[#allocation28_spill] sm:$0xff] %v6520_v62  ;;  %v1983_v37 = vpop.permute.xlu1 %1982  ;;  %2301 = vrot.lane.b32.xlu0 (!%p4720_p8), %v6520_v62, %s5313_s30 }
 0x386   : > { %v6523_v41 = vmul.f32 %v8278_v13, %v1983_v37  ;;  %v1981_v43 = vpop.permute.xlu0 %1980 }
 0x387   : > { %v6526_v46 = vmul.f32 %v8280_v51, %v1981_v43 }
 0x388   : > { %8308 = vst [vmem:[#allocation29_spill] sm:$0xff] %v6523_v41  ;;  %2307 = vrot.lane.b32.xlu1 (!%p4720_p8), %v6523_v41, %s5313_s30 }
 0x389   : > { %8309 = vst [vmem:[#allocation30_spill] sm:$0xff] %v6526_v46  ;;  %v1987_v40 = vpop.permute.xlu1 %1986  ;;  %2216 = sbr.rel (%p4720_p8) target bundleno = 1025 (0x401), region = 40  ;;  %2305 = vrot.lane.b32.xlu0 (!%p4720_p8), %v6526_v46, %s5313_s30 }
 0x38a   : > { %v6529_v1 = vmul.f32 %v6271_v56, %v1987_v40  ;;  %v1985_v59 = vpop.permute.xlu0 %1984 }
 0x38b   : > { %v6532_v31 = vmul.f32 %v6275_v16, %v1985_v59 }
 0x38c   : > { %2311 = vrot.lane.b32.xlu1 (!%p4720_p8), %v6529_v1, %s5313_s30 }
 0x38d   : > { %8310 = vst [vmem:[#allocation31_spill] sm:$0xff] %v6532_v31  ;;  %v2147_v36 = vpop.permute.xlu1 %2146  ;;  %2309 = vrot.lane.b32.xlu0 (!%p4720_p8), %v6532_v31, %s5313_s30 }
 0x38e   : > { %2212 = vst.msk [vmem:[#allocation3 + $0xf8] sm:$0xff] %vm8187_vm2, %v2147_v36  ;;  %v2145_v57 = vpop.permute.xlu0 %2144 }
 0x38f   : > { %2211 = vst.msk [vmem:[#allocation3 + $0xf0] sm:$0xff] %vm8187_vm2, %v2145_v57 }
 0x393   : > { %v2250_v16 = vpop.permute.xlu0 %2249 }
 0x394   : > { %2345 = vst.msk [vmem:[%s5374_s24] sm:$0xff] %vm8187_vm2, %v2250_v16 }
 0x397   : > { %v2252_v51 = vpop.permute.xlu0 %2251 }
 0x398   : > { %2346 = vst.msk [vmem:[%s5374_s24 + $0x8] sm:$0xff] %vm8187_vm2, %v2252_v51 }
 0x39b   : > { %v2254_v56 = vpop.permute.xlu1 %2253 }
 0x39c   : > { %2347 = vst.msk [vmem:[%s5374_s24 + $0x10] sm:$0xff] %vm8187_vm2, %v2254_v56 }
 0x39f   : > { %v2256_v13 = vpop.permute.xlu1 %2255 }
 0x3a0   : > { %2348 = vst.msk [vmem:[%s5374_s24 + $0x18] sm:$0xff] %vm8187_vm2, %v2256_v13 }
 0x3a3   : > { %v2260_v21 = vpop.permute.xlu1 %2259  ;;  %v2258_v15 = vpop.permute.xlu0 %2257 }
 0x3a4   : > { %2350 = vst.msk [vmem:[%s5374_s24 + $0x28] sm:$0xff] %vm8187_vm2, %v2260_v21  ;;  %2349 = vst.msk [vmem:[%s5374_s24 + $0x20] sm:$0xff] %vm8187_vm2, %v2258_v15 }
 0x3aa   : > { %v2264_v10 = vpop.permute.xlu1 %2263 }
 0x3ab   : > { %v2262_v55 = vpop.permute.xlu0 %2261  ;;  %2352 = vst.msk [vmem:[%s5374_s24 + $0x38] sm:$0xff] %vm8187_vm2, %v2264_v10 }
 0x3ac   : > { %2351 = vst.msk [vmem:[%s5374_s24 + $0x30] sm:$0xff] %vm8187_vm2, %v2262_v55 }
 0x3b2   : > { %v2268_v6 = vpop.permute.xlu1 %2267 }
 0x3b3   : > { %v2266_v34 = vpop.permute.xlu0 %2265  ;;  %2354 = vst.msk [vmem:[%s5374_s24 + $0x48] sm:$0xff] %vm8187_vm2, %v2268_v6 }
 0x3b4   : > { %2353 = vst.msk [vmem:[%s5374_s24 + $0x40] sm:$0xff] %vm8187_vm2, %v2266_v34 }
 0x3ba   : > { %v2272_v53 = vpop.permute.xlu1 %2271 }
 0x3bb   : > { %v2270_v60 = vpop.permute.xlu0 %2269  ;;  %2356 = vst.msk [vmem:[%s5374_s24 + $0x58] sm:$0xff] %vm8187_vm2, %v2272_v53 }
 0x3bc   : > { %2355 = vst.msk [vmem:[%s5374_s24 + $0x50] sm:$0xff] %vm8187_vm2, %v2270_v60 }
 0x3c2   : > { %v2276_v29 = vpop.permute.xlu1 %2275 }
 0x3c3   : > { %v2274_v14 = vpop.permute.xlu0 %2273  ;;  %2358 = vst.msk [vmem:[%s5374_s24 + $0x68] sm:$0xff] %vm8187_vm2, %v2276_v29 }
 0x3c4   : > { %2357 = vst.msk [vmem:[%s5374_s24 + $0x60] sm:$0xff] %vm8187_vm2, %v2274_v14 }
 0x3ca   : > { %v2280_v28 = vpop.permute.xlu1 %2279 }
 0x3cb   : > { %v2278_v11 = vpop.permute.xlu0 %2277  ;;  %2360 = vst.msk [vmem:[%s5374_s24 + $0x78] sm:$0xff] %vm8187_vm2, %v2280_v28 }
 0x3cc   : > { %2359 = vst.msk [vmem:[%s5374_s24 + $0x70] sm:$0xff] %vm8187_vm2, %v2278_v11 }
 0x3d2   : > { %v2284_v52 = vpop.permute.xlu1 %2283 }
 0x3d3   : > { %v2282_v2 = vpop.permute.xlu0 %2281  ;;  %2362 = vst.msk [vmem:[%s5374_s24 + $0x88] sm:$0xff] %vm8187_vm2, %v2284_v52 }
 0x3d4   : > { %2361 = vst.msk [vmem:[%s5374_s24 + $0x80] sm:$0xff] %vm8187_vm2, %v2282_v2 }
 0x3da   : > { %v2288_v5 = vpop.permute.xlu1 %2287 }
 0x3db   : > { %v2286_v33 = vpop.permute.xlu0 %2285  ;;  %2364 = vst.msk [vmem:[%s5374_s24 + $0x98] sm:$0xff] %vm8187_vm2, %v2288_v5 }
 0x3dc   : > { %2363 = vst.msk [vmem:[%s5374_s24 + $0x90] sm:$0xff] %vm8187_vm2, %v2286_v33 }
 0x3e2   : > { %v2292_v12 = vpop.permute.xlu1 %2291 }
 0x3e3   : > { %v2290_v9 = vpop.permute.xlu0 %2289  ;;  %2366 = vst.msk [vmem:[%s5374_s24 + $0xa8] sm:$0xff] %vm8187_vm2, %v2292_v12 }
 0x3e4   : > { %2365 = vst.msk [vmem:[%s5374_s24 + $0xa0] sm:$0xff] %vm8187_vm2, %v2290_v9 }
 0x3ea   : > { %v2296_v24 = vpop.permute.xlu1 %2295 }
 0x3eb   : > { %v2294_v19 = vpop.permute.xlu0 %2293  ;;  %2368 = vst.msk [vmem:[%s5374_s24 + $0xb8] sm:$0xff] %vm8187_vm2, %v2296_v24 }
 0x3ec   : > { %2367 = vst.msk [vmem:[%s5374_s24 + $0xb0] sm:$0xff] %vm8187_vm2, %v2294_v19 }
 0x3f2   : > { %v2300_v23 = vpop.permute.xlu1 %2299 }
 0x3f3   : > { %v2298_v39 = vpop.permute.xlu0 %2297  ;;  %2370 = vst.msk [vmem:[%s5374_s24 + $0xc8] sm:$0xff] %vm8187_vm2, %v2300_v23 }
 0x3f4   : > { %2369 = vst.msk [vmem:[%s5374_s24 + $0xc0] sm:$0xff] %vm8187_vm2, %v2298_v39 }
 0x3f6   : > { %v2304_v37 = vpop.permute.xlu1 %2303 }
 0x3f7   : > { %v2302_v43 = vpop.permute.xlu0 %2301  ;;  %2372 = vst.msk [vmem:[%s5374_s24 + $0xd8] sm:$0xff] %vm8187_vm2, %v2304_v37 }
 0x3f8   : > { %2371 = vst.msk [vmem:[%s5374_s24 + $0xd0] sm:$0xff] %vm8187_vm2, %v2302_v43 }
 0x3fa   : > { %v2308_v40 = vpop.permute.xlu1 %2307 }
 0x3fb   : > { %v2306_v59 = vpop.permute.xlu0 %2305  ;;  %2374 = vst.msk [vmem:[%s5374_s24 + $0xe8] sm:$0xff] %vm8187_vm2, %v2308_v40 }
 0x3fc   : > { %2373 = vst.msk [vmem:[%s5374_s24 + $0xe0] sm:$0xff] %vm8187_vm2, %v2306_v59 }
 0x3fe   : > { %v2312_v36 = vpop.permute.xlu1 %2311 }
 0x3ff   : > { %v2310_v57 = vpop.permute.xlu0 %2309  ;;  %2376 = vst.msk [vmem:[%s5374_s24 + $0xf8] sm:$0xff] %vm8187_vm2, %v2312_v36 }
 0x400   : > { %2375 = vst.msk [vmem:[%s5374_s24 + $0xf0] sm:$0xff] %vm8187_vm2, %v2310_v57 }
 0x401 PF: > { %p4721_p9 = scmp.ge.s32.totalorder %s5291_s12, 7 }
 0x403   : > { %2380 = sbr.rel (%p4721_p9) target bundleno = 1927 (0x787), region = 44 }
 0x40a   : > { %v2919_v56 = vrot.slane %v6418_v27, 7  ;;  %vm8170_vm3 = vcmask 1040384   ;;  %v2920_v16 = vrot.slane %v6415_v61, 7  ;;  %v2922_v13 = vrot.slane %v6426_v22, 7  ;;  %s5314_s11 = smov 64   ;;  %s5315_s12 = smov 96  }
 0x40b   : > { %v2924_v51 = vrot.slane %v6423_v7, 7  ;;  %v2926_v10 = vrot.slane %v6434_v20, 7  ;;  %v2928_v6 = vrot.slane %v6431_v58, 7  ;;  %v2930_v53 = vrot.slane %v6442_v0, 7  ;;  %s5316_s24 = smov 32  }
 0x40c   : > { %2978 = vrot.lane.b32.xlu0 %v2919_v56, %s5314_s11  ;;  %v2923_v21 = vsel %vm8170_vm3, %v2920_v16, %v2922_v13  ;;  %v2921_v15 = vsel %vm8170_vm3, %v2919_v56, %v2920_v16  ;;  %v2932_v29 = vrot.slane %v6439_v18, 7  ;;  %v2934_v28 = vrot.slane %v6450_v17, 7 }
 0x40d   : > { %2982 = vrot.lane.b32.xlu1 %v2923_v21, %s5314_s11  ;;  %v2925_v55 = vsel %vm8170_vm3, %v2922_v13, %v2924_v51  ;;  %v2927_v34 = vsel %vm8170_vm3, %v2924_v51, %v2926_v10  ;;  %v2929_v60 = vsel %vm8170_vm3, %v2926_v10, %v2928_v6  ;;  %v2931_v14 = vsel %vm8170_vm3, %v2928_v6, %v2930_v53 }
 0x40e   : > { %v2933_v11 = vsel %vm8170_vm3, %v2930_v53, %v2932_v29  ;;  %v2936_v52 = vrot.slane %v6447_v42, 7  ;;  %v2935_v2 = vsel %vm8170_vm3, %v2932_v29, %v2934_v28  ;;  %v2938_v5 = vrot.slane %v6458_v47, 7 }
 0x40f   : > { %v2940_v12 = vrot.slane %v6455_v63, 7  ;;  %v2942_v24 = vrot.slane %v6466_v38, 7  ;;  %v2944_v23 = vrot.slane %v6463_v30, 7  ;;  %v2946_v37 = vrot.slane %v6474_v44, 7 }
 0x410   : > { %2980 = vrot.lane.b32.xlu0 %v2921_v15, %s5314_s11  ;;  %v2937_v33 = vsel %vm8170_vm3, %v2934_v28, %v2936_v52  ;;  %v2939_v9 = vsel %vm8170_vm3, %v2936_v52, %v2938_v5  ;;  %v2948_v40 = vrot.slane %v6471_v25, 7  ;;  %v2950_v36 = vrot.slane %v6482_v32, 7 }
 0x411   : > { %2984 = vrot.lane.b32.xlu1 %v2925_v55, %s5314_s11  ;;  %v2941_v19 = vsel %vm8170_vm3, %v2938_v5, %v2940_v12  ;;  %v2943_v39 = vsel %vm8170_vm3, %v2940_v12, %v2942_v24  ;;  %v2945_v43 = vsel %vm8170_vm3, %v2942_v24, %v2944_v23  ;;  %v2947_v59 = vsel %vm8170_vm3, %v2944_v23, %v2946_v37 }
 0x412   : > { %v2949_v57 = vsel %vm8170_vm3, %v2946_v37, %v2948_v40  ;;  %v2952_v56 = vrot.slane %v6479_v8, 7  ;;  %v2951_v16 = vsel %vm8170_vm3, %v2948_v40, %v2950_v36  ;;  %v2954_v13 = vrot.slane %v6490_v4, 7 }
 0x413   : > { %v2956_v21 = vrot.slane %v6487_v49, 7  ;;  %v2958_v10 = vrot.slane %v6498_v35, 7  ;;  %v2960_v6 = vrot.slane %v6495_v54, 7  ;;  %v2962_v53 = vrot.slane %v6506_v3, 7 }
 0x414   : > { %2986 = vrot.lane.b32.xlu0 %v2927_v34, %s5314_s11  ;;  %v2953_v51 = vsel %vm8170_vm3, %v2950_v36, %v2952_v56  ;;  %v2955_v15 = vsel %vm8170_vm3, %v2952_v56, %v2954_v13  ;;  %v2964_v29 = vrot.slane %v6503_v48, 7  ;;  %v2966_v28 = vrot.slane %v6514_v26, 7 }
 0x415   : > { %2988 = vrot.lane.b32.xlu1 %v2929_v60, %s5314_s11  ;;  %v2957_v55 = vsel %vm8170_vm3, %v2954_v13, %v2956_v21  ;;  %v2959_v34 = vsel %vm8170_vm3, %v2956_v21, %v2958_v10  ;;  %v2961_v60 = vsel %vm8170_vm3, %v2958_v10, %v2960_v6  ;;  %v2968_v52 = vrot.slane %v6511_v50, 7 }
 0x416   : > { %v2970_v5 = vrot.slane %v6520_v62, 7  ;;  %v2972_v12 = vrot.slane %v6517_v45, 7  ;;  %v2974_v24 = vrot.slane %v6526_v46, 7  ;;  %v8129_v23 = vrot.slane %v6523_v41, 7 }
 0x417   : > { %vm3098_vm4 = vcmask 261121   ;;  %v3346_v10 = vrot.slane %v6415_v61, 1  ;;  %vm8185_vm7 = vcmask 1046528  }
 0x418   : > { %2990 = vrot.lane.b32.xlu0 %v2931_v14, %s5314_s11  ;;  %v2963_v14 = vsel %vm8170_vm3, %v2960_v6, %v2962_v53  ;;  %v2977_v37 = vsel %vm8170_vm3, %v2974_v24, %v8129_v23  ;;  %v3368_v23 = vrot.slane %v6466_v38, 1 }
 0x419   : > { %2992 = vrot.lane.b32.xlu1 %v2933_v11, %s5314_s11  ;;  %v2965_v11 = vsel %vm8170_vm3, %v2962_v53, %v2964_v29 }
 0x41c   : > { %2994 = vrot.lane.b32.xlu0 %v2935_v2, %s5314_s11  ;;  %v2967_v2 = vsel %vm8170_vm3, %v2964_v29, %v2966_v28  ;;  %v3348_v29 = vrot.slane %v6426_v22, 1 }
 0x41d   : > { %2996 = vrot.lane.b32.xlu1 %v2937_v33, %s5314_s11  ;;  %v2969_v33 = vsel %vm8170_vm3, %v2966_v28, %v2968_v52 }
 0x420   : > { %2998 = vrot.lane.b32.xlu0 %v2939_v9, %s5314_s11  ;;  %v2971_v9 = vsel %vm8170_vm3, %v2968_v52, %v2970_v5 }
 0x421   : > { %3000 = vrot.lane.b32.xlu1 %v2941_v19, %s5314_s11  ;;  %v2973_v19 = vsel %vm8170_vm3, %v2970_v5, %v2972_v12 }
 0x424   : > { %3002 = vrot.lane.b32.xlu0 %v2943_v39, %s5314_s11  ;;  %v2975_v39 = vsel %vm8170_vm3, %v2972_v12, %v2974_v24  ;;  %v3349_v12 = vsel %vm8185_vm7, %v3346_v10, %v3348_v29 }
 0x425   : > { %3004 = vrot.lane.b32.xlu1 %v2945_v43, %s5314_s11  ;;  %v2381_v43 = vlaneseq }
 0x427   : > { %v6801_v40 = vshrl.u32 %v2381_v43, 7 }
 0x428   : > { %3006 = vrot.lane.b32.xlu0 %v2947_v59, %s5314_s11 }
 0x429   : > { %3008 = vrot.lane.b32.xlu1 %v2949_v57, %s5314_s11  ;;  %v2386_v59 = vadd.s32 32, %v6801_v40  ;;  %v2384_v36 = vadd.s32 16, %v6801_v40 }
 0x42b   : > { %v2446_v57 = vand.u32 15, %v2386_v59  ;;  %v2432_v56 = vand.u32 15, %v2384_v36 }
 0x42c   : > { %3010 = vrot.lane.b32.xlu0 %v2951_v16, %s5314_s11  ;;  %v2388_v16 = vadd.s32 48, %v6801_v40 }
 0x42d   : > { %3012 = vrot.lane.b32.xlu1 %v2953_v51, %s5314_s11  ;;  %vm6818_vm5 = vcmp.ge.s32.totalorder %v2446_v57, 1  ;;  %vm6824_vm6 = vcmp.ge.s32.totalorder %v2432_v56, 1  ;;  %v2394_v57 = vadd.s32 96, %v6801_v40 }
 0x42e   : > { %v2460_v53 = vand.u32 15, %v2388_v16  ;;  %v3356_v16 = vrot.slane %v6442_v0, 1 }
 0x430   : > { %3014 = vrot.lane.b32.xlu0 %v2955_v15, %s5314_s11  ;;  %v3345_v15 = vrot.slane %v6418_v27, 1  ;;  %vm6856_vm8 = vcmp.ge.s32.totalorder %v2460_v53, 1 }
 0x431   : > { %3016 = vrot.lane.b32.xlu1 %v2957_v55, %s5314_s11 }
 0x432   : > { %v3347_v28 = vsel %vm8185_vm7, %v3345_v15, %v3346_v10 }
 0x434   : > { %3018 = vrot.lane.b32.xlu0 %v2959_v34, %s5314_s11 }
 0x435   : > { %3020 = vrot.lane.b32.xlu1 %v2961_v60, %s5314_s11  ;;  %v2390_v60 = vadd.s32 64, %v6801_v40 }
 0x437   : > { %v2474_v5 = vand.u32 15, %v2390_v60 }
 0x438   : > { %3022 = vrot.lane.b32.xlu0 %v2963_v14, %s5314_s11 }
 0x439   : > { %3024 = vrot.lane.b32.xlu1 %v2965_v11, %s5314_s11  ;;  %v3350_v11 = vrot.slane %v6423_v7, 1  ;;  %vm6877_vm9 = vcmp.ge.s32.totalorder %v2474_v5, 1  ;;  %v3360_v5 = vrot.slane %v6450_v17, 1 }
 0x43c   : > { %3026 = vrot.lane.b32.xlu0 %v2967_v2, %s5314_s11 }
 0x43d   : > { %3028 = vrot.lane.b32.xlu1 %v2969_v33, %s5314_s11  ;;  %v2392_v33 = vadd.s32 80, %v6801_v40 }
 0x43f   : > { %v2488_v36 = vand.u32 15, %v2392_v33 }
 0x440   : > { %3030 = vrot.lane.b32.xlu0 %v2971_v9, %s5314_s11  ;;  %v3352_v9 = vrot.slane %v6434_v20, 1 }
 0x441   : > { %3032 = vrot.lane.b32.xlu1 %v2973_v19, %s5314_s11  ;;  %v3351_v19 = vsel %vm8185_vm7, %v3348_v29, %v3350_v11  ;;  %vm6898_vm10 = vcmp.ge.s32.totalorder %v2488_v36, 1  ;;  %v2502_v29 = vand.u32 15, %v2394_v57  ;;  %v2398_v57 = vadd.s32 128, %v6801_v40 }
 0x442   : > { %v3353_v56 = vsel %vm8185_vm7, %v3350_v11, %v3352_v9 }
 0x443   : > { %vm6919_vm11 = vcmp.ge.s32.totalorder %v2502_v29, 1 }
 0x444   : > { %3034 = vrot.lane.b32.xlu0 %v2975_v39, %s5314_s11  ;;  %v3354_v39 = vrot.slane %v6431_v58, 1 }
 0x445   : > { %3036 = vrot.lane.b32.xlu1 %v2977_v37, %s5314_s11 }
 0x446   : > { %v3355_v10 = vsel %vm8185_vm7, %v3352_v9, %v3354_v39  ;;  %v3357_v11 = vsel %vm8185_vm7, %v3354_v39, %v3356_v16  ;;  %v3362_v9 = vrot.slane %v6447_v42, 1 }
 0x448   : > { %3129 = vrot.lane.b32.xlu0 %v6418_v27, %s5315_s12 }
 0x449   : > { %3131 = vrot.lane.b32.xlu1 %v6415_v61, %s5315_s12 }
 0x44c   : > { %3133 = vrot.lane.b32.xlu0 %v6426_v22, %s5315_s12 }
 0x44d   : > { %3135 = vrot.lane.b32.xlu1 %v6423_v7, %s5315_s12  ;;  %v3398_v7 = vrot.slane %v6517_v45, 1 }
 0x450   : > { %3137 = vrot.lane.b32.xlu0 %v6434_v20, %s5315_s12 }
 0x451   : > { %3139 = vrot.lane.b32.xlu1 %v6431_v58, %s5315_s12 }
 0x454   : > { %3141 = vrot.lane.b32.xlu0 %v6442_v0, %s5315_s12 }
 0x455   : > { %3143 = vrot.lane.b32.xlu1 %v6439_v18, %s5315_s12 }
 0x458   : > { %3145 = vrot.lane.b32.xlu0 %v6450_v17, %s5315_s12 }
 0x459   : > { %3147 = vrot.lane.b32.xlu1 %v6447_v42, %s5315_s12 }
 0x45c   : > { %3149 = vrot.lane.b32.xlu0 %v6458_v47, %s5315_s12 }
 0x45d   : > { %3151 = vrot.lane.b32.xlu1 %v6455_v63, %s5315_s12 }
 0x460   : > { %3153 = vrot.lane.b32.xlu0 %v6466_v38, %s5315_s12 }
 0x461   : > { %3155 = vrot.lane.b32.xlu1 %v6463_v30, %s5315_s12 }
 0x464   : > { %3157 = vrot.lane.b32.xlu0 %v6474_v44, %s5315_s12 }
 0x465   : > { %3159 = vrot.lane.b32.xlu1 %v6471_v25, %s5315_s12 }
 0x468   : > { %3161 = vrot.lane.b32.xlu0 %v6482_v32, %s5315_s12 }
 0x469   : > { %3163 = vrot.lane.b32.xlu1 %v6479_v8, %s5315_s12 }
 0x46c   : > { %3165 = vrot.lane.b32.xlu0 %v6490_v4, %s5315_s12 }
 0x46d   : > { %3167 = vrot.lane.b32.xlu1 %v6487_v49, %s5315_s12 }
 0x470   : > { %3169 = vrot.lane.b32.xlu0 %v6498_v35, %s5315_s12 }
 0x471   : > { %3171 = vrot.lane.b32.xlu1 %v6495_v54, %s5315_s12 }
 0x474   : > { %3173 = vrot.lane.b32.xlu0 %v6506_v3, %s5315_s12 }
 0x475   : > { %3175 = vrot.lane.b32.xlu1 %v6503_v48, %s5315_s12 }
 0x478   : > { %3177 = vrot.lane.b32.xlu0 %v6514_v26, %s5315_s12 }
 0x479   : > { %3179 = vrot.lane.b32.xlu1 %v6511_v50, %s5315_s12 }
 0x47c   : > { %3181 = vrot.lane.b32.xlu0 %v6520_v62, %s5315_s12 }
 0x47d   : > { %3183 = vrot.lane.b32.xlu1 %v6517_v45, %s5315_s12  ;;  %v3402_v45 = vrot.slane %v6523_v41, 1 }
 0x47e   : > { %v6822_v51 = vpop.permute.xlu0 %2978 }
 0x47f   : > { %v3068_v55 = vsel %vm6824_vm6, %v6822_v51, 0.0  ;;  %v6833_v6 = vpop.permute.xlu1 %2982 }
 0x480   : > { %3185 = vrot.lane.b32.xlu0 %v6526_v46, %s5315_s12  ;;  %3099 = vst.msk [vmem:[#allocation2 + $0x30] sm:$0xfe] %vm3098_vm4, %v3068_v55  ;;  %v3070_v34 = vsel %vm6818_vm5, %v6833_v6, 0.0  ;;  %v3358_v55 = vrot.slane %v6439_v18, 1 }
 0x481   : > { %3187 = vrot.lane.b32.xlu1 %v6523_v41, %s5315_s12  ;;  %3101 = vst.msk [vmem:[#allocation2 + $0x60] sm:$0xff] %vm8187_vm2, %v3070_v34 }
 0x482   : > { %v6845_v14 = vpop.permute.xlu0 %2980 }
 0x483   : > { %3100 = vst.msk [vmem:[#allocation2 + $0x48] sm:$0xff] %vm8187_vm2, %v6845_v14  ;;  %v6851_v52 = vpop.permute.xlu1 %2984 }
 0x484   : > { %3102 = vst.msk [vmem:[#allocation2 + $0x78] sm:$0xff] %vm8187_vm2, %v6851_v52  ;;  %3406 = vrot.lane.b32.xlu0 %v3345_v15, %s5314_s11 }
 0x485   : > { %3408 = vrot.lane.b32.xlu1 %v3347_v28, %s5314_s11  ;;  %v2396_v28 = vadd.s32 112, %v6801_v40 }
 0x486   : > { %v6864_v24 = vpop.permute.xlu0 %2986 }
 0x487   : > { %v6868_v37 = vpop.permute.xlu1 %2988  ;;  %v3072_v43 = vsel %vm6856_vm8, %v6864_v24, 0.0  ;;  %v2516_v36 = vand.u32 15, %v2396_v28  ;;  %v2530_v28 = vand.u32 15, %v2398_v57 }
 0x488   : > { %3104 = vst.msk [vmem:[#allocation2 + $0xa8] sm:$0xff] %vm8187_vm2, %v6868_v37  ;;  %3410 = vrot.lane.b32.xlu0 %v3349_v12, %s5314_s11  ;;  %3103 = vst.msk [vmem:[#allocation2 + $0x90] sm:$0xff] %vm8187_vm2, %v3072_v43  ;;  %v3359_v12 = vsel %vm8185_vm7, %v3356_v16, %v3358_v55  ;;  %v3364_v16 = vrot.slane %v6458_v47, 1 }
 0x489   : > { %3412 = vrot.lane.b32.xlu1 %v3351_v19, %s5314_s11  ;;  %vm6940_vm12 = vcmp.ge.s32.totalorder %v2516_v36, 1  ;;  %vm6961_vm13 = vcmp.ge.s32.totalorder %v2530_v28, 1 }
 0x48a   : > { %v6885_v15 = vpop.permute.xlu0 %2990 }
 0x48b   : > { %v6889_v34 = vpop.permute.xlu1 %2992  ;;  %v3074_v53 = vsel %vm6877_vm9, %v6885_v15, 0.0 }
 0x48c   : > { %3106 = vst.msk [vmem:[#allocation2 + $0xd8] sm:$0xff] %vm8187_vm2, %v6889_v34  ;;  %3414 = vrot.lane.b32.xlu0 %v3353_v56, %s5314_s11  ;;  %3105 = vst.msk [vmem:[#allocation2 + $0xc0] sm:$0xff] %vm8187_vm2, %v3074_v53  ;;  %v3361_v56 = vsel %vm8185_vm7, %v3358_v55, %v3360_v5  ;;  %v3363_v53 = vsel %vm8185_vm7, %v3360_v5, %v3362_v9  ;;  %v8323_v55 = vmov 0  ;;  %v2400_v5 = vadd.s32 144, %v6801_v40 }
 0x48d   : > { %3416 = vrot.lane.b32.xlu1 %v3355_v10, %s5314_s11  ;;  %v8324_v55 = vsel %vm6940_vm12, 4294967295, %v8323_v55 }
 0x48e   : > { %v6906_v33 = vpop.permute.xlu0 %2994  ;;  %v2544_v57 = vand.u32 15, %v2400_v5 }
 0x48f   : > { %v6910_v19 = vpop.permute.xlu1 %2996  ;;  %v3076_v43 = vsel %vm6898_vm10, %v6906_v33, 0.0 }
 0x490   : > { %3108 = vst.msk [vmem:[#allocation2 + $0x108] sm:$0xff] %vm8187_vm2, %v6910_v19  ;;  %3418 = vrot.lane.b32.xlu0 %v3357_v11, %s5314_s11  ;;  %3107 = vst.msk [vmem:[#allocation2 + $0xf0] sm:$0xff] %vm8187_vm2, %v3076_v43  ;;  %v3366_v11 = vrot.slane %v6455_v63, 1  ;;  %vm6982_vm14 = vcmp.ge.s32.totalorder %v2544_v57, 1 }
 0x491   : > { %3420 = vrot.lane.b32.xlu1 %v3359_v12, %s5314_s11  ;;  %v3365_v12 = vsel %vm8185_vm7, %v3362_v9, %v3364_v16  ;;  %v8325_v9 = vmov 0 }
 0x492   : > { %v6927_v10 = vpop.permute.xlu0 %2998  ;;  %v3367_v47 = vsel %vm8185_vm7, %v3364_v16, %v3366_v11  ;;  %v8326_v9 = vsel %vm6961_vm13, 4294967295, %v8325_v9  ;;  %v2402_v16 = vadd.s32 160, %v6801_v40 }
 0x493   : > { %v6931_v43 = vpop.permute.xlu1 %3000  ;;  %v3078_v29 = vsel %vm6919_vm11, %v6927_v10, 0.0 }
 0x494   : > { %3110 = vst.msk [vmem:[#allocation2 + $0x138] sm:$0xff] %vm8187_vm2, %v6931_v43  ;;  %3422 = vrot.lane.b32.xlu0 %v3361_v56, %s5314_s11  ;;  %3109 = vst.msk [vmem:[#allocation2 + $0x120] sm:$0xff] %vm8187_vm2, %v3078_v29  ;;  %v3370_v56 = vrot.slane %v6463_v30, 1  ;;  %v3372_v30 = vrot.slane %v6474_v44, 1 }
 0x495   : > { %3424 = vrot.lane.b32.xlu1 %v3363_v53, %s5314_s11  ;;  %v3369_v53 = vsel %vm8185_vm7, %v3366_v11, %v3368_v23  ;;  %v2404_v11 = vadd.s32 176, %v6801_v40 }
 0x496   : > { %v6948_v63 = vpop.permute.xlu0 %3002  ;;  %v3371_v42 = vsel %vm8185_vm7, %v3368_v23, %v3370_v56  ;;  %v2558_v23 = vand.u32 15, %v2402_v16  ;;  %v3373_v5 = vsel %vm8185_vm7, %v3370_v56, %v3372_v30  ;;  %v2406_v56 = vadd.s32 192, %v6801_v40 }
 0x497   : > { %v6952_v29 = vpop.permute.xlu1 %3004  ;;  %v3080_v36 = vsel %vm6940_vm12, %v6948_v63, 0.0 }
 0x498   : > { %3112 = vst.msk [vmem:[#allocation2 + $0x168] sm:$0xff] %vm8187_vm2, %v6952_v29  ;;  %3426 = vrot.lane.b32.xlu0 %v3365_v12, %s5314_s11  ;;  %3111 = vst.msk [vmem:[#allocation2 + $0x150] sm:$0xff] %vm8187_vm2, %v3080_v36  ;;  %v3374_v12 = vrot.slane %v6471_v25, 1  ;;  %v3376_v25 = vrot.slane %v6482_v32, 1  ;;  %vm7003_vm15 = vcmp.ge.s32.totalorder %v2558_v23, 1 }
 0x499   : > { %3428 = vrot.lane.b32.xlu1 %v3367_v47, %s5314_s11  ;;  %v8327_v47 = vmov 0 }
 0x49a   : > { %v6969_v38 = vpop.permute.xlu0 %3006  ;;  %v8328_v47 = vsel %vm6982_vm14, 4294967295, %v8327_v47  ;;  %v3375_v17 = vsel %vm8185_vm7, %v3372_v30, %v3374_v12  ;;  %v2572_v30 = vand.u32 15, %v2404_v11  ;;  %v3377_v16 = vsel %vm8185_vm7, %v3374_v12, %v3376_v25 }
 0x49b   : > { %v6973_v36 = vpop.permute.xlu1 %3008  ;;  %v3082_v28 = vsel %vm6961_vm13, %v6969_v38, 0.0  ;;  %v2408_v12 = vadd.s32 208, %v6801_v40 }
 0x49c   : > { %3114 = vst.msk [vmem:[#allocation2 + $0x198] sm:$0xff] %vm8187_vm2, %v6973_v36  ;;  %3430 = vrot.lane.b32.xlu0 %v3369_v53, %s5314_s11  ;;  %3113 = vst.msk [vmem:[#allocation2 + $0x180] sm:$0xff] %vm8187_vm2, %v3082_v28  ;;  %v3378_v53 = vrot.slane %v6479_v8, 1  ;;  %v3380_v8 = vrot.slane %v6490_v4, 1  ;;  %vm7024_vm0 = vcmp.ge.s32.totalorder %v2572_v30, 1 }
 0x49d   : > { %3432 = vrot.lane.b32.xlu1 %v3371_v42, %s5314_s11  ;;  %v8329_v42 = vmov 0 }
 0x49e   : > { %v6990_v44 = vpop.permute.xlu0 %3010  ;;  %v8330_v42 = vsel %vm7003_vm15, 4294967295, %v8329_v42  ;;  %v3379_v18 = vsel %vm8185_vm7, %v3376_v25, %v3378_v53  ;;  %v2586_v25 = vand.u32 15, %v2406_v56  ;;  %v3381_v11 = vsel %vm8185_vm7, %v3378_v53, %v3380_v8 }
 0x49f   : > { %v6994_v28 = vpop.permute.xlu1 %3012  ;;  %v3084_v57 = vsel %vm6982_vm14, %v6990_v44, 0.0  ;;  %v2410_v53 = vadd.s32 224, %v6801_v40 }
 0x4a0   : > { %3116 = vst.msk [vmem:[#allocation2 + $0x1c8] sm:$0xff] %vm8187_vm2, %v6994_v28  ;;  %3434 = vrot.lane.b32.xlu0 %v3373_v5, %s5314_s11  ;;  %3115 = vst.msk [vmem:[#allocation2 + $0x1b0] sm:$0xff] %vm8187_vm2, %v3084_v57  ;;  %v3382_v5 = vrot.slane %v6487_v49, 1  ;;  %v3384_v49 = vrot.slane %v6498_v35, 1  ;;  %vm7045_vm1 = vcmp.ge.s32.totalorder %v2586_v25, 1 }
 0x4a1   : > { %3436 = vrot.lane.b32.xlu1 %v3375_v17, %s5314_s11  ;;  %v8331_v17 = vmov 0 }
 0x4a2   : > { %v7011_v32 = vpop.permute.xlu0 %3014  ;;  %v8332_v17 = vsel %vm7024_vm0, 4294967295, %v8331_v17  ;;  %v3383_v0 = vsel %vm8185_vm7, %v3380_v8, %v3382_v5  ;;  %v2600_v8 = vand.u32 15, %v2408_v12  ;;  %v3385_v56 = vsel %vm8185_vm7, %v3382_v5, %v3384_v49 }
 0x4a3   : > { %v7015_v57 = vpop.permute.xlu1 %3016  ;;  %v3086_v23 = vsel %vm7003_vm15, %v7011_v32, 0.0  ;;  %v2412_v5 = vadd.s32 240, %v6801_v40 }
 0x4a4   : > { %3118 = vst.msk [vmem:[#allocation2 + $0x1f8] sm:$0xff] %vm8187_vm2, %v7015_v57  ;;  %3438 = vrot.lane.b32.xlu0 %v3377_v16, %s5314_s11  ;;  %3117 = vst.msk [vmem:[#allocation2 + $0x1e0] sm:$0xff] %vm8187_vm2, %v3086_v23  ;;  %v3386_v16 = vrot.slane %v6495_v54, 1  ;;  %v3388_v54 = vrot.slane %v6506_v3, 1  ;;  %vm7066_vm4 = vcmp.ge.s32.totalorder %v2600_v8, 1 }
 0x4a5   : > { %3440 = vrot.lane.b32.xlu1 %v3379_v18, %s5314_s11  ;;  %v8333_v18 = vmov 0 }
 0x4a6   : > { %v7032_v4 = vpop.permute.xlu0 %3018  ;;  %v8334_v18 = vsel %vm7045_vm1, 4294967295, %v8333_v18  ;;  %v3387_v58 = vsel %vm8185_vm7, %v3384_v49, %v3386_v16  ;;  %v2614_v49 = vand.u32 15, %v2410_v53  ;;  %v3389_v12 = vsel %vm8185_vm7, %v3386_v16, %v3388_v54 }
 0x4a7   : > { %v7036_v23 = vpop.permute.xlu1 %3020  ;;  %v3088_v30 = vsel %vm7024_vm0, %v7032_v4, 0.0  ;;  %v3396_v53 = vrot.slane %v6520_v62, 1 }
 0x4a8   : > { %3120 = vst.msk [vmem:[#allocation2 + $0x228] sm:$0xff] %vm8187_vm2, %v7036_v23  ;;  %3442 = vrot.lane.b32.xlu0 %v3381_v11, %s5314_s11  ;;  %3119 = vst.msk [vmem:[#allocation2 + $0x210] sm:$0xff] %vm8187_vm2, %v3088_v30  ;;  %v3390_v11 = vrot.slane %v6503_v48, 1  ;;  %v3392_v48 = vrot.slane %v6514_v26, 1  ;;  %vm7087_vm3 = vcmp.ge.s32.totalorder %v2614_v49, 1 }
 0x4a9   : > { %3444 = vrot.lane.b32.xlu1 %v3383_v0, %s5314_s11  ;;  %v8335_v0 = vmov 0 }
 0x4aa   : > { %v7053_v35 = vpop.permute.xlu0 %3022  ;;  %v8336_v0 = vsel %vm7066_vm4, 4294967295, %v8335_v0  ;;  %v3391_v20 = vsel %vm8185_vm7, %v3388_v54, %v3390_v11  ;;  %v2628_v54 = vand.u32 15, %v2412_v5  ;;  %v3393_v16 = vsel %vm8185_vm7, %v3390_v11, %v3392_v48 }
 0x4ab   : > { %v7057_v30 = vpop.permute.xlu1 %3024  ;;  %v3090_v25 = vsel %vm7045_vm1, %v7053_v35, 0.0  ;;  %v3400_v11 = vrot.slane %v6526_v46, 1 }
 0x4ac   : > { %3122 = vst.msk [vmem:[#allocation2 + $0x258] sm:$0xff] %vm8187_vm2, %v7057_v30  ;;  %3446 = vrot.lane.b32.xlu0 %v3385_v56, %s5314_s11  ;;  %3121 = vst.msk [vmem:[#allocation2 + $0x240] sm:$0xff] %vm8187_vm2, %v3090_v25  ;;  %v3394_v56 = vrot.slane %v6511_v50, 1 }
 0x4ad   : > { %3448 = vrot.lane.b32.xlu1 %v3387_v58, %s5314_s11  ;;  %v8337_v58 = vmov 0 }
 0x4ae   : > { %v7074_v3 = vpop.permute.xlu0 %3026  ;;  %v8338_v58 = vsel %vm7087_vm3, 4294967295, %v8337_v58  ;;  %v3395_v26 = vsel %vm8185_vm7, %v3392_v48, %v3394_v56  ;;  %v3397_v48 = vsel %vm8185_vm7, %v3394_v56, %v3396_v53  ;;  %v8186_v56 = vrot.slane %v6532_v31, 1 }
 0x4af   : > { %v7078_v25 = vpop.permute.xlu1 %3028  ;;  %v3092_v8 = vsel %vm7066_vm4, %v7074_v3, 0.0  ;;  %vm7107_vm4 = vcmp.ge.s32.totalorder %v2628_v54, 1 }
 0x4b0   : > { %3124 = vst.msk [vmem:[#allocation2 + $0x288] sm:$0xff] %vm8187_vm2, %v7078_v25  ;;  %3450 = vrot.lane.b32.xlu0 %v3389_v12, %s5314_s11  ;;  %3123 = vst.msk [vmem:[#allocation2 + $0x270] sm:$0xff] %vm8187_vm2, %v3092_v8  ;;  %v3399_v8 = vsel %vm8185_vm7, %v3396_v53, %v3398_v7  ;;  %v3403_v53 = vsel %vm8185_vm7, %v3400_v11, %v3402_v45 }
 0x4b1   : > { %3452 = vrot.lane.b32.xlu1 %v3391_v20, %s5314_s11  ;;  %v8339_v20 = vmov 0 }
 0x4b2   : > { %v7094_v50 = vpop.permute.xlu0 %3030  ;;  %v8340_v20 = vsel %vm7107_vm4, 4294967295, %v8339_v20 }
 0x4b3   : > { %v7098_v12 = vpop.permute.xlu1 %3032  ;;  %v3094_v49 = vsel %vm7087_vm3, %v7094_v50, 0.0  ;;  %8341 = vst [vmem:[#allocation32_spill] sm:$0xff] %v8340_v20  ;;  %vm8188_vm3 = vcmask 523520  }
 0x4b4   : > { %3126 = vst.msk [vmem:[#allocation2 + $0x2b8] sm:$0xff] %vm8187_vm2, %v7098_v12  ;;  %3454 = vrot.lane.b32.xlu0 %v3393_v16, %s5314_s11  ;;  %3125 = vst.msk [vmem:[#allocation2 + $0x2a0] sm:$0xff] %vm8187_vm2, %v3094_v49 }
 0x4b5   : > { %3456 = vrot.lane.b32.xlu1 %v3395_v26, %s5314_s11  ;;  %v3401_v26 = vsel %vm8185_vm7, %v3398_v7, %v3400_v11 }
 0x4b6   : > { %v7114_v5 = vpop.permute.xlu0 %3034 }
 0x4b7   : > { %v7118_v62 = vpop.permute.xlu1 %3036  ;;  %v3096_v54 = vsel %vm7107_vm4, %v7114_v5, 0.0 }
 0x4b8   : > { %3128 = vst.msk [vmem:[#allocation2 + $0x2e8] sm:$0xff] %vm8187_vm2, %v7118_v62  ;;  %3458 = vrot.lane.b32.xlu0 %v3397_v48, %s5314_s11  ;;  %3127 = vst.msk [vmem:[#allocation2 + $0x2d0] sm:$0xff] %vm8187_vm2, %v3096_v54  ;;  %v3405_v48 = vsel %vm8185_vm7, %v3402_v45, %v8186_v56 }
 0x4b9   : > { %3460 = vrot.lane.b32.xlu1 %v3399_v8, %s5314_s11 }
 0x4ba   : > { %v3130_v16 = vpop.permute.xlu0 %3129 }
 0x4bb   : > { %3220 = vst.msk [vmem:[#allocation2 + $0x30] sm:$0xff] %vm8188_vm3, %v3130_v16  ;;  %v3132_v49 = vpop.permute.xlu1 %3131 }
 0x4bc   : > { %3221 = vst.msk [vmem:[#allocation2 + $0x48] sm:$0xff] %vm8188_vm3, %v3132_v49  ;;  %3462 = vrot.lane.b32.xlu0 %v3401_v26, %s5314_s11 }
 0x4bd   : > { %3464 = vrot.lane.b32.xlu1 %v3403_v53, %s5314_s11 }
 0x4be   : > { %v3134_v8 = vpop.permute.xlu0 %3133 }
 0x4bf   : > { %3222 = vst.msk [vmem:[#allocation2 + $0x60] sm:$0xff] %vm8188_vm3, %v3134_v8  ;;  %v3136_v7 = vpop.permute.xlu1 %3135 }
 0x4c0   : > { %3223 = vst.msk [vmem:[#allocation2 + $0x78] sm:$0xff] %vm8188_vm3, %v3136_v7  ;;  %3466 = vrot.lane.b32.xlu0 %v3405_v48, %s5314_s11 }
 0x4c2   : > { %v3138_v11 = vpop.permute.xlu0 %3137 }
 0x4c3   : > { %3224 = vst.msk [vmem:[#allocation2 + $0x90] sm:$0xff] %vm8188_vm3, %v3138_v11  ;;  %v3140_v54 = vpop.permute.xlu1 %3139 }
 0x4c4   : > { %3225 = vst.msk [vmem:[#allocation2 + $0xa8] sm:$0xff] %vm8188_vm3, %v3140_v54 }
 0x4c6   : > { %v3142_v26 = vpop.permute.xlu0 %3141 }
 0x4c7   : > { %3226 = vst.msk [vmem:[#allocation2 + $0xc0] sm:$0xff] %vm8188_vm3, %v3142_v26  ;;  %v3144_v16 = vpop.permute.xlu1 %3143 }
 0x4c8   : > { %3227 = vst.msk [vmem:[#allocation2 + $0xd8] sm:$0xff] %vm8188_vm3, %v3144_v16 }
 0x4ca   : > { %v3146_v45 = vpop.permute.xlu0 %3145 }
 0x4cb   : > { %3228 = vst.msk [vmem:[#allocation2 + $0xf0] sm:$0xff] %vm8188_vm3, %v3146_v45  ;;  %v3148_v53 = vpop.permute.xlu1 %3147 }
 0x4cc   : > { %3229 = vst.msk [vmem:[#allocation2 + $0x108] sm:$0xff] %vm8188_vm3, %v3148_v53 }
 0x4ce   : > { %v3150_v49 = vpop.permute.xlu0 %3149 }
 0x4cf   : > { %3230 = vst.msk [vmem:[#allocation2 + $0x120] sm:$0xff] %vm8188_vm3, %v3150_v49  ;;  %v3152_v48 = vpop.permute.xlu1 %3151 }
 0x4d0   : > { %3231 = vst.msk [vmem:[#allocation2 + $0x138] sm:$0xff] %vm8188_vm3, %v3152_v48 }
 0x4d2   : > { %v3154_v8 = vpop.permute.xlu0 %3153 }
 0x4d3   : > { %3232 = vst.msk [vmem:[#allocation2 + $0x150] sm:$0xff] %vm8188_vm3, %v3154_v8  ;;  %v3156_v7 = vpop.permute.xlu1 %3155 }
 0x4d4   : > { %3233 = vst.msk [vmem:[#allocation2 + $0x168] sm:$0xff] %vm8188_vm3, %v3156_v7 }
 0x4d6   : > { %v3158_v11 = vpop.permute.xlu0 %3157 }
 0x4d7   : > { %3234 = vst.msk [vmem:[#allocation2 + $0x180] sm:$0xff] %vm8188_vm3, %v3158_v11  ;;  %v3160_v54 = vpop.permute.xlu1 %3159 }
 0x4d8   : > { %3235 = vst.msk [vmem:[#allocation2 + $0x198] sm:$0xff] %vm8188_vm3, %v3160_v54 }
 0x4da   : > { %v3162_v26 = vpop.permute.xlu0 %3161 }
 0x4db   : > { %3236 = vst.msk [vmem:[#allocation2 + $0x1b0] sm:$0xff] %vm8188_vm3, %v3162_v26  ;;  %v3164_v16 = vpop.permute.xlu1 %3163  ;;  %v2383_v26 = vadd.s32 8, %v6801_v40 }
 0x4dc   : > { %3237 = vst.msk [vmem:[#allocation2 + $0x1c8] sm:$0xff] %vm8188_vm3, %v3164_v16 }
 0x4de   : > { %v3166_v45 = vpop.permute.xlu0 %3165 }
 0x4df   : > { %3238 = vst.msk [vmem:[#allocation2 + $0x1e0] sm:$0xff] %vm8188_vm3, %v3166_v45  ;;  %v3168_v53 = vpop.permute.xlu1 %3167 }
 0x4e0   : > { %3239 = vst.msk [vmem:[#allocation2 + $0x1f8] sm:$0xff] %vm8188_vm3, %v3168_v53  ;;  %v2425_v53 = vand.u32 15, %v2383_v26 }
 0x4e2   : > { %v3170_v49 = vpop.permute.xlu0 %3169  ;;  %vm7169_vm7 = vcmp.lt.s32.totalorder %v2425_v53, 15 }
 0x4e3   : > { %3240 = vst.msk [vmem:[#allocation2 + $0x210] sm:$0xff] %vm8188_vm3, %v3170_v49  ;;  %v3172_v48 = vpop.permute.xlu1 %3171  ;;  %v2385_v49 = vadd.s32 24, %v6801_v40 }
 0x4e4   : > { %3241 = vst.msk [vmem:[#allocation2 + $0x228] sm:$0xff] %vm8188_vm3, %v3172_v48 }
 0x4e6   : > { %v3174_v8 = vpop.permute.xlu0 %3173 }
 0x4e7   : > { %3242 = vst.msk [vmem:[#allocation2 + $0x240] sm:$0xff] %vm8188_vm3, %v3174_v8  ;;  %v3176_v7 = vpop.permute.xlu1 %3175 }
 0x4e8   : > { %3243 = vst.msk [vmem:[#allocation2 + $0x258] sm:$0xff] %vm8188_vm3, %v3176_v7  ;;  %v8342_v7 = vmov 0 }
 0x4e9   : > { %v8343_v7 = vsel %vm7169_vm7, 4294967295, %v8342_v7 }
 0x4ea   : > { %v3178_v11 = vpop.permute.xlu0 %3177  ;;  %8344 = vst [vmem:[#allocation33_spill] sm:$0xff] %v8343_v7 }
 0x4eb   : > { %3244 = vst.msk [vmem:[#allocation2 + $0x270] sm:$0xff] %vm8188_vm3, %v3178_v11  ;;  %v3180_v54 = vpop.permute.xlu1 %3179  ;;  %v2439_v11 = vand.u32 15, %v2385_v49  ;;  %v2389_v49 = vadd.s32 56, %v6801_v40 }
 0x4ec   : > { %3245 = vst.msk [vmem:[#allocation2 + $0x288] sm:$0xff] %vm8188_vm3, %v3180_v54  ;;  %v2387_v54 = vadd.s32 40, %v6801_v40 }
 0x4ed   : > { %vm7181_vm2 = vcmp.lt.s32.totalorder %v2439_v11, 15  ;;  %v8352_v11 = vmov 0 }
 0x4ee   : > { %v3182_v16 = vpop.permute.xlu0 %3181  ;;  %v2453_v53 = vand.u32 15, %v2387_v54  ;;  %v2467_v54 = vand.u32 15, %v2389_v49 }
 0x4ef   : > { %3246 = vst.msk [vmem:[#allocation2 + $0x2a0] sm:$0xff] %vm8188_vm3, %v3182_v16  ;;  %v3184_v45 = vpop.permute.xlu1 %3183 }
 0x4f0   : > { %3247 = vst.msk [vmem:[#allocation2 + $0x2b8] sm:$0xff] %vm8188_vm3, %v3184_v45  ;;  %v8346_v45 = vmov 0  ;;  %vm7198_vm4 = vcmp.lt.s32.totalorder %v2453_v53, 15  ;;  %vm7219_vm0 = vcmp.lt.s32.totalorder %v2467_v54, 15  ;;  %v8358_v53 = vmov 0 }
 0x4f1   : > { %v8347_v45 = vsel %vm7181_vm2, 4294967295, %v8346_v45  ;;  %v8353_v11 = vsel %vm7198_vm4, 4294967295, %v8352_v11  ;;  %v8359_v53 = vsel %vm7219_vm0, 4294967295, %v8358_v53 }
 0x4f2   : > { %v3186_v48 = vpop.permute.xlu0 %3185  ;;  %8348 = vst [vmem:[#allocation35_spill] sm:$0xff] %v8347_v45  ;;  %8354 = vst [vmem:[#allocation38_spill] sm:$0xff] %v8353_v11 }
 0x4f3   : > { %3248 = vst.msk [vmem:[#allocation2 + $0x2d0] sm:$0xff] %vm8188_vm3, %v3186_v48  ;;  %v3188_v8 = vpop.permute.xlu1 %3187  ;;  %8360 = vst [vmem:[#allocation41_spill] sm:$0xff] %v8359_v53 }
 0x4f4   : > { %3249 = vst.msk [vmem:[#allocation2 + $0x2e8] sm:$0xff] %vm8188_vm3, %v3188_v8  ;;  %vm8351_vm3 = vcmask 261120  }
 0x4f5   : > { %vm8357_vm1 = vmmov %vm8351_vm3 }
 0x4f6   : > { %v3407_v16 = vpop.permute.xlu0 %3406 }
 0x4f7   : > { %v7174_v56 = vpop.permute.xlu1 %3408  ;;  %v3499_v26 = vsel %vm7169_vm7, %v3407_v16, 0.0 }
 0x4f8   : > { %8345 = vst [vmem:[#allocation34_spill] sm:$0xff] %v7174_v56  ;;  %3563 = vrot.lane.b32.xlu0 %v7174_v56, %s5314_s11  ;;  %3561 = vrot.lane.b32.xlu1 %v3499_v26, %s5314_s11  ;;  %v2391_v26 = vadd.s32 72, %v6801_v40 }
 0x4fa   : > { %v7186_v48 = vpop.permute.xlu0 %3410  ;;  %v2481_v49 = vand.u32 15, %v2391_v26  ;;  %v2395_v26 = vadd.s32 104, %v6801_v40 }
 0x4fb   : > { %8349 = vst [vmem:[#allocation36_spill] sm:$0xff] %v7186_v48  ;;  %v7188_v8 = vpop.permute.xlu1 %3412  ;;  %v3501_v16 = vsel %vm7181_vm2, %v7186_v48, 0.0 }
 0x4fc   : > { %8350 = vst [vmem:[#allocation37_spill] sm:$0xff] %v7188_v8  ;;  %4570 = vst.msk [vmem:[#allocation2 + $0x10] sm:$0xff] %vm8351_vm3, %v7188_v8  ;;  %3567 = vrot.lane.b32.xlu0 %v7188_v8, %s5314_s11  ;;  %3565 = vrot.lane.b32.xlu1 %v3501_v16, %s5314_s11  ;;  %v2393_v16 = vadd.s32 88, %v6801_v40 }
 0x4fe   : > { %v7203_v56 = vpop.permute.xlu0 %3414  ;;  %v2495_v54 = vand.u32 15, %v2393_v16  ;;  %v2397_v16 = vadd.s32 120, %v6801_v40 }
 0x4ff   : > { %8355 = vst [vmem:[#allocation39_spill] sm:$0xff] %v7203_v56  ;;  %v4541_v48 = vsel %vm7169_vm7, %v7203_v56, 0.0  ;;  %v7208_v46 = vpop.permute.xlu1 %3416  ;;  %v3503_v8 = vsel %vm7198_vm4, %v7203_v56, 0.0  ;;  %vm7240_vm7 = vcmp.lt.s32.totalorder %v2481_v49, 15  ;;  %v2509_v49 = vand.u32 15, %v2395_v26 }
 0x500   : > { %8356 = vst [vmem:[#allocation40_spill] sm:$0xff] %v7208_v46  ;;  %4571 = vst.msk [vmem:[#allocation2 + $0x28] sm:$0xff] %vm8351_vm3, %v4541_v48  ;;  %3571 = vrot.lane.b32.xlu0 %v7208_v46, %s5314_s11  ;;  %3569 = vrot.lane.b32.xlu1 %v3503_v8, %s5314_s11  ;;  %v8364_v8 = vmov 0  ;;  %v2399_v26 = vadd.s32 136, %v6801_v40 }
 0x501   : > { %4572 = vst.msk [vmem:[#allocation2 + $0x40] sm:$0xff] %vm8357_vm1, %v7208_v46  ;;  %vm8363_vm3 = vmmov %vm8357_vm1  ;;  %v8365_v8 = vsel %vm7240_vm7, 4294967295, %v8364_v8 }
 0x502   : > { %v7224_v7 = vpop.permute.xlu0 %3418  ;;  %8366 = vst [vmem:[#allocation44_spill] sm:$0xff] %v8365_v8 }
 0x503   : > { %8361 = vst [vmem:[#allocation42_spill] sm:$0xff] %v7224_v7  ;;  %v4543_v48 = vsel %vm7181_vm2, %v7224_v7, 0.0  ;;  %v7229_v56 = vpop.permute.xlu1 %3420  ;;  %v3505_v46 = vsel %vm7219_vm0, %v7224_v7, 0.0  ;;  %vm7261_vm2 = vcmp.lt.s32.totalorder %v2495_v54, 15  ;;  %v2523_v54 = vand.u32 15, %v2397_v16 }
 0x504   : > { %8362 = vst [vmem:[#allocation43_spill] sm:$0xff] %v7229_v56  ;;  %4573 = vst.msk [vmem:[#allocation2 + $0x58] sm:$0xff] %vm8357_vm1, %v4543_v48  ;;  %3575 = vrot.lane.b32.xlu0 %v7229_v56, %s5314_s11  ;;  %3573 = vrot.lane.b32.xlu1 %v3505_v46, %s5314_s11  ;;  %v8370_v46 = vmov 0  ;;  %v2401_v16 = vadd.s32 152, %v6801_v40 }
 0x505   : > { %4574 = vst.msk [vmem:[#allocation2 + $0x70] sm:$0xff] %vm8363_vm3, %v7229_v56  ;;  %vm8369_vm3 = vmmov %vm8357_vm1  ;;  %v8371_v46 = vsel %vm7261_vm2, 4294967295, %v8370_v46 }
 0x506   : > { %v7245_v45 = vpop.permute.xlu0 %3422  ;;  %8372 = vst [vmem:[#allocation47_spill] sm:$0xff] %v8371_v46 }
 0x507   : > { %8367 = vst [vmem:[#allocation45_spill] sm:$0xff] %v7245_v45  ;;  %v4545_v48 = vsel %vm7198_vm4, %v7245_v45, 0.0  ;;  %v7250_v7 = vpop.permute.xlu1 %3424  ;;  %v3507_v56 = vsel %vm7240_vm7, %v7245_v45, 0.0  ;;  %vm7282_vm4 = vcmp.lt.s32.totalorder %v2509_v49, 15  ;;  %v2537_v49 = vand.u32 15, %v2399_v26 }
 0x508   : > { %8368 = vst [vmem:[#allocation46_spill] sm:$0xff] %v7250_v7  ;;  %4575 = vst.msk [vmem:[#allocation2 + $0x88] sm:$0xff] %vm8357_vm1, %v4545_v48  ;;  %3579 = vrot.lane.b32.xlu0 %v7250_v7, %s5314_s11  ;;  %3577 = vrot.lane.b32.xlu1 %v3507_v56, %s5314_s11  ;;  %v8376_v56 = vmov 0  ;;  %v2403_v26 = vadd.s32 168, %v6801_v40 }
 0x509   : > { %4576 = vst.msk [vmem:[#allocation2 + $0xa0] sm:$0xff] %vm8369_vm3, %v7250_v7  ;;  %vm8375_vm3 = vmmov %vm8357_vm1  ;;  %v8377_v56 = vsel %vm7282_vm4, 4294967295, %v8376_v56 }
 0x50a   : > { %v7266_v11 = vpop.permute.xlu0 %3426  ;;  %8378 = vst [vmem:[#allocation50_spill] sm:$0xff] %v8377_v56 }
 0x50b   : > { %8373 = vst [vmem:[#allocation48_spill] sm:$0xff] %v7266_v11  ;;  %v4547_v48 = vsel %vm7219_vm0, %v7266_v11, 0.0  ;;  %v7271_v45 = vpop.permute.xlu1 %3428  ;;  %v3509_v7 = vsel %vm7261_vm2, %v7266_v11, 0.0  ;;  %vm7303_vm0 = vcmp.lt.s32.totalorder %v2523_v54, 15  ;;  %v2551_v54 = vand.u32 15, %v2401_v16 }
 0x50c   : > { %8374 = vst [vmem:[#allocation49_spill] sm:$0xff] %v7271_v45  ;;  %4577 = vst.msk [vmem:[#allocation2 + $0xb8] sm:$0xff] %vm8357_vm1, %v4547_v48  ;;  %3583 = vrot.lane.b32.xlu0 %v7271_v45, %s5314_s11  ;;  %3581 = vrot.lane.b32.xlu1 %v3509_v7, %s5314_s11  ;;  %v8382_v7 = vmov 0  ;;  %v2405_v16 = vadd.s32 184, %v6801_v40 }
 0x50d   : > { %4578 = vst.msk [vmem:[#allocation2 + $0xd0] sm:$0xff] %vm8375_vm3, %v7271_v45  ;;  %vm8381_vm3 = vmmov %vm8357_vm1  ;;  %v8383_v7 = vsel %vm7303_vm0, 4294967295, %v8382_v7 }
 0x50e   : > { %v7287_v53 = vpop.permute.xlu0 %3430  ;;  %8384 = vst [vmem:[#allocation53_spill] sm:$0xff] %v8383_v7 }
 0x50f   : > { %8379 = vst [vmem:[#allocation51_spill] sm:$0xff] %v7287_v53  ;;  %v4549_v48 = vsel %vm7240_vm7, %v7287_v53, 0.0  ;;  %v7292_v11 = vpop.permute.xlu1 %3432  ;;  %v3511_v45 = vsel %vm7282_vm4, %v7287_v53, 0.0  ;;  %vm7324_vm7 = vcmp.lt.s32.totalorder %v2537_v49, 15  ;;  %v2565_v49 = vand.u32 15, %v2403_v26 }
 0x510   : > { %8380 = vst [vmem:[#allocation52_spill] sm:$0xff] %v7292_v11  ;;  %4579 = vst.msk [vmem:[#allocation2 + $0xe8] sm:$0xff] %vm8357_vm1, %v4549_v48  ;;  %3587 = vrot.lane.b32.xlu0 %v7292_v11, %s5314_s11  ;;  %3585 = vrot.lane.b32.xlu1 %v3511_v45, %s5314_s11  ;;  %v8388_v45 = vmov 0  ;;  %v2407_v26 = vadd.s32 200, %v6801_v40 }
 0x511   : > { %4580 = vst.msk [vmem:[#allocation2 + $0x100] sm:$0xff] %vm8381_vm3, %v7292_v11  ;;  %vm8387_vm3 = vmmov %vm8357_vm1  ;;  %v8389_v45 = vsel %vm7324_vm7, 4294967295, %v8388_v45 }
 0x512   : > { %v7308_v8 = vpop.permute.xlu0 %3434  ;;  %8390 = vst [vmem:[#allocation56_spill] sm:$0xff] %v8389_v45 }
 0x513   : > { %8385 = vst [vmem:[#allocation54_spill] sm:$0xff] %v7308_v8  ;;  %v4551_v48 = vsel %vm7261_vm2, %v7308_v8, 0.0  ;;  %v7313_v53 = vpop.permute.xlu1 %3436  ;;  %v3513_v11 = vsel %vm7303_vm0, %v7308_v8, 0.0  ;;  %vm7345_vm2 = vcmp.lt.s32.totalorder %v2551_v54, 15  ;;  %v2579_v54 = vand.u32 15, %v2405_v16 }
 0x514   : > { %8386 = vst [vmem:[#allocation55_spill] sm:$0xff] %v7313_v53  ;;  %4581 = vst.msk [vmem:[#allocation2 + $0x118] sm:$0xff] %vm8357_vm1, %v4551_v48  ;;  %3591 = vrot.lane.b32.xlu0 %v7313_v53, %s5314_s11  ;;  %3589 = vrot.lane.b32.xlu1 %v3513_v11, %s5314_s11  ;;  %v8394_v11 = vmov 0  ;;  %v2409_v16 = vadd.s32 216, %v6801_v40 }
 0x515   : > { %4582 = vst.msk [vmem:[#allocation2 + $0x130] sm:$0xff] %vm8387_vm3, %v7313_v53  ;;  %vm8393_vm3 = vmmov %vm8357_vm1  ;;  %v8395_v11 = vsel %vm7345_vm2, 4294967295, %v8394_v11 }
 0x516   : > { %v7329_v46 = vpop.permute.xlu0 %3438  ;;  %8396 = vst [vmem:[#allocation59_spill] sm:$0xff] %v8395_v11 }
 0x517   : > { %8391 = vst [vmem:[#allocation57_spill] sm:$0xff] %v7329_v46  ;;  %v4553_v48 = vsel %vm7282_vm4, %v7329_v46, 0.0  ;;  %v7334_v8 = vpop.permute.xlu1 %3440  ;;  %v3515_v53 = vsel %vm7324_vm7, %v7329_v46, 0.0  ;;  %vm7366_vm4 = vcmp.lt.s32.totalorder %v2565_v49, 15  ;;  %v2593_v49 = vand.u32 15, %v2407_v26 }
 0x518   : > { %8392 = vst [vmem:[#allocation58_spill] sm:$0xff] %v7334_v8  ;;  %4583 = vst.msk [vmem:[#allocation2 + $0x148] sm:$0xff] %vm8357_vm1, %v4553_v48  ;;  %3595 = vrot.lane.b32.xlu0 %v7334_v8, %s5314_s11  ;;  %3593 = vrot.lane.b32.xlu1 %v3515_v53, %s5314_s11  ;;  %v8400_v53 = vmov 0  ;;  %v2411_v26 = vadd.s32 232, %v6801_v40 }
 0x519   : > { %4584 = vst.msk [vmem:[#allocation2 + $0x160] sm:$0xff] %vm8393_vm3, %v7334_v8  ;;  %vm8399_vm3 = vmmov %vm8357_vm1  ;;  %v8401_v53 = vsel %vm7366_vm4, 4294967295, %v8400_v53 }
 0x51a   : > { %v7350_v56 = vpop.permute.xlu0 %3442  ;;  %8402 = vst [vmem:[#allocation62_spill] sm:$0xff] %v8401_v53 }
 0x51b   : > { %8397 = vst [vmem:[#allocation60_spill] sm:$0xff] %v7350_v56  ;;  %v4555_v48 = vsel %vm7303_vm0, %v7350_v56, 0.0  ;;  %v7355_v46 = vpop.permute.xlu1 %3444  ;;  %v3517_v8 = vsel %vm7345_vm2, %v7350_v56, 0.0  ;;  %vm7387_vm0 = vcmp.lt.s32.totalorder %v2579_v54, 15  ;;  %v2607_v54 = vand.u32 15, %v2409_v16 }
 0x51c   : > { %8398 = vst [vmem:[#allocation61_spill] sm:$0xff] %v7355_v46  ;;  %4585 = vst.msk [vmem:[#allocation2 + $0x178] sm:$0xff] %vm8357_vm1, %v4555_v48  ;;  %3599 = vrot.lane.b32.xlu0 %v7355_v46, %s5314_s11  ;;  %3597 = vrot.lane.b32.xlu1 %v3517_v8, %s5314_s11  ;;  %v8406_v8 = vmov 0  ;;  %v2413_v16 = vadd.s32 248, %v6801_v40 }
 0x51d   : > { %4586 = vst.msk [vmem:[#allocation2 + $0x190] sm:$0xff] %vm8399_vm3, %v7355_v46  ;;  %vm8405_vm3 = vmmov %vm8357_vm1  ;;  %v8407_v8 = vsel %vm7387_vm0, 4294967295, %v8406_v8 }
 0x51e   : > { %v7371_v7 = vpop.permute.xlu0 %3446  ;;  %8408 = vst [vmem:[#allocation65_spill] sm:$0xff] %v8407_v8 }
 0x51f   : > { %8403 = vst [vmem:[#allocation63_spill] sm:$0xff] %v7371_v7  ;;  %v4557_v48 = vsel %vm7324_vm7, %v7371_v7, 0.0  ;;  %v7376_v56 = vpop.permute.xlu1 %3448  ;;  %v3519_v46 = vsel %vm7366_vm4, %v7371_v7, 0.0  ;;  %vm7408_vm7 = vcmp.lt.s32.totalorder %v2593_v49, 15  ;;  %v2621_v49 = vand.u32 15, %v2411_v26 }
 0x520   : > { %8404 = vst [vmem:[#allocation64_spill] sm:$0xff] %v7376_v56  ;;  %4587 = vst.msk [vmem:[#allocation2 + $0x1a8] sm:$0xff] %vm8357_vm1, %v4557_v48  ;;  %3603 = vrot.lane.b32.xlu0 %v7376_v56, %s5314_s11  ;;  %3601 = vrot.lane.b32.xlu1 %v3519_v46, %s5314_s11  ;;  %v8412_v46 = vmov 0  ;;  %v3694_v26 = vrot.slane %v6532_v31, 7 }
 0x521   : > { %4588 = vst.msk [vmem:[#allocation2 + $0x1c0] sm:$0xff] %vm8405_vm3, %v7376_v56  ;;  %vm8411_vm3 = vmmov %vm8357_vm1  ;;  %v8413_v46 = vsel %vm7408_vm7, 4294967295, %v8412_v46 }
 0x522   : > { %v7392_v45 = vpop.permute.xlu0 %3450 }
 0x523   : > { %8409 = vst [vmem:[#allocation66_spill] sm:$0xff] %v7392_v45  ;;  %v4559_v48 = vsel %vm7345_vm2, %v7392_v45, 0.0  ;;  %v7397_v7 = vpop.permute.xlu1 %3452  ;;  %v3521_v56 = vsel %vm7387_vm0, %v7392_v45, 0.0  ;;  %vm7429_vm2 = vcmp.lt.s32.totalorder %v2607_v54, 15  ;;  %v2635_v54 = vand.u32 15, %v2413_v16 }
 0x524   : > { %8410 = vst [vmem:[#allocation67_spill] sm:$0xff] %v7397_v7  ;;  %4589 = vst.msk [vmem:[#allocation2 + $0x1d8] sm:$0xff] %vm8357_vm1, %v4559_v48  ;;  %3607 = vrot.lane.b32.xlu0 %v7397_v7, %s5314_s11  ;;  %3605 = vrot.lane.b32.xlu1 %v3521_v56, %s5314_s11 }
 0x525   : > { %4590 = vst.msk [vmem:[#allocation2 + $0x1f0] sm:$0xff] %vm8411_vm3, %v7397_v7  ;;  %vm8416_vm3 = vmmov %vm8357_vm1 }
 0x526   : > { %v7413_v11 = vpop.permute.xlu0 %3454 }
 0x527   : > { %8414 = vst [vmem:[#allocation68_spill] sm:$0xff] %v7413_v11  ;;  %v4561_v48 = vsel %vm7366_vm4, %v7413_v11, 0.0  ;;  %v7418_v45 = vpop.permute.xlu1 %3456  ;;  %v3523_v7 = vsel %vm7408_vm7, %v7413_v11, 0.0  ;;  %vm7450_vm4 = vcmp.lt.s32.totalorder %v2621_v49, 15  ;;  %v8430_v49 = vrot.slane %v6523_v41, 7 }
 0x528   : > { %8415 = vst [vmem:[#allocation69_spill] sm:$0xff] %v7418_v45  ;;  %4591 = vst.msk [vmem:[#allocation2 + $0x208] sm:$0xff] %vm8357_vm1, %v4561_v48  ;;  %3611 = vrot.lane.b32.xlu0 %v7418_v45, %s5314_s11  ;;  %3609 = vrot.lane.b32.xlu1 %v3523_v7, %s5314_s11  ;;  %v8422_v7 = vmov 0 }
 0x529   : > { %4592 = vst.msk [vmem:[#allocation2 + $0x220] sm:$0xff] %vm8416_vm3, %v7418_v45  ;;  %vm8421_vm3 = vmmov %vm8357_vm1  ;;  %v8423_v7 = vsel %vm7450_vm4, 4294967295, %v8422_v7 }
 0x52a   : > { %v7434_v53 = vpop.permute.xlu0 %3458  ;;  %8424 = vst [vmem:[#allocation72_spill] sm:$0xff] %v8423_v7  ;;  %v8255_v7 = vrot.slane %v6529_v1, 7 }
 0x52b   : > { %8419 = vst [vmem:[#allocation70_spill] sm:$0xff] %v7434_v53  ;;  %v4563_v48 = vsel %vm7387_vm0, %v7434_v53, 0.0  ;;  %v7439_v11 = vpop.permute.xlu1 %3460  ;;  %v3525_v45 = vsel %vm7429_vm2, %v7434_v53, 0.0  ;;  %vm7471_vm0 = vcmp.lt.s32.totalorder %v2635_v54, 15 }
 0x52c   : > { %8420 = vst [vmem:[#allocation71_spill] sm:$0xff] %v7439_v11  ;;  %4593 = vst.msk [vmem:[#allocation2 + $0x238] sm:$0xff] %vm8357_vm1, %v4563_v48  ;;  %3615 = vrot.lane.b32.xlu0 %v7439_v11, %s5314_s11  ;;  %3613 = vrot.lane.b32.xlu1 %v3525_v45, %s5314_s11 }
 0x52d   : > { %4594 = vst.msk [vmem:[#allocation2 + $0x250] sm:$0xff] %vm8421_vm3, %v7439_v11  ;;  %vm8427_vm3 = vmmov %vm8357_vm1 }
 0x52e   : > { %v7455_v8 = vpop.permute.xlu0 %3462 }
 0x52f   : > { %8425 = vst [vmem:[#allocation73_spill] sm:$0xff] %v7455_v8  ;;  %v4565_v48 = vsel %vm7408_vm7, %v7455_v8, 0.0  ;;  %v7460_v53 = vpop.permute.xlu1 %3464  ;;  %v3527_v11 = vsel %vm7450_vm4, %v7455_v8, 0.0  ;;  %vm8431_vm7 = vcmask 1040384  }
 0x530   : > { %8426 = vst [vmem:[#allocation74_spill] sm:$0xff] %v7460_v53  ;;  %4595 = vst.msk [vmem:[#allocation2 + $0x268] sm:$0xff] %vm8357_vm1, %v4565_v48  ;;  %3619 = vrot.lane.b32.xlu0 %v7460_v53, %s5314_s11  ;;  %3617 = vrot.lane.b32.xlu1 %v3527_v11, %s5314_s11  ;;  %v3695_v16 = vsel %vm8431_vm7, %v8430_v49, %v3694_v26  ;;  %v2418_v48 = vand.u32 15, %v6801_v40  ;;  %v3697_v54 = vsel %vm8431_vm7, %v3694_v26, %v8255_v7  ;;  %v8444_v7 = vld [vmem:[#allocation9_spill] sm:$0xff] }
 0x531   : > { %4596 = vst.msk [vmem:[#allocation2 + $0x280] sm:$0xff] %vm8427_vm3, %v7460_v53  ;;  %v3708_v26 = vsel %vm6818_vm5, %v6864_v24, 0.0  ;;  %vm8435_vm7 = vnez %v8334_v18  ;;  %v4237_v40 = vsel %vm6818_vm5, %v6885_v15, 0.0 }
 0x532   : > { %v7479_v8 = vpop.permute.xlu0 %3466  ;;  %vm7494_vm3 = vcmp.ge.s32.totalorder %v2418_v48, 1  ;;  %v3716_v48 = vsel %vm6919_vm11, %v6948_v63, 0.0 }
 0x533   : > { %v4567_v53 = vsel %vm7429_vm2, %v7479_v8, 0.0  ;;  %v3529_v11 = vsel %vm7471_vm0, %v7479_v8, 0.0  ;;  %v3704_v49 = vsel %vm7494_vm3, %v6822_v51, 0.0  ;;  %v3710_v51 = vsel %vm6856_vm8, %v6885_v15, 0.0 }
 0x534   : > { %4597 = vst.msk [vmem:[#allocation2 + $0x298] sm:$0xff] %vm8357_vm1, %v4567_v53  ;;  %3698 = vrot.lane.b32.xlu0 %v3695_v16, %s5314_s11  ;;  %3621 = vrot.lane.b32.xlu1 %v3529_v11, %s5314_s11  ;;  %v3706_v53 = vsel %vm6824_vm6, %v6833_v6, 0.0  ;;  %v3714_v16 = vsel %vm6898_vm10, %v6927_v10, 0.0  ;;  %v3718_v11 = vsel %vm6940_vm12, %v6969_v38, 0.0  ;;  %vm8434_vm1 = vnez %v8332_v17 }
 0x535   : > { %v4233_v45 = vsel %vm7494_vm3, %v6833_v6, 0.0 }
 0x538   : > { %3768 = vrot.lane.b32.xlu0 %v3704_v49, %s5315_s12  ;;  %3700 = vrot.lane.b32.xlu1 %v3697_v54, %s5314_s11  ;;  %v3720_v54 = vsel %vm6961_vm13, %v6990_v44, 0.0  ;;  %v3722_v49 = vsel %vm6982_vm14, %v7011_v32, 0.0  ;;  %vm3654_vm14 = vcmask 785927   ;;  %vm8517_vm13 = vcmask 261120  }
 0x53c   : > { %3772 = vrot.lane.b32.xlu0 %v3706_v53, %s5315_s12  ;;  %3770 = vrot.lane.b32.xlu1 %v6845_v14, %s5315_s12  ;;  %v3712_v14 = vsel %vm6877_vm9, %v6906_v33, 0.0  ;;  %v3724_v53 = vsel %vm7003_vm15, %v7032_v4, 0.0  ;;  %vm8258_vm15 = vcmask 785920  }
 0x540   : > { %3776 = vrot.lane.b32.xlu0 %v3708_v26, %s5315_s12  ;;  %3774 = vrot.lane.b32.xlu1 %v6851_v52, %s5315_s12  ;;  %v3726_v26 = vsel %vm8434_vm1, %v7053_v35, 0.0  ;;  %vm8436_vm1 = vnez %v8336_v0 }
 0x544   : > { %3780 = vrot.lane.b32.xlu0 %v3710_v51, %s5315_s12  ;;  %3778 = vrot.lane.b32.xlu1 %v6868_v37, %s5315_s12  ;;  %v3728_v51 = vsel %vm8435_vm7, %v7074_v3, 0.0  ;;  %vm8437_vm7 = vnez %v8338_v58 }
 0x548   : > { %3784 = vrot.lane.b32.xlu0 %v3712_v14, %s5315_s12  ;;  %3782 = vrot.lane.b32.xlu1 %v6889_v34, %s5315_s12 }
 0x54c   : > { %3788 = vrot.lane.b32.xlu0 %v3714_v16, %s5315_s12  ;;  %3786 = vrot.lane.b32.xlu1 %v6910_v19, %s5315_s12 }
 0x550   : > { %3792 = vrot.lane.b32.xlu0 %v3716_v48, %s5315_s12  ;;  %3790 = vrot.lane.b32.xlu1 %v6931_v43, %s5315_s12  ;;  %v3730_v48 = vsel %vm8436_vm1, %v7094_v50, 0.0  ;;  %vm8260_vm1 = vcmask 1048320  }
 0x554   : > { %3796 = vrot.lane.b32.xlu0 %v3718_v11, %s5315_s12  ;;  %3794 = vrot.lane.b32.xlu1 %v6952_v29, %s5315_s12 }
 0x558   : > { %3800 = vrot.lane.b32.xlu0 %v3720_v54, %s5315_s12  ;;  %3798 = vrot.lane.b32.xlu1 %v6973_v36, %s5315_s12 }
 0x55c   : > { %3804 = vrot.lane.b32.xlu0 %v3722_v49, %s5315_s12  ;;  %3802 = vrot.lane.b32.xlu1 %v6994_v28, %s5315_s12  ;;  %v3732_v49 = vsel %vm8437_vm7, %v7114_v5, 0.0  ;;  %vm3864_vm7 = vcmask 1048321  }
 0x560   : > { %3808 = vrot.lane.b32.xlu0 %v3724_v53, %s5315_s12  ;;  %3806 = vrot.lane.b32.xlu1 %v7015_v57, %s5315_s12 }
 0x564   : > { %3812 = vrot.lane.b32.xlu0 %v3726_v26, %s5315_s12  ;;  %3810 = vrot.lane.b32.xlu1 %v7036_v23, %s5315_s12 }
 0x568   : > { %3816 = vrot.lane.b32.xlu0 %v3728_v51, %s5315_s12  ;;  %3814 = vrot.lane.b32.xlu1 %v7057_v30, %s5315_s12 }
 0x56a   : > { %v3564_v14 = vpop.permute.xlu0 %3563  ;;  %v3562_v16 = vpop.permute.xlu1 %3561 }
 0x56b   : > { %3657 = vst.msk [vmem:[#allocation2 + $0x30] sm:$0xff] %vm8258_vm15, %v3564_v14 }
 0x56c   : > { %3655 = vst.msk [vmem:[#allocation2 + $0x18] sm:$0x80] %vm3654_vm14, %v3562_v16  ;;  %3820 = vrot.lane.b32.xlu0 %v3730_v48, %s5315_s12  ;;  %3818 = vrot.lane.b32.xlu1 %v7078_v25, %s5315_s12  ;;  %vm8438_vm14 = vnez %v8340_v20  ;;  %v8448_v20 = vld [vmem:[#allocation14_spill] sm:$0xff] }
 0x56e   : > { %v3568_v11 = vpop.permute.xlu0 %3567  ;;  %v3566_v54 = vpop.permute.xlu1 %3565 }
 0x56f   : > { %3659 = vst.msk [vmem:[#allocation2 + $0x60] sm:$0xff] %vm8258_vm15, %v3568_v11  ;;  %3658 = vst.msk [vmem:[#allocation2 + $0x48] sm:$0xff] %vm8258_vm15, %v3566_v54 }
 0x570   : > { %3824 = vrot.lane.b32.xlu0 %v3732_v49, %s5315_s12  ;;  %3822 = vrot.lane.b32.xlu1 %v7098_v12, %s5315_s12 }
 0x572   : > { %v3572_v53 = vpop.permute.xlu0 %3571  ;;  %v3570_v26 = vpop.permute.xlu1 %3569 }
 0x573   : > { %3661 = vst.msk [vmem:[#allocation2 + $0x90] sm:$0xff] %vm8258_vm15, %v3572_v53  ;;  %3660 = vst.msk [vmem:[#allocation2 + $0x78] sm:$0xff] %vm8258_vm15, %v3570_v26 }
 0x574   : > { %3826 = vrot.lane.b32.xlu1 %v7118_v62, %s5315_s12 }
 0x576   : > { %v3576_v51 = vpop.permute.xlu0 %3575  ;;  %v3574_v14 = vpop.permute.xlu1 %3573 }
 0x577   : > { %3663 = vst.msk [vmem:[#allocation2 + $0xc0] sm:$0xff] %vm8258_vm15, %v3576_v51  ;;  %3662 = vst.msk [vmem:[#allocation2 + $0xa8] sm:$0xff] %vm8258_vm15, %v3574_v14 }
 0x57a   : > { %v3580_v16 = vpop.permute.xlu0 %3579  ;;  %v3578_v48 = vpop.permute.xlu1 %3577 }
 0x57b   : > { %3665 = vst.msk [vmem:[#allocation2 + $0xf0] sm:$0xff] %vm8258_vm15, %v3580_v16  ;;  %3664 = vst.msk [vmem:[#allocation2 + $0xd8] sm:$0xff] %vm8258_vm15, %v3578_v48 }
 0x57e   : > { %v3584_v11 = vpop.permute.xlu0 %3583  ;;  %v3582_v54 = vpop.permute.xlu1 %3581 }
 0x57f   : > { %3667 = vst.msk [vmem:[#allocation2 + $0x120] sm:$0xff] %vm8258_vm15, %v3584_v11  ;;  %3666 = vst.msk [vmem:[#allocation2 + $0x108] sm:$0xff] %vm8258_vm15, %v3582_v54 }
 0x582   : > { %v3588_v49 = vpop.permute.xlu0 %3587  ;;  %v3586_v53 = vpop.permute.xlu1 %3585 }
 0x583   : > { %3669 = vst.msk [vmem:[#allocation2 + $0x150] sm:$0xff] %vm8258_vm15, %v3588_v49  ;;  %3668 = vst.msk [vmem:[#allocation2 + $0x138] sm:$0xff] %vm8258_vm15, %v3586_v53 }
 0x586   : > { %v3592_v26 = vpop.permute.xlu0 %3591  ;;  %v3590_v51 = vpop.permute.xlu1 %3589 }
 0x587   : > { %3671 = vst.msk [vmem:[#allocation2 + $0x180] sm:$0xff] %vm8258_vm15, %v3592_v26  ;;  %3670 = vst.msk [vmem:[#allocation2 + $0x168] sm:$0xff] %vm8258_vm15, %v3590_v51 }
 0x58a   : > { %v3596_v14 = vpop.permute.xlu0 %3595  ;;  %v3594_v16 = vpop.permute.xlu1 %3593 }
 0x58b   : > { %3673 = vst.msk [vmem:[#allocation2 + $0x1b0] sm:$0xff] %vm8258_vm15, %v3596_v14  ;;  %3672 = vst.msk [vmem:[#allocation2 + $0x198] sm:$0xff] %vm8258_vm15, %v3594_v16 }
 0x58e   : > { %v3600_v48 = vpop.permute.xlu0 %3599  ;;  %v3598_v11 = vpop.permute.xlu1 %3597 }
 0x58f   : > { %3675 = vst.msk [vmem:[#allocation2 + $0x1e0] sm:$0xff] %vm8258_vm15, %v3600_v48  ;;  %3674 = vst.msk [vmem:[#allocation2 + $0x1c8] sm:$0xff] %vm8258_vm15, %v3598_v11 }
 0x592   : > { %v3604_v54 = vpop.permute.xlu0 %3603  ;;  %v3602_v49 = vpop.permute.xlu1 %3601 }
 0x593   : > { %3677 = vst.msk [vmem:[#allocation2 + $0x210] sm:$0xff] %vm8258_vm15, %v3604_v54  ;;  %3676 = vst.msk [vmem:[#allocation2 + $0x1f8] sm:$0xff] %vm8258_vm15, %v3602_v49 }
 0x596   : > { %v3608_v53 = vpop.permute.xlu0 %3607  ;;  %v3606_v26 = vpop.permute.xlu1 %3605 }
 0x597   : > { %3679 = vst.msk [vmem:[#allocation2 + $0x240] sm:$0xff] %vm8258_vm15, %v3608_v53  ;;  %3678 = vst.msk [vmem:[#allocation2 + $0x228] sm:$0xff] %vm8258_vm15, %v3606_v26 }
 0x59a   : > { %v3612_v51 = vpop.permute.xlu0 %3611  ;;  %v3610_v14 = vpop.permute.xlu1 %3609 }
 0x59b   : > { %3681 = vst.msk [vmem:[#allocation2 + $0x270] sm:$0xff] %vm8258_vm15, %v3612_v51  ;;  %3680 = vst.msk [vmem:[#allocation2 + $0x258] sm:$0xff] %vm8258_vm15, %v3610_v14 }
 0x59e   : > { %v3616_v16 = vpop.permute.xlu0 %3615  ;;  %v3614_v48 = vpop.permute.xlu1 %3613 }
 0x59f   : > { %3683 = vst.msk [vmem:[#allocation2 + $0x2a0] sm:$0xff] %vm8258_vm15, %v3616_v16  ;;  %3682 = vst.msk [vmem:[#allocation2 + $0x288] sm:$0xff] %vm8258_vm15, %v3614_v48 }
 0x5a2   : > { %v3620_v11 = vpop.permute.xlu0 %3619  ;;  %v3618_v54 = vpop.permute.xlu1 %3617 }
 0x5a3   : > { %3685 = vst.msk [vmem:[#allocation2 + $0x2d0] sm:$0xff] %vm8258_vm15, %v3620_v11  ;;  %3684 = vst.msk [vmem:[#allocation2 + $0x2b8] sm:$0xff] %vm8258_vm15, %v3618_v54 }
 0x5a6   : > { %v7618_v49 = vpop.permute.xlu0 %3698  ;;  %v3622_v53 = vpop.permute.xlu1 %3621 }
 0x5a7   : > { %3686 = vst.msk [vmem:[#allocation2 + $0x2e8] sm:$0xff] %vm8258_vm15, %v3622_v53  ;;  %v3734_v26 = vsel %vm8438_vm14, %v7618_v49, 0.0  ;;  %v8440_v53 = vld [vmem:[#allocation6_spill] sm:$0xff] }
 0x5a8   : > { %3828 = vrot.lane.b32.xlu0 %v3734_v26, %s5315_s12 }
 0x5aa   : > { %v3769_v51 = vpop.permute.xlu0 %3768  ;;  %v7625_v14 = vpop.permute.xlu1 %3700 }
 0x5ab   : > { %3865 = vst.msk [vmem:[#allocation2] sm:$0xfe] %vm3864_vm7, %v3769_v51  ;;  %3830 = vrot.lane.b32.xlu1 %v7625_v14, %s5315_s12  ;;  %vm8466_vm7 = vcmask 1046528  }
 0x5ac   : > { %3898 = vrot.lane.b32.xlu0 %v6418_v27, %s5314_s11  ;;  %v8439_v27 = vld [vmem:[#allocation4_spill] sm:$0xff] }
 0x5ae   : > { %v3773_v16 = vpop.permute.xlu0 %3772  ;;  %v3771_v48 = vpop.permute.xlu1 %3770 }
 0x5af   : > { %3868 = vst.msk [vmem:[#allocation2 + $0x30] sm:$0xff] %vm8260_vm1, %v3773_v16  ;;  %3867 = vst.msk [vmem:[#allocation2 + $0x18] sm:$0xff] %vm8260_vm1, %v3771_v48  ;;  %3900 = vrot.lane.b32.xlu1 %v6415_v61, %s5314_s11  ;;  %v8441_v61 = vld [vmem:[#allocation5_spill] sm:$0xff]  ;;  %v8442_v16 = vld [vmem:[#allocation8_spill] sm:$0xff] }
 0x5b0   : > { %3902 = vrot.lane.b32.xlu0 %v6426_v22, %s5314_s11 }
 0x5b2   : > { %v3777_v11 = vpop.permute.xlu0 %3776  ;;  %v3775_v54 = vpop.permute.xlu1 %3774 }
 0x5b3   : > { %3870 = vst.msk [vmem:[#allocation2 + $0x60] sm:$0xff] %vm8260_vm1, %v3777_v11  ;;  %3869 = vst.msk [vmem:[#allocation2 + $0x48] sm:$0xff] %vm8260_vm1, %v3775_v54  ;;  %3904 = vrot.lane.b32.xlu1 %v8439_v27, %s5314_s11  ;;  %v8443_v54 = vld [vmem:[#allocation7_spill] sm:$0xff]  ;;  %v8446_v27 = vld [vmem:[#allocation10_spill] sm:$0xff] }
 0x5b4   : > { %3906 = vrot.lane.b32.xlu0 %v8440_v53, %s5314_s11 }
 0x5b6   : > { %v3781_v26 = vpop.permute.xlu0 %3780  ;;  %v3779_v51 = vpop.permute.xlu1 %3778 }
 0x5b7   : > { %3872 = vst.msk [vmem:[#allocation2 + $0x90] sm:$0xff] %vm8260_vm1, %v3781_v26  ;;  %3871 = vst.msk [vmem:[#allocation2 + $0x78] sm:$0xff] %vm8260_vm1, %v3779_v51  ;;  %3908 = vrot.lane.b32.xlu1 %v8441_v61, %s5314_s11  ;;  %v8445_v61 = vld [vmem:[#allocation12_spill] sm:$0xff] }
 0x5b8   : > { %3910 = vrot.lane.b32.xlu0 %v8442_v16, %s5314_s11 }
 0x5ba   : > { %v3785_v48 = vpop.permute.xlu0 %3784  ;;  %v3783_v11 = vpop.permute.xlu1 %3782 }
 0x5bb   : > { %3874 = vst.msk [vmem:[#allocation2 + $0xc0] sm:$0xff] %vm8260_vm1, %v3785_v48  ;;  %3873 = vst.msk [vmem:[#allocation2 + $0xa8] sm:$0xff] %vm8260_vm1, %v3783_v11  ;;  %3912 = vrot.lane.b32.xlu1 %v8443_v54, %s5314_s11  ;;  %v8447_v54 = vld [vmem:[#allocation13_spill] sm:$0xff] }
 0x5bc   : > { %3914 = vrot.lane.b32.xlu0 %v8444_v7, %s5314_s11 }
 0x5be   : > { %v3789_v26 = vpop.permute.xlu0 %3788  ;;  %v3787_v51 = vpop.permute.xlu1 %3786 }
 0x5bf   : > { %3876 = vst.msk [vmem:[#allocation2 + $0xf0] sm:$0xff] %vm8260_vm1, %v3789_v26  ;;  %3875 = vst.msk [vmem:[#allocation2 + $0xd8] sm:$0xff] %vm8260_vm1, %v3787_v51  ;;  %3916 = vrot.lane.b32.xlu1 %v8445_v61, %s5314_s11  ;;  %v8449_v61 = vld [vmem:[#allocation11_spill] sm:$0xff] }
 0x5c0   : > { %3918 = vrot.lane.b32.xlu0 %v8446_v27, %s5314_s11  ;;  %v8450_v27 = vld [vmem:[#allocation16_spill] sm:$0xff] }
 0x5c2   : > { %v3793_v48 = vpop.permute.xlu0 %3792  ;;  %v3791_v11 = vpop.permute.xlu1 %3790 }
 0x5c3   : > { %3878 = vst.msk [vmem:[#allocation2 + $0x120] sm:$0xff] %vm8260_vm1, %v3793_v48  ;;  %3877 = vst.msk [vmem:[#allocation2 + $0x108] sm:$0xff] %vm8260_vm1, %v3791_v11  ;;  %3920 = vrot.lane.b32.xlu1 %v8447_v54, %s5314_s11  ;;  %v8451_v54 = vld [vmem:[#allocation15_spill] sm:$0xff] }
 0x5c4   : > { %3922 = vrot.lane.b32.xlu0 %v8448_v20, %s5314_s11  ;;  %v8452_v20 = vld [vmem:[#allocation18_spill] sm:$0xff] }
 0x5c6   : > { %v3797_v26 = vpop.permute.xlu0 %3796  ;;  %v3795_v51 = vpop.permute.xlu1 %3794 }
 0x5c7   : > { %3880 = vst.msk [vmem:[#allocation2 + $0x150] sm:$0xff] %vm8260_vm1, %v3797_v26  ;;  %3879 = vst.msk [vmem:[#allocation2 + $0x138] sm:$0xff] %vm8260_vm1, %v3795_v51  ;;  %3924 = vrot.lane.b32.xlu1 %v8449_v61, %s5314_s11  ;;  %v8453_v61 = vld [vmem:[#allocation17_spill] sm:$0xff] }
 0x5c8   : > { %3926 = vrot.lane.b32.xlu0 %v8450_v27, %s5314_s11  ;;  %v8454_v27 = vld [vmem:[#allocation20_spill] sm:$0xff] }
 0x5ca   : > { %v3801_v48 = vpop.permute.xlu0 %3800  ;;  %v3799_v11 = vpop.permute.xlu1 %3798 }
 0x5cb   : > { %3882 = vst.msk [vmem:[#allocation2 + $0x180] sm:$0xff] %vm8260_vm1, %v3801_v48  ;;  %3881 = vst.msk [vmem:[#allocation2 + $0x168] sm:$0xff] %vm8260_vm1, %v3799_v11  ;;  %3928 = vrot.lane.b32.xlu1 %v8451_v54, %s5314_s11  ;;  %v8455_v54 = vld [vmem:[#allocation19_spill] sm:$0xff] }
 0x5cc   : > { %3930 = vrot.lane.b32.xlu0 %v8452_v20, %s5314_s11  ;;  %v8456_v20 = vld [vmem:[#allocation22_spill] sm:$0xff] }
 0x5ce   : > { %v3805_v26 = vpop.permute.xlu0 %3804  ;;  %v3803_v51 = vpop.permute.xlu1 %3802 }
 0x5cf   : > { %3884 = vst.msk [vmem:[#allocation2 + $0x1b0] sm:$0xff] %vm8260_vm1, %v3805_v26  ;;  %3883 = vst.msk [vmem:[#allocation2 + $0x198] sm:$0xff] %vm8260_vm1, %v3803_v51  ;;  %3932 = vrot.lane.b32.xlu1 %v8453_v61, %s5314_s11  ;;  %v8457_v61 = vld [vmem:[#allocation21_spill] sm:$0xff] }
 0x5d0   : > { %3934 = vrot.lane.b32.xlu0 %v8454_v27, %s5314_s11  ;;  %v8458_v27 = vld [vmem:[#allocation24_spill] sm:$0xff] }
 0x5d2   : > { %v3809_v48 = vpop.permute.xlu0 %3808  ;;  %v3807_v11 = vpop.permute.xlu1 %3806 }
 0x5d3   : > { %3886 = vst.msk [vmem:[#allocation2 + $0x1e0] sm:$0xff] %vm8260_vm1, %v3809_v48  ;;  %3885 = vst.msk [vmem:[#allocation2 + $0x1c8] sm:$0xff] %vm8260_vm1, %v3807_v11  ;;  %3936 = vrot.lane.b32.xlu1 %v8455_v54, %s5314_s11  ;;  %v8459_v54 = vld [vmem:[#allocation23_spill] sm:$0xff] }
 0x5d4   : > { %3938 = vrot.lane.b32.xlu0 %v8456_v20, %s5314_s11  ;;  %v8460_v20 = vld [vmem:[#allocation26_spill] sm:$0xff] }
 0x5d6   : > { %v3813_v26 = vpop.permute.xlu0 %3812  ;;  %v3811_v51 = vpop.permute.xlu1 %3810 }
 0x5d7   : > { %3888 = vst.msk [vmem:[#allocation2 + $0x210] sm:$0xff] %vm8260_vm1, %v3813_v26  ;;  %3887 = vst.msk [vmem:[#allocation2 + $0x1f8] sm:$0xff] %vm8260_vm1, %v3811_v51  ;;  %3940 = vrot.lane.b32.xlu1 %v8457_v61, %s5314_s11  ;;  %v8461_v61 = vld [vmem:[#allocation25_spill] sm:$0xff] }
 0x5d8   : > { %3942 = vrot.lane.b32.xlu0 %v8458_v27, %s5314_s11  ;;  %v8462_v27 = vld [vmem:[#allocation28_spill] sm:$0xff] }
 0x5da   : > { %v3817_v48 = vpop.permute.xlu0 %3816  ;;  %v3815_v11 = vpop.permute.xlu1 %3814 }
 0x5db   : > { %3890 = vst.msk [vmem:[#allocation2 + $0x240] sm:$0xff] %vm8260_vm1, %v3817_v48  ;;  %3889 = vst.msk [vmem:[#allocation2 + $0x228] sm:$0xff] %vm8260_vm1, %v3815_v11  ;;  %3944 = vrot.lane.b32.xlu1 %v8459_v54, %s5314_s11  ;;  %v8463_v54 = vld [vmem:[#allocation27_spill] sm:$0xff] }
 0x5dc   : > { %3946 = vrot.lane.b32.xlu0 %v8460_v20, %s5314_s11  ;;  %v8464_v20 = vld [vmem:[#allocation30_spill] sm:$0xff] }
 0x5de   : > { %v3821_v26 = vpop.permute.xlu0 %3820  ;;  %v3819_v51 = vpop.permute.xlu1 %3818 }
 0x5df   : > { %3892 = vst.msk [vmem:[#allocation2 + $0x270] sm:$0xff] %vm8260_vm1, %v3821_v26  ;;  %3891 = vst.msk [vmem:[#allocation2 + $0x258] sm:$0xff] %vm8260_vm1, %v3819_v51  ;;  %3948 = vrot.lane.b32.xlu1 %v8461_v61, %s5314_s11  ;;  %v4029_v26 = vrot.slane %v6529_v1, 1 }
 0x5e0   : > { %3950 = vrot.lane.b32.xlu0 %v8462_v27, %s5314_s11 }
 0x5e2   : > { %v3825_v48 = vpop.permute.xlu0 %3824  ;;  %v3823_v11 = vpop.permute.xlu1 %3822 }
 0x5e3   : > { %3894 = vst.msk [vmem:[#allocation2 + $0x2a0] sm:$0xff] %vm8260_vm1, %v3825_v48  ;;  %3893 = vst.msk [vmem:[#allocation2 + $0x288] sm:$0xff] %vm8260_vm1, %v3823_v11  ;;  %3952 = vrot.lane.b32.xlu1 %v8463_v54, %s5314_s11  ;;  %v8465_v48 = vrot.slane %v6532_v31, 1  ;;  %v8468_v54 = vld [vmem:[#allocation36_spill] sm:$0xff] }
 0x5e4   : > { %3954 = vrot.lane.b32.xlu0 %v8464_v20, %s5314_s11  ;;  %v8473_v20 = vld [vmem:[#allocation35_spill] sm:$0xff] }
 0x5e5   : > { %v4030_v11 = vsel %vm8466_vm7, %v8465_v48, %v4029_v26  ;;  %v8472_v48 = vld [vmem:[#allocation39_spill] sm:$0xff]  ;;  %vm8474_vm7 = vnez %v8473_v20  ;;  %v8483_v20 = vld [vmem:[#allocation46_spill] sm:$0xff] }
 0x5e6   : > { %v3827_v51 = vpop.permute.xlu1 %3826  ;;  %v4040_v27 = vsel %vm8474_vm7, %v8472_v48, 0.0  ;;  %v8485_v48 = vld [vmem:[#allocation44_spill] sm:$0xff] }
 0x5e7   : > { %3895 = vst.msk [vmem:[#allocation2 + $0x2b8] sm:$0xff] %vm8260_vm1, %v3827_v51  ;;  %3956 = vrot.lane.b32.xlu1 %v6523_v41, %s5314_s11  ;;  %v8467_v51 = vld [vmem:[#allocation34_spill] sm:$0xff]  ;;  %v8469_v41 = vld [vmem:[#allocation33_spill] sm:$0xff]  ;;  %vm8486_vm7 = vnez %v8485_v48 }
 0x5e8   : > { %3958 = vrot.lane.b32.xlu0 %v6532_v31, %s5314_s11  ;;  %vm8470_vm15 = vnez %v8469_v41  ;;  %v8471_v31 = vld [vmem:[#allocation37_spill] sm:$0xff]  ;;  %v8479_v41 = vld [vmem:[#allocation43_spill] sm:$0xff] }
 0x5e9   : > { %v4038_v61 = vsel %vm8470_vm15, %v8468_v54, 0.0  ;;  %v8496_v48 = vld [vmem:[#allocation57_spill] sm:$0xff] }
 0x5eb   : > { %3960 = vrot.lane.b32.xlu1 %v6529_v1, %s5314_s11 }
 0x5ec   : > { %4031 = vrot.lane.b32.xlu0 %v4030_v11, %s5314_s11  ;;  %v8476_v11 = vld [vmem:[#allocation42_spill] sm:$0xff] }
 0x5ef   : > { %4033 = vrot.lane.b32.xlu1 %v4029_v26, %s5314_s11  ;;  %v8475_v26 = vld [vmem:[#allocation40_spill] sm:$0xff] }
 0x5f0   : > { %4101 = vrot.lane.b32.xlu0 %v8467_v51, %s5316_s24  ;;  %v8477_v51 = vld [vmem:[#allocation38_spill] sm:$0xff] }
 0x5f1   : > { %vm8478_vm1 = vnez %v8477_v51  ;;  %v8489_v51 = vld [vmem:[#allocation47_spill] sm:$0xff] }
 0x5f2   : > { %v4042_v7 = vsel %vm8478_vm1, %v8476_v11, 0.0  ;;  %v8488_v11 = vld [vmem:[#allocation51_spill] sm:$0xff]  ;;  %vm8490_vm1 = vnez %v8489_v51  ;;  %v8500_v51 = vld [vmem:[#allocation60_spill] sm:$0xff] }
 0x5f3   : > { %4103 = vrot.lane.b32.xlu1 %v4038_v61, %s5316_s24  ;;  %v8480_v61 = vld [vmem:[#allocation45_spill] sm:$0xff] }
 0x5f4   : > { %4105 = vrot.lane.b32.xlu0 %v8471_v31, %s5316_s24  ;;  %v8481_v31 = vld [vmem:[#allocation41_spill] sm:$0xff] }
 0x5f5   : > { %vm8482_vm15 = vnez %v8481_v31  ;;  %v8492_v31 = vld [vmem:[#allocation54_spill] sm:$0xff] }
 0x5f6   : > { %v4044_v54 = vsel %vm8482_vm15, %v8480_v61, 0.0  ;;  %v8491_v61 = vld [vmem:[#allocation52_spill] sm:$0xff] }
 0x5f7   : > { %4107 = vrot.lane.b32.xlu1 %v4040_v27, %s5316_s24  ;;  %v8484_v27 = vld [vmem:[#allocation48_spill] sm:$0xff] }
 0x5f8   : > { %4109 = vrot.lane.b32.xlu0 %v8475_v26, %s5316_s24  ;;  %v4046_v26 = vsel %vm8486_vm7, %v8484_v27, 0.0  ;;  %v8495_v27 = vld [vmem:[#allocation55_spill] sm:$0xff] }
 0x5fb   : > { %4111 = vrot.lane.b32.xlu1 %v4042_v7, %s5316_s24  ;;  %v8487_v7 = vld [vmem:[#allocation49_spill] sm:$0xff] }
 0x5fc   : > { %4113 = vrot.lane.b32.xlu0 %v8479_v41, %s5316_s24  ;;  %v4048_v41 = vsel %vm8490_vm1, %v8488_v11, 0.0  ;;  %v8499_v11 = vld [vmem:[#allocation58_spill] sm:$0xff] }
 0x5ff   : > { %4115 = vrot.lane.b32.xlu1 %v4044_v54, %s5316_s24  ;;  %v8493_v54 = vld [vmem:[#allocation50_spill] sm:$0xff] }
 0x600   : > { %4117 = vrot.lane.b32.xlu0 %v8483_v20, %s5316_s24  ;;  %vm8494_vm15 = vnez %v8493_v54  ;;  %v8504_v54 = vld [vmem:[#allocation63_spill] sm:$0xff] }
 0x601   : > { %v4050_v20 = vsel %vm8494_vm15, %v8492_v31, 0.0  ;;  %v8503_v31 = vld [vmem:[#allocation61_spill] sm:$0xff] }
 0x603   : > { %4119 = vrot.lane.b32.xlu1 %v4046_v26, %s5316_s24  ;;  %v8497_v26 = vld [vmem:[#allocation53_spill] sm:$0xff] }
 0x604   : > { %4121 = vrot.lane.b32.xlu0 %v8487_v7, %s5316_s24  ;;  %vm8498_vm7 = vnez %v8497_v26 }
 0x605   : > { %v4052_v7 = vsel %vm8498_vm7, %v8496_v48, 0.0  ;;  %v8507_v48 = vld [vmem:[#allocation64_spill] sm:$0xff] }
 0x607   : > { %4123 = vrot.lane.b32.xlu1 %v4048_v41, %s5316_s24  ;;  %v8501_v41 = vld [vmem:[#allocation56_spill] sm:$0xff] }
 0x608   : > { %4125 = vrot.lane.b32.xlu0 %v8491_v61, %s5316_s24  ;;  %vm8502_vm1 = vnez %v8501_v41 }
 0x609   : > { %v4054_v61 = vsel %vm8502_vm1, %v8500_v51, 0.0  ;;  %vm8511_vm1 = vcmask 1048320   ;;  %v8512_v51 = vld [vmem:[#allocation67_spill] sm:$0xff] }
 0x60a   : > { %vm8513_vm14 = vmmov %vm8511_vm1 }
 0x60b   : > { %4127 = vrot.lane.b32.xlu1 %v4050_v20, %s5316_s24  ;;  %v8505_v20 = vld [vmem:[#allocation59_spill] sm:$0xff] }
 0x60c   : > { %4129 = vrot.lane.b32.xlu0 %v8495_v27, %s5316_s24  ;;  %vm8506_vm15 = vnez %v8505_v20  ;;  %v8515_v20 = vld [vmem:[#allocation65_spill] sm:$0xff] }
 0x60d   : > { %v4056_v27 = vsel %vm8506_vm15, %v8504_v54, 0.0  ;;  %v8514_v54 = vld [vmem:[#allocation68_spill] sm:$0xff]  ;;  %vm8516_vm15 = vnez %v8515_v20 }
 0x60f   : > { %4131 = vrot.lane.b32.xlu1 %v4052_v7, %s5316_s24  ;;  %v8508_v7 = vld [vmem:[#allocation66_spill] sm:$0xff] }
 0x610   : > { %4133 = vrot.lane.b32.xlu0 %v8499_v11, %s5316_s24  ;;  %v8509_v11 = vld [vmem:[#allocation62_spill] sm:$0xff] }
 0x611   : > { %vm8510_vm7 = vnez %v8509_v11  ;;  %v8520_v11 = vld [vmem:[#allocation70_spill] sm:$0xff] }
 0x612   : > { %v4058_v41 = vsel %vm8510_vm7, %v8508_v7, 0.0  ;;  %vm8519_vm7 = vmmov %vm8517_vm13 }
 0x613   : > { %4135 = vrot.lane.b32.xlu1 %v4054_v61, %s5316_s24 }
 0x614   : > { %4137 = vrot.lane.b32.xlu0 %v8503_v31, %s5316_s24 }
 0x617   : > { %4139 = vrot.lane.b32.xlu1 %v4056_v27, %s5316_s24  ;;  %v4060_v27 = vsel %vm8516_vm15, %v8514_v54, 0.0  ;;  %v8525_v54 = vld [vmem:[#allocation73_spill] sm:$0xff]  ;;  %vm8526_vm15 = vmmov %vm8519_vm7 }
 0x618   : > { %4141 = vrot.lane.b32.xlu0 %v8507_v48, %s5316_s24  ;;  %v8518_v48 = vld [vmem:[#allocation69_spill] sm:$0xff]  ;;  %v4064_v20 = vsel %vm7429_vm2, %v8525_v54, 0.0 }
 0x61a   : > { %v3829_v26 = vpop.permute.xlu0 %3828 }
 0x61b   : > { %3896 = vst.msk [vmem:[#allocation2 + $0x2d0] sm:$0xff] %vm8511_vm1, %v3829_v26  ;;  %4143 = vrot.lane.b32.xlu1 %v4058_v41, %s5316_s24  ;;  %vm8521_vm1 = vnez %v8413_v46  ;;  %v8527_v46 = vld [vmem:[#allocation74_spill] sm:$0xff] }
 0x61c   : > { %4145 = vrot.lane.b32.xlu0 %v8512_v51, %s5316_s24  ;;  %v4062_v41 = vsel %vm8521_vm1, %v8520_v11, 0.0  ;;  %v8523_v51 = vld [vmem:[#allocation71_spill] sm:$0xff]  ;;  %vm8529_vm1 = vmmov %vm8519_vm7 }
 0x61d   : > { %v3831_v61 = vpop.permute.xlu1 %3830  ;;  %vm8530_vm2 = vmmov %vm8529_vm1 }
 0x61e   : > { %3897 = vst.msk [vmem:[#allocation2 + $0x2e8] sm:$0xff] %vm8513_vm14, %v3831_v61  ;;  %v3899_v31 = vpop.permute.xlu0 %3898  ;;  %vm8522_vm14 = vmmov %vm8519_vm7 }
 0x61f   : > { %3994 = vst.msk [vmem:[#allocation2 + $0x8] sm:$0xff] %vm8517_vm13, %v3899_v31  ;;  %4147 = vrot.lane.b32.xlu1 %v4060_v27, %s5316_s24  ;;  %vm8524_vm13 = vmmov %vm8519_vm7 }
 0x620   : > { %4149 = vrot.lane.b32.xlu0 %v8518_v48, %s5316_s24  ;;  %vm8535_vm12 = vmmov %vm8529_vm1 }
 0x621   : > { %v3901_v26 = vpop.permute.xlu1 %3900 }
 0x622   : > { %3995 = vst.msk [vmem:[#allocation2 + $0x20] sm:$0xff] %vm8519_vm7, %v3901_v26  ;;  %v3903_v7 = vpop.permute.xlu0 %3902 }
 0x623   : > { %3996 = vst.msk [vmem:[#allocation2 + $0x38] sm:$0xff] %vm8522_vm14, %v3903_v7  ;;  %4151 = vrot.lane.b32.xlu1 %v4062_v41, %s5316_s24  ;;  %v4066_v7 = vsel %vm7450_vm4, %v7479_v8, 0.0  ;;  %vm8531_vm14 = vmmov %vm8529_vm1 }
 0x624   : > { %4153 = vrot.lane.b32.xlu0 %v8523_v51, %s5316_s24 }
 0x625   : > { %v3905_v61 = vpop.permute.xlu1 %3904 }
 0x626   : > { %3997 = vst.msk [vmem:[#allocation2 + $0x50] sm:$0xff] %vm8524_vm13, %v3905_v61  ;;  %v3907_v31 = vpop.permute.xlu0 %3906  ;;  %vm8532_vm13 = vmmov %vm8529_vm1 }
 0x627   : > { %3998 = vst.msk [vmem:[#allocation2 + $0x68] sm:$0xff] %vm8526_vm15, %v3907_v31  ;;  %4155 = vrot.lane.b32.xlu1 %v4064_v20, %s5316_s24  ;;  %vm8533_vm15 = vmmov %vm8529_vm1 }
 0x628   : > { %4157 = vrot.lane.b32.xlu0 %v8527_v46, %s5316_s24 }
 0x629   : > { %v3909_v27 = vpop.permute.xlu1 %3908 }
 0x62a   : > { %3999 = vst.msk [vmem:[#allocation2 + $0x80] sm:$0xff] %vm8519_vm7, %v3909_v27  ;;  %v3911_v48 = vpop.permute.xlu0 %3910  ;;  %vm8534_vm7 = vmmov %vm8529_vm1 }
 0x62b   : > { %4000 = vst.msk [vmem:[#allocation2 + $0x98] sm:$0xff] %vm8529_vm1, %v3911_v48  ;;  %4159 = vrot.lane.b32.xlu1 %v4066_v7, %s5316_s24 }
 0x62d   : > { %v3913_v56 = vpop.permute.xlu1 %3912 }
 0x62e   : > { %4001 = vst.msk [vmem:[#allocation2 + $0xb0] sm:$0xff] %vm8530_vm2, %v3913_v56  ;;  %v3915_v11 = vpop.permute.xlu0 %3914  ;;  %vm8536_vm2 = vmmov %vm8529_vm1 }
 0x62f   : > { %4002 = vst.msk [vmem:[#allocation2 + $0xc8] sm:$0xff] %vm8531_vm14, %v3915_v11  ;;  %vm8537_vm14 = vmmov %vm8529_vm1 }
 0x631   : > { %v3917_v41 = vpop.permute.xlu1 %3916 }
 0x632   : > { %4003 = vst.msk [vmem:[#allocation2 + $0xe0] sm:$0xff] %vm8532_vm13, %v3917_v41  ;;  %v3919_v51 = vpop.permute.xlu0 %3918  ;;  %vm8538_vm13 = vmmov %vm8529_vm1 }
 0x633   : > { %4004 = vst.msk [vmem:[#allocation2 + $0xf8] sm:$0xff] %vm8533_vm15, %v3919_v51  ;;  %vm8539_vm15 = vmmov %vm8529_vm1 }
 0x635   : > { %v3921_v61 = vpop.permute.xlu1 %3920 }
 0x636   : > { %4005 = vst.msk [vmem:[#allocation2 + $0x110] sm:$0xff] %vm8534_vm7, %v3921_v61  ;;  %v3923_v8 = vpop.permute.xlu0 %3922  ;;  %vm8540_vm7 = vmmov %vm8529_vm1 }
 0x637   : > { %4006 = vst.msk [vmem:[#allocation2 + $0x128] sm:$0xff] %vm8535_vm12, %v3923_v8  ;;  %vm8541_vm12 = vmmov %vm8529_vm1 }
 0x639   : > { %v3925_v31 = vpop.permute.xlu1 %3924 }
 0x63a   : > { %4007 = vst.msk [vmem:[#allocation2 + $0x140] sm:$0xff] %vm8529_vm1, %v3925_v31  ;;  %v3927_v54 = vpop.permute.xlu0 %3926 }
 0x63b   : > { %4008 = vst.msk [vmem:[#allocation2 + $0x158] sm:$0xff] %vm8536_vm2, %v3927_v54  ;;  %vm8542_vm2 = vmmov %vm8529_vm1 }
 0x63d   : > { %v3929_v20 = vpop.permute.xlu1 %3928 }
 0x63e   : > { %4009 = vst.msk [vmem:[#allocation2 + $0x170] sm:$0xff] %vm8537_vm14, %v3929_v20  ;;  %v3931_v46 = vpop.permute.xlu0 %3930  ;;  %vm8543_vm14 = vmmov %vm8529_vm1 }
 0x63f   : > { %4010 = vst.msk [vmem:[#allocation2 + $0x188] sm:$0xff] %vm8538_vm13, %v3931_v46  ;;  %vm8544_vm13 = vmmov %vm8529_vm1 }
 0x641   : > { %v3933_v27 = vpop.permute.xlu1 %3932 }
 0x642   : > { %4011 = vst.msk [vmem:[#allocation2 + $0x1a0] sm:$0xff] %vm8539_vm15, %v3933_v27  ;;  %v3935_v48 = vpop.permute.xlu0 %3934  ;;  %vm8545_vm15 = vmmov %vm8529_vm1 }
 0x643   : > { %4012 = vst.msk [vmem:[#allocation2 + $0x1b8] sm:$0xff] %vm8540_vm7, %v3935_v48  ;;  %vm8546_vm7 = vmmov %vm8529_vm1 }
 0x645   : > { %v3937_v7 = vpop.permute.xlu1 %3936 }
 0x646   : > { %4013 = vst.msk [vmem:[#allocation2 + $0x1d0] sm:$0xff] %vm8541_vm12, %v3937_v7  ;;  %v3939_v56 = vpop.permute.xlu0 %3938  ;;  %vm8547_vm12 = vmmov %vm8529_vm1 }
 0x647   : > { %4014 = vst.msk [vmem:[#allocation2 + $0x1e8] sm:$0xff] %vm8529_vm1, %v3939_v56 }
 0x649   : > { %v3941_v11 = vpop.permute.xlu1 %3940 }
 0x64a   : > { %4015 = vst.msk [vmem:[#allocation2 + $0x200] sm:$0xff] %vm8542_vm2, %v3941_v11  ;;  %v3943_v41 = vpop.permute.xlu0 %3942  ;;  %vm8548_vm2 = vmmov %vm8529_vm1 }
 0x64b   : > { %4016 = vst.msk [vmem:[#allocation2 + $0x218] sm:$0xff] %vm8543_vm14, %v3943_v41  ;;  %vm8549_vm14 = vmmov %vm8529_vm1 }
 0x64d   : > { %v3945_v51 = vpop.permute.xlu1 %3944 }
 0x64e   : > { %4017 = vst.msk [vmem:[#allocation2 + $0x230] sm:$0xff] %vm8544_vm13, %v3945_v51  ;;  %v3947_v61 = vpop.permute.xlu0 %3946  ;;  %vm8550_vm13 = vmmov %vm8529_vm1 }
 0x64f   : > { %4018 = vst.msk [vmem:[#allocation2 + $0x248] sm:$0xff] %vm8545_vm15, %v3947_v61  ;;  %vm8551_vm15 = vmmov %vm8529_vm1  ;;  %v8554_v61 = vrot.slane %v6529_v1, 7 }
 0x651   : > { %v3949_v8 = vpop.permute.xlu1 %3948 }
 0x652   : > { %4019 = vst.msk [vmem:[#allocation2 + $0x260] sm:$0xff] %vm8546_vm7, %v3949_v8  ;;  %v3951_v31 = vpop.permute.xlu0 %3950  ;;  %vm8552_vm7 = vmmov %vm8529_vm1 }
 0x653   : > { %4020 = vst.msk [vmem:[#allocation2 + $0x278] sm:$0xff] %vm8547_vm12, %v3951_v31  ;;  %vm4599_vm12 = vcmask 260096  }
 0x655   : > { %v3953_v54 = vpop.permute.xlu1 %3952 }
 0x656   : > { %4021 = vst.msk [vmem:[#allocation2 + $0x290] sm:$0xff] %vm8529_vm1, %v3953_v54  ;;  %v3955_v20 = vpop.permute.xlu0 %3954  ;;  %vm8553_vm1 = vcmask 523520  }
 0x657   : > { %4022 = vst.msk [vmem:[#allocation2 + $0x2a8] sm:$0xff] %vm8548_vm2, %v3955_v20  ;;  %vm8555_vm2 = vmmov %vm8553_vm1  ;;  %v4235_v20 = vsel %vm6824_vm6, %v6864_v24, 0.0 }
 0x659   : > { %v3957_v46 = vpop.permute.xlu1 %3956 }
 0x65a   : > { %4023 = vst.msk [vmem:[#allocation2 + $0x2c0] sm:$0xff] %vm8549_vm14, %v3957_v46  ;;  %v3959_v27 = vpop.permute.xlu0 %3958  ;;  %v8600_v46 = vld [vmem:[#allocation28_spill] sm:$0xff] }
 0x65b   : > { %4024 = vst.msk [vmem:[#allocation2 + $0x2d8] sm:$0xff] %vm8550_vm13, %v3959_v27 }
 0x65d   : > { %v3961_v48 = vpop.permute.xlu1 %3960 }
 0x65e   : > { %4025 = vst.msk [vmem:[#allocation2 + $0x2f0] sm:$0xff] %vm8551_vm15, %v3961_v48  ;;  %v4032_v7 = vpop.permute.xlu0 %4031 }
 0x65f   : > { %4598 = vst.msk [vmem:[#allocation2 + $0x2b0] sm:$0xff] %vm8552_vm7, %v4032_v7  ;;  %4161 = vrot.lane.b32.xlu0 %v4032_v7, %s5316_s24  ;;  %v8601_v7 = vld [vmem:[#allocation32_spill] sm:$0xff] }
 0x661   : > { %v4034_v56 = vpop.permute.xlu1 %4033 }
 0x662   : > { %v4068_v11 = vsel %vm7471_vm0, %v4034_v56, 0.0  ;;  %v4569_v41 = vsel %vm7450_vm4, %v4034_v56, 0.0  ;;  %v4102_v51 = vpop.permute.xlu0 %4101  ;;  %vm8556_vm0 = vmmov %vm8553_vm1 }
 0x663   : > { %4600 = vst.msk [vmem:[#allocation2 + $0x2c8] sm:$0x7f] %vm4599_vm12, %v4569_v41  ;;  %4230 = vrot.lane.b32.xlu0 %v8554_v61, %s5314_s11  ;;  %4163 = vrot.lane.b32.xlu1 %v4068_v11, %s5316_s24  ;;  %vm8557_vm4 = vmmov %vm8556_vm0  ;;  %v8603_v11 = vld [vmem:[#allocation30_spill] sm:$0xff]  ;;  %v8606_v61 = vld [vmem:[#allocation4_spill] sm:$0xff] }
 0x664   : > { %4197 = vst.msk [vmem:[#allocation2 + $0x8] sm:$0xff] %vm8553_vm1, %v4102_v51  ;;  %vm8558_vm14 = vmmov %vm8556_vm0 }
 0x665   : > { %v4104_v8 = vpop.permute.xlu1 %4103  ;;  %vm8559_vm3 = vmmov %vm8556_vm0 }
 0x666   : > { %4198 = vst.msk [vmem:[#allocation2 + $0x20] sm:$0xff] %vm8555_vm2, %v4104_v8  ;;  %v4106_v31 = vpop.permute.xlu0 %4105  ;;  %vm8560_vm13 = vmmov %vm8556_vm0  ;;  %vm8570_vm2 = vnez %v8324_v55  ;;  %v8607_v8 = vld [vmem:[#allocation31_spill] sm:$0xff] }
 0x667   : > { %4199 = vst.msk [vmem:[#allocation2 + $0x38] sm:$0xff] %vm8556_vm0, %v4106_v31  ;;  %4297 = vrot.lane.b32.xlu0 %v6851_v52, %s5314_s11  ;;  %4295 = vrot.lane.b32.xlu1 %v4233_v45, %s5314_s11  ;;  %vm8561_vm6 = vmmov %vm8556_vm0 }
 0x668   : > { %vm8562_vm15 = vmmov %vm8556_vm0 }
 0x669   : > { %v4108_v26 = vpop.permute.xlu1 %4107  ;;  %vm8563_vm5 = vmmov %vm8556_vm0 }
 0x66a   : > { %4200 = vst.msk [vmem:[#allocation2 + $0x50] sm:$0xff] %vm8557_vm4, %v4108_v26  ;;  %v4110_v54 = vpop.permute.xlu0 %4109  ;;  %vm8564_vm7 = vmmov %vm8556_vm0  ;;  %vm8572_vm4 = vnez %v8326_v9  ;;  %v8610_v26 = vld [vmem:[#allocation5_spill] sm:$0xff] }
 0x66b   : > { %4201 = vst.msk [vmem:[#allocation2 + $0x68] sm:$0xff] %vm8558_vm14, %v4110_v54  ;;  %4301 = vrot.lane.b32.xlu0 %v6868_v37, %s5314_s11  ;;  %4299 = vrot.lane.b32.xlu1 %v4235_v20, %s5314_s11  ;;  %v4239_v37 = vsel %vm6856_vm8, %v6906_v33, 0.0  ;;  %vm8565_vm8 = vmmov %vm8556_vm0 }
 0x66c   : > { %vm8566_vm12 = vmmov %vm8556_vm0 }
 0x66d   : > { %v4112_v6 = vpop.permute.xlu1 %4111  ;;  %vm8568_vm1 = vmmov %vm8556_vm0 }
 0x66e   : > { %4202 = vst.msk [vmem:[#allocation2 + $0x80] sm:$0xff] %vm8559_vm3, %v4112_v6  ;;  %v4114_v52 = vpop.permute.xlu0 %4113  ;;  %vm8573_vm14 = vmmov %vm8556_vm0  ;;  %v8613_v6 = vld [vmem:[#allocation7_spill] sm:$0xff] }
 0x66f   : > { %4203 = vst.msk [vmem:[#allocation2 + $0x98] sm:$0xff] %vm8560_vm13, %v4114_v52  ;;  %4305 = vrot.lane.b32.xlu0 %v6889_v34, %s5314_s11  ;;  %4303 = vrot.lane.b32.xlu1 %v4237_v40, %s5314_s11  ;;  %v4241_v34 = vsel %vm6877_vm9, %v6927_v10, 0.0  ;;  %vm8567_vm9 = vmmov %vm8556_vm0  ;;  %vm8575_vm13 = vnez %v8328_v47 }
 0x670   : > { %vm8574_vm3 = vmmov %vm8556_vm0 }
 0x671   : > { %v4116_v21 = vpop.permute.xlu1 %4115 }
 0x672   : > { %4204 = vst.msk [vmem:[#allocation2 + $0xb0] sm:$0xff] %vm8561_vm6, %v4116_v21  ;;  %v4118_v24 = vpop.permute.xlu0 %4117  ;;  %vm8576_vm6 = vmmov %vm8556_vm0  ;;  %v8616_v21 = vld [vmem:[#allocation12_spill] sm:$0xff] }
 0x673   : > { %4205 = vst.msk [vmem:[#allocation2 + $0xc8] sm:$0xff] %vm8562_vm15, %v4118_v24  ;;  %4309 = vrot.lane.b32.xlu0 %v6910_v19, %s5314_s11  ;;  %4307 = vrot.lane.b32.xlu1 %v4239_v37, %s5314_s11  ;;  %v4243_v19 = vsel %vm6898_vm10, %v6948_v63, 0.0  ;;  %vm8569_vm10 = vmmov %vm8556_vm0 }
 0x674   : > { %vm8577_vm15 = vmmov %vm8556_vm0 }
 0x675   : > { %v4120_v13 = vpop.permute.xlu1 %4119 }
 0x676   : > { %4206 = vst.msk [vmem:[#allocation2 + $0xe0] sm:$0xff] %vm8563_vm5, %v4120_v13  ;;  %v4122_v15 = vpop.permute.xlu0 %4121  ;;  %vm8578_vm5 = vnez %v8330_v42  ;;  %v8619_v13 = vld [vmem:[#allocation13_spill] sm:$0xff] }
 0x677   : > { %4207 = vst.msk [vmem:[#allocation2 + $0xf8] sm:$0xff] %vm8564_vm7, %v4122_v15  ;;  %4313 = vrot.lane.b32.xlu0 %v6931_v43, %s5314_s11  ;;  %4311 = vrot.lane.b32.xlu1 %v4241_v34, %s5314_s11  ;;  %v4245_v43 = vsel %vm6919_vm11, %v6969_v38, 0.0  ;;  %vm8571_vm11 = vmmov %vm8556_vm0 }
 0x678   : > { %vm8579_vm7 = vmmov %vm8556_vm0 }
 0x679   : > { %v4124_v2 = vpop.permute.xlu1 %4123 }
 0x67a   : > { %4208 = vst.msk [vmem:[#allocation2 + $0x110] sm:$0xff] %vm8565_vm8, %v4124_v2  ;;  %v4126_v33 = vpop.permute.xlu0 %4125  ;;  %vm8580_vm8 = vmmov %vm8556_vm0  ;;  %v8622_v2 = vld [vmem:[#allocation11_spill] sm:$0xff] }
 0x67b   : > { %4209 = vst.msk [vmem:[#allocation2 + $0x128] sm:$0xff] %vm8566_vm12, %v4126_v33  ;;  %4317 = vrot.lane.b32.xlu0 %v6952_v29, %s5314_s11  ;;  %4315 = vrot.lane.b32.xlu1 %v4243_v19, %s5314_s11  ;;  %v4247_v29 = vsel %vm8570_vm2, %v6990_v44, 0.0  ;;  %vm8581_vm12 = vnez %v8332_v17  ;;  %vm8585_vm2 = vmmov %vm8556_vm0 }
 0x67d   : > { %v4128_v59 = vpop.permute.xlu1 %4127 }
 0x67e   : > { %4210 = vst.msk [vmem:[#allocation2 + $0x140] sm:$0xff] %vm8567_vm9, %v4128_v59  ;;  %v4130_v10 = vpop.permute.xlu0 %4129  ;;  %vm8582_vm9 = vmmov %vm8556_vm0  ;;  %v8625_v59 = vld [vmem:[#allocation15_spill] sm:$0xff] }
 0x67f   : > { %4211 = vst.msk [vmem:[#allocation2 + $0x158] sm:$0xff] %vm8568_vm1, %v4130_v10  ;;  %4321 = vrot.lane.b32.xlu0 %v6973_v36, %s5314_s11  ;;  %4319 = vrot.lane.b32.xlu1 %v4245_v43, %s5314_s11  ;;  %v4249_v36 = vsel %vm8572_vm4, %v7011_v32, 0.0  ;;  %vm8583_vm1 = vmmov %vm8556_vm0 }
 0x680   : > { %vm8587_vm4 = vmmov %vm8556_vm0 }
 0x681   : > { %v4132_v63 = vpop.permute.xlu1 %4131 }
 0x682   : > { %4212 = vst.msk [vmem:[#allocation2 + $0x170] sm:$0xff] %vm8569_vm10, %v4132_v63  ;;  %v4134_v60 = vpop.permute.xlu0 %4133  ;;  %vm8584_vm10 = vnez %v8334_v18  ;;  %v8628_v63 = vld [vmem:[#allocation17_spill] sm:$0xff] }
 0x683   : > { %4213 = vst.msk [vmem:[#allocation2 + $0x188] sm:$0xff] %vm8556_vm0, %v4134_v60  ;;  %4325 = vrot.lane.b32.xlu0 %v6994_v28, %s5314_s11  ;;  %4323 = vrot.lane.b32.xlu1 %v4247_v29, %s5314_s11  ;;  %v4251_v28 = vsel %vm8575_vm13, %v7032_v4, 0.0  ;;  %vm8599_vm13 = vmmov %vm8556_vm0 }
 0x685   : > { %v4136_v38 = vpop.permute.xlu1 %4135 }
 0x686   : > { %4214 = vst.msk [vmem:[#allocation2 + $0x1a0] sm:$0xff] %vm8571_vm11, %v4136_v38  ;;  %v4138_v39 = vpop.permute.xlu0 %4137  ;;  %vm8586_vm11 = vnez %v8336_v0  ;;  %v8591_v0 = vld [vmem:[#allocation10_spill] sm:$0xff]  ;;  %v8631_v38 = vld [vmem:[#allocation19_spill] sm:$0xff] }
 0x687   : > { %4215 = vst.msk [vmem:[#allocation2 + $0x1b8] sm:$0xff] %vm8573_vm14, %v4138_v39  ;;  %4329 = vrot.lane.b32.xlu0 %v7015_v57, %s5314_s11  ;;  %4327 = vrot.lane.b32.xlu1 %v4249_v36, %s5314_s11  ;;  %v4253_v57 = vsel %vm8578_vm5, %v7053_v35, 0.0  ;;  %vm8588_vm14 = vmmov %vm8556_vm0  ;;  %vm8604_vm5 = vcmask 785920  }
 0x689   : > { %v4140_v44 = vpop.permute.xlu1 %4139 }
 0x68a   : > { %4216 = vst.msk [vmem:[#allocation2 + $0x1d0] sm:$0xff] %vm8574_vm3, %v4140_v44  ;;  %v4142_v55 = vpop.permute.xlu0 %4141  ;;  %vm8589_vm3 = vnez %v8338_v58  ;;  %v8592_v58 = vld [vmem:[#allocation14_spill] sm:$0xff]  ;;  %v8634_v44 = vld [vmem:[#allocation21_spill] sm:$0xff] }
 0x68b   : > { %4217 = vst.msk [vmem:[#allocation2 + $0x1e8] sm:$0xff] %vm8576_vm6, %v4142_v55  ;;  %4333 = vrot.lane.b32.xlu0 %v7036_v23, %s5314_s11  ;;  %4331 = vrot.lane.b32.xlu1 %v4251_v28, %s5314_s11  ;;  %v4255_v23 = vsel %vm8581_vm12, %v7074_v3, 0.0  ;;  %v4261_v18 = vsel %vm8589_vm3, %v7618_v49, 0.0  ;;  %v8596_v49 = vld [vmem:[#allocation22_spill] sm:$0xff]  ;;  %vm4228_vm6 = vcmask 522496   ;;  %vm8609_vm12 = vmmov %vm8604_vm5 }
 0x68d   : > { %v4144_v32 = vpop.permute.xlu1 %4143 }
 0x68e   : > { %4218 = vst.msk [vmem:[#allocation2 + $0x200] sm:$0xff] %vm8577_vm15, %v4144_v32  ;;  %v4146_v9 = vpop.permute.xlu0 %4145  ;;  %vm8602_vm15 = vnez %v8601_v7  ;;  %v8637_v32 = vld [vmem:[#allocation23_spill] sm:$0xff] }
 0x68f   : > { %4219 = vst.msk [vmem:[#allocation2 + $0x218] sm:$0xff] %vm8579_vm7, %v4146_v9  ;;  %4337 = vrot.lane.b32.xlu0 %v7057_v30, %s5314_s11  ;;  %4335 = vrot.lane.b32.xlu1 %v4253_v57, %s5314_s11  ;;  %v4257_v30 = vsel %vm8584_vm10, %v7094_v50, 0.0  ;;  %vm8605_vm7 = vmmov %vm8604_vm5 }
 0x691   : > { %v4148_v4 = vpop.permute.xlu1 %4147 }
 0x692   : > { %4220 = vst.msk [vmem:[#allocation2 + $0x230] sm:$0xff] %vm8580_vm8, %v4148_v4  ;;  %v4150_v47 = vpop.permute.xlu0 %4149  ;;  %vm8608_vm8 = vmmov %vm8604_vm5  ;;  %v8640_v4 = vld [vmem:[#allocation25_spill] sm:$0xff] }
 0x693   : > { %4221 = vst.msk [vmem:[#allocation2 + $0x248] sm:$0xff] %vm8582_vm9, %v4150_v47  ;;  %4341 = vrot.lane.b32.xlu0 %v7078_v25, %s5314_s11  ;;  %4339 = vrot.lane.b32.xlu1 %v4255_v23, %s5314_s11  ;;  %v4259_v25 = vsel %vm8586_vm11, %v7114_v5, 0.0  ;;  %v8595_v5 = vld [vmem:[#allocation20_spill] sm:$0xff]  ;;  %vm8611_vm9 = vmmov %vm8604_vm5 }
 0x695   : > { %v4152_v35 = vpop.permute.xlu1 %4151 }
 0x696   : > { %4222 = vst.msk [vmem:[#allocation2 + $0x260] sm:$0xff] %vm8583_vm1, %v4152_v35  ;;  %v4154_v42 = vpop.permute.xlu0 %4153  ;;  %vm8612_vm1 = vmmov %vm8604_vm5  ;;  %v8642_v35 = vld [vmem:[#allocation27_spill] sm:$0xff] }
 0x697   : > { %4223 = vst.msk [vmem:[#allocation2 + $0x278] sm:$0xff] %vm8585_vm2, %v4154_v42  ;;  %4345 = vrot.lane.b32.xlu0 %v7098_v12, %s5314_s11  ;;  %4343 = vrot.lane.b32.xlu1 %v4257_v30, %s5314_s11  ;;  %v8593_v12 = vld [vmem:[#allocation16_spill] sm:$0xff]  ;;  %vm8614_vm10 = vmmov %vm8612_vm1 }
 0x698   : > { %vm8615_vm2 = vmmov %vm8612_vm1 }
 0x699   : > { %v4156_v3 = vpop.permute.xlu1 %4155 }
 0x69a   : > { %4224 = vst.msk [vmem:[#allocation2 + $0x290] sm:$0xff] %vm8556_vm0, %v4156_v3  ;;  %v4158_v17 = vpop.permute.xlu0 %4157  ;;  %vm8617_vm0 = vmmov %vm8612_vm1  ;;  %v8645_v3 = vld [vmem:[#allocation29_spill] sm:$0xff] }
 0x69b   : > { %4225 = vst.msk [vmem:[#allocation2 + $0x2a8] sm:$0xff] %vm8587_vm4, %v4158_v17  ;;  %4349 = vrot.lane.b32.xlu0 %v7118_v62, %s5314_s11  ;;  %4347 = vrot.lane.b32.xlu1 %v4259_v25, %s5314_s11  ;;  %v8590_v62 = vld [vmem:[#allocation9_spill] sm:$0xff]  ;;  %vm8618_vm11 = vmmov %vm8617_vm0 }
 0x69c   : > { %vm8620_vm4 = vmmov %vm8617_vm0 }
 0x69d   : > { %v4160_v50 = vpop.permute.xlu1 %4159  ;;  %vm8623_vm3 = vmmov %vm8617_vm0 }
 0x69e   : > { %4226 = vst.msk [vmem:[#allocation2 + $0x2c0] sm:$0xff] %vm8588_vm14, %v4160_v50  ;;  %vm8621_vm14 = vmmov %vm8617_vm0 }
 0x69f   : > { %4353 = vrot.lane.b32.xlu0 %v7625_v14, %s5314_s11  ;;  %4351 = vrot.lane.b32.xlu1 %v4261_v18, %s5314_s11  ;;  %v8597_v14 = vld [vmem:[#allocation24_spill] sm:$0xff] }
 0x6a3   : > { %4420 = vrot.lane.b32.xlu0 %v6426_v22, %s5316_s24  ;;  %v8594_v22 = vld [vmem:[#allocation18_spill] sm:$0xff] }
 0x6a7   : > { %4424 = vrot.lane.b32.xlu0 %v8440_v53, %s5316_s24  ;;  %v8598_v53 = vld [vmem:[#allocation26_spill] sm:$0xff] }
 0x6ab   : > { %4428 = vrot.lane.b32.xlu0 %v8442_v16, %s5316_s24 }
 0x6af   : > { %4432 = vrot.lane.b32.xlu0 %v8590_v62, %s5316_s24 }
 0x6b3   : > { %4436 = vrot.lane.b32.xlu0 %v8591_v0, %s5316_s24 }
 0x6b7   : > { %4440 = vrot.lane.b32.xlu0 %v8592_v58, %s5316_s24 }
 0x6bb   : > { %4444 = vrot.lane.b32.xlu0 %v8593_v12, %s5316_s24 }
 0x6bf   : > { %4448 = vrot.lane.b32.xlu0 %v8594_v22, %s5316_s24 }
 0x6c3   : > { %4452 = vrot.lane.b32.xlu0 %v8595_v5, %s5316_s24 }
 0x6c7   : > { %4456 = vrot.lane.b32.xlu0 %v8596_v49, %s5316_s24 }
 0x6cb   : > { %4460 = vrot.lane.b32.xlu0 %v8597_v14, %s5316_s24 }
 0x6cf   : > { %4464 = vrot.lane.b32.xlu0 %v8598_v53, %s5316_s24 }
 0x6d1   : > { %v4162_v16 = vpop.permute.xlu0 %4161 }
 0x6d2   : > { %4227 = vst.msk [vmem:[#allocation2 + $0x2d8] sm:$0xff] %vm8599_vm13, %v4162_v16  ;;  %vm8624_vm13 = vmmov %vm8617_vm0 }
 0x6d3   : > { %4468 = vrot.lane.b32.xlu0 %v8600_v46, %s5316_s24 }
 0x6d5   : > { %v4231_v27 = vpop.permute.xlu0 %4230  ;;  %v4164_v48 = vpop.permute.xlu1 %4163 }
 0x6d6   : > { %v4263_v56 = vsel %vm8602_vm15, %v4231_v27, 0.0  ;;  %4229 = vst.msk [vmem:[#allocation2 + $0x2f0] sm:$0x7f] %vm4228_vm6, %v4164_v48  ;;  %vm8626_vm6 = vmmov %vm8617_vm0 }
 0x6d7   : > { %4355 = vrot.lane.b32.xlu1 %v4263_v56, %s5314_s11  ;;  %4472 = vrot.lane.b32.xlu0 %v8603_v11, %s5316_s24  ;;  %vm8627_vm15 = vmmov %vm8617_vm0 }
 0x6d9   : > { %v4298_v41 = vpop.permute.xlu0 %4297  ;;  %v4296_v51 = vpop.permute.xlu1 %4295 }
 0x6da   : > { %4389 = vst.msk [vmem:[#allocation2 + $0x20] sm:$0xff] %vm8604_vm5, %v4298_v41  ;;  %vm8629_vm5 = vmmov %vm8617_vm0 }
 0x6db   : > { %4388 = vst.msk [vmem:[#allocation2 + $0x8] sm:$0xff] %vm8605_vm7, %v4296_v51  ;;  %4422 = vrot.lane.b32.xlu1 %v8606_v61, %s5316_s24  ;;  %4476 = vrot.lane.b32.xlu0 %v8607_v8, %s5316_s24  ;;  %vm8630_vm7 = vmmov %vm8617_vm0 }
 0x6dd   : > { %v4302_v31 = vpop.permute.xlu0 %4301  ;;  %v4300_v45 = vpop.permute.xlu1 %4299 }
 0x6de   : > { %4391 = vst.msk [vmem:[#allocation2 + $0x50] sm:$0xff] %vm8608_vm8, %v4302_v31  ;;  %vm8632_vm8 = vmmov %vm8617_vm0 }
 0x6df   : > { %4390 = vst.msk [vmem:[#allocation2 + $0x38] sm:$0xff] %vm8609_vm12, %v4300_v45  ;;  %4426 = vrot.lane.b32.xlu1 %v8610_v26, %s5316_s24  ;;  %vm8633_vm12 = vmmov %vm8617_vm0 }
 0x6e1   : > { %v4306_v54 = vpop.permute.xlu0 %4305  ;;  %v4304_v20 = vpop.permute.xlu1 %4303 }
 0x6e2   : > { %4393 = vst.msk [vmem:[#allocation2 + $0x80] sm:$0xff] %vm8611_vm9, %v4306_v54  ;;  %vm8635_vm9 = vmmov %vm8617_vm0 }
 0x6e3   : > { %4392 = vst.msk [vmem:[#allocation2 + $0x68] sm:$0xff] %vm8612_vm1, %v4304_v20  ;;  %4430 = vrot.lane.b32.xlu1 %v8613_v6, %s5316_s24  ;;  %vm8636_vm1 = vmmov %vm8617_vm0 }
 0x6e5   : > { %v4310_v52 = vpop.permute.xlu0 %4309  ;;  %v4308_v40 = vpop.permute.xlu1 %4307 }
 0x6e6   : > { %4395 = vst.msk [vmem:[#allocation2 + $0xb0] sm:$0xff] %vm8614_vm10, %v4310_v52  ;;  %vm8638_vm10 = vmmov %vm8617_vm0 }
 0x6e7   : > { %4394 = vst.msk [vmem:[#allocation2 + $0x98] sm:$0xff] %vm8615_vm2, %v4308_v40  ;;  %4434 = vrot.lane.b32.xlu1 %v8616_v21, %s5316_s24  ;;  %vm8639_vm2 = vmmov %vm8617_vm0 }
 0x6e9   : > { %v4314_v24 = vpop.permute.xlu0 %4313  ;;  %v4312_v37 = vpop.permute.xlu1 %4311 }
 0x6ea   : > { %4397 = vst.msk [vmem:[#allocation2 + $0xe0] sm:$0xff] %vm8617_vm0, %v4314_v24 }
 0x6eb   : > { %4396 = vst.msk [vmem:[#allocation2 + $0xc8] sm:$0xff] %vm8618_vm11, %v4312_v37  ;;  %4438 = vrot.lane.b32.xlu1 %v8619_v13, %s5316_s24  ;;  %vm8641_vm11 = vmmov %vm8617_vm0 }
 0x6ed   : > { %v4318_v15 = vpop.permute.xlu0 %4317  ;;  %v4316_v34 = vpop.permute.xlu1 %4315 }
 0x6ee   : > { %4399 = vst.msk [vmem:[#allocation2 + $0x110] sm:$0xff] %vm8620_vm4, %v4318_v15  ;;  %vm8643_vm4 = vmmov %vm8617_vm0 }
 0x6ef   : > { %4398 = vst.msk [vmem:[#allocation2 + $0xf8] sm:$0xff] %vm8621_vm14, %v4316_v34  ;;  %4442 = vrot.lane.b32.xlu1 %v8622_v2, %s5316_s24  ;;  %vm8644_vm14 = vmmov %vm8617_vm0 }
 0x6f1   : > { %v4322_v33 = vpop.permute.xlu0 %4321  ;;  %v4320_v19 = vpop.permute.xlu1 %4319 }
 0x6f2   : > { %4401 = vst.msk [vmem:[#allocation2 + $0x140] sm:$0xff] %vm8623_vm3, %v4322_v33  ;;  %vm8646_vm3 = vmmov %vm8617_vm0 }
 0x6f3   : > { %4400 = vst.msk [vmem:[#allocation2 + $0x128] sm:$0xff] %vm8624_vm13, %v4320_v19  ;;  %4446 = vrot.lane.b32.xlu1 %v8625_v59, %s5316_s24  ;;  %vm8647_vm13 = vmmov %vm8617_vm0 }
 0x6f5   : > { %v4326_v10 = vpop.permute.xlu0 %4325  ;;  %v4324_v43 = vpop.permute.xlu1 %4323 }
 0x6f6   : > { %4403 = vst.msk [vmem:[#allocation2 + $0x170] sm:$0xff] %vm8626_vm6, %v4326_v10  ;;  %vm8648_vm6 = vcmask 1048320  }
 0x6f7   : > { %4402 = vst.msk [vmem:[#allocation2 + $0x158] sm:$0xff] %vm8627_vm15, %v4324_v43  ;;  %4450 = vrot.lane.b32.xlu1 %v8628_v63, %s5316_s24  ;;  %vm8649_vm15 = vmmov %vm8648_vm6 }
 0x6f9   : > { %v4330_v60 = vpop.permute.xlu0 %4329  ;;  %v4328_v29 = vpop.permute.xlu1 %4327 }
 0x6fa   : > { %4405 = vst.msk [vmem:[#allocation2 + $0x1a0] sm:$0xff] %vm8629_vm5, %v4330_v60  ;;  %vm8650_vm5 = vmmov %vm8648_vm6 }
 0x6fb   : > { %4404 = vst.msk [vmem:[#allocation2 + $0x188] sm:$0xff] %vm8630_vm7, %v4328_v29  ;;  %4454 = vrot.lane.b32.xlu1 %v8631_v38, %s5316_s24  ;;  %vm8651_vm7 = vmmov %vm8650_vm5 }
 0x6fd   : > { %v4334_v39 = vpop.permute.xlu0 %4333  ;;  %v4332_v36 = vpop.permute.xlu1 %4331 }
 0x6fe   : > { %4407 = vst.msk [vmem:[#allocation2 + $0x1d0] sm:$0xff] %vm8632_vm8, %v4334_v39  ;;  %vm8652_vm8 = vmmov %vm8650_vm5 }
 0x6ff   : > { %4406 = vst.msk [vmem:[#allocation2 + $0x1b8] sm:$0xff] %vm8633_vm12, %v4332_v36  ;;  %4458 = vrot.lane.b32.xlu1 %v8634_v44, %s5316_s24  ;;  %vm8653_vm12 = vmmov %vm8650_vm5 }
 0x701   : > { %v4338_v55 = vpop.permute.xlu0 %4337  ;;  %v4336_v28 = vpop.permute.xlu1 %4335 }
 0x702   : > { %4409 = vst.msk [vmem:[#allocation2 + $0x200] sm:$0xff] %vm8635_vm9, %v4338_v55  ;;  %vm8654_vm9 = vmmov %vm8650_vm5 }
 0x703   : > { %4408 = vst.msk [vmem:[#allocation2 + $0x1e8] sm:$0xff] %vm8636_vm1, %v4336_v28  ;;  %4462 = vrot.lane.b32.xlu1 %v8637_v32, %s5316_s24  ;;  %vm8655_vm1 = vmmov %vm8650_vm5 }
 0x705   : > { %v4342_v9 = vpop.permute.xlu0 %4341  ;;  %v4340_v57 = vpop.permute.xlu1 %4339 }
 0x706   : > { %4411 = vst.msk [vmem:[#allocation2 + $0x230] sm:$0xff] %vm8638_vm10, %v4342_v9  ;;  %vm8656_vm10 = vmmov %vm8655_vm1 }
 0x707   : > { %4410 = vst.msk [vmem:[#allocation2 + $0x218] sm:$0xff] %vm8639_vm2, %v4340_v57  ;;  %4466 = vrot.lane.b32.xlu1 %v8640_v4, %s5316_s24  ;;  %vm8657_vm2 = vmmov %vm8655_vm1 }
 0x709   : > { %v4346_v47 = vpop.permute.xlu0 %4345  ;;  %v4344_v23 = vpop.permute.xlu1 %4343 }
 0x70a   : > { %4413 = vst.msk [vmem:[#allocation2 + $0x260] sm:$0xff] %vm8617_vm0, %v4346_v47  ;;  %vm8658_vm0 = vmmov %vm8655_vm1 }
 0x70b   : > { %4412 = vst.msk [vmem:[#allocation2 + $0x248] sm:$0xff] %vm8641_vm11, %v4344_v23  ;;  %4470 = vrot.lane.b32.xlu1 %v8642_v35, %s5316_s24  ;;  %vm8659_vm11 = vmmov %vm8658_vm0 }
 0x70d   : > { %v4350_v42 = vpop.permute.xlu0 %4349  ;;  %v4348_v30 = vpop.permute.xlu1 %4347 }
 0x70e   : > { %4415 = vst.msk [vmem:[#allocation2 + $0x290] sm:$0xff] %vm8643_vm4, %v4350_v42  ;;  %vm8660_vm4 = vmmov %vm8658_vm0 }
 0x70f   : > { %4414 = vst.msk [vmem:[#allocation2 + $0x278] sm:$0xff] %vm8644_vm14, %v4348_v30  ;;  %4474 = vrot.lane.b32.xlu1 %v8645_v3, %s5316_s24  ;;  %vm4418_vm14 = vcmask 778752  }
 0x711   : > { %v4354_v17 = vpop.permute.xlu0 %4353  ;;  %v4352_v25 = vpop.permute.xlu1 %4351 }
 0x712   : > { %4417 = vst.msk [vmem:[#allocation2 + $0x2c0] sm:$0xff] %vm8646_vm3, %v4354_v17  ;;  %vm8661_vm3 = vmmov %vm8658_vm0 }
 0x713   : > { %4416 = vst.msk [vmem:[#allocation2 + $0x2a8] sm:$0xff] %vm8647_vm13, %v4352_v25  ;;  %4478 = vrot.lane.b32.xlu1 %v6529_v1, %s5316_s24  ;;  %vm8662_vm13 = vmmov %vm8658_vm0 }
 0x715   : > { %v4421_v50 = vpop.permute.xlu0 %4420 }
 0x716   : > { %4510 = vst.msk [vmem:[#allocation2 + $0x8] sm:$0xff] %vm8648_vm6, %v4421_v50  ;;  %vm8663_vm6 = vmmov %vm8658_vm0 }
 0x719   : > { %v4425_v18 = vpop.permute.xlu0 %4424 }
 0x71a   : > { %4512 = vst.msk [vmem:[#allocation2 + $0x38] sm:$0xff] %vm8649_vm15, %v4425_v18  ;;  %vm8664_vm15 = vmmov %vm8658_vm0 }
 0x71d   : > { %v4429_v62 = vpop.permute.xlu0 %4428 }
 0x71e   : > { %4514 = vst.msk [vmem:[#allocation2 + $0x68] sm:$0xff] %vm8650_vm5, %v4429_v62  ;;  %vm8665_vm5 = vmmov %vm8658_vm0 }
 0x721   : > { %v4433_v0 = vpop.permute.xlu0 %4432 }
 0x722   : > { %4516 = vst.msk [vmem:[#allocation2 + $0x98] sm:$0xff] %vm8651_vm7, %v4433_v0  ;;  %vm8666_vm7 = vmmov %vm8658_vm0 }
 0x725   : > { %v4437_v58 = vpop.permute.xlu0 %4436 }
 0x726   : > { %4518 = vst.msk [vmem:[#allocation2 + $0xc8] sm:$0xff] %vm8652_vm8, %v4437_v58  ;;  %vm8667_vm8 = vmmov %vm8658_vm0 }
 0x729   : > { %v4441_v12 = vpop.permute.xlu0 %4440 }
 0x72a   : > { %4520 = vst.msk [vmem:[#allocation2 + $0xf8] sm:$0xff] %vm8653_vm12, %v4441_v12  ;;  %vm8668_vm12 = vmmov %vm8658_vm0 }
 0x72d   : > { %v4445_v22 = vpop.permute.xlu0 %4444 }
 0x72e   : > { %4522 = vst.msk [vmem:[#allocation2 + $0x128] sm:$0xff] %vm8654_vm9, %v4445_v22  ;;  %vm8669_vm9 = vmmov %vm8658_vm0 }
 0x731   : > { %v4449_v1 = vpop.permute.xlu0 %4448 }
 0x732   : > { %4524 = vst.msk [vmem:[#allocation2 + $0x158] sm:$0xff] %vm8655_vm1, %v4449_v1  ;;  %vm8670_vm1 = vmmov %vm8658_vm0 }
 0x735   : > { %v4453_v5 = vpop.permute.xlu0 %4452 }
 0x736   : > { %4526 = vst.msk [vmem:[#allocation2 + $0x188] sm:$0xff] %vm8656_vm10, %v4453_v5  ;;  %vm8671_vm10 = vmmov %vm8658_vm0 }
 0x739   : > { %v4457_v49 = vpop.permute.xlu0 %4456 }
 0x73a   : > { %4528 = vst.msk [vmem:[#allocation2 + $0x1b8] sm:$0xff] %vm8657_vm2, %v4457_v49  ;;  %vm8672_vm2 = vmmov %vm8658_vm0 }
 0x73d   : > { %v4461_v14 = vpop.permute.xlu0 %4460 }
 0x73e   : > { %4530 = vst.msk [vmem:[#allocation2 + $0x1e8] sm:$0xff] %vm8658_vm0, %v4461_v14 }
 0x741   : > { %v4465_v53 = vpop.permute.xlu0 %4464 }
 0x742   : > { %4532 = vst.msk [vmem:[#allocation2 + $0x218] sm:$0xff] %vm8659_vm11, %v4465_v53  ;;  %vm8673_vm11 = vmmov %vm8658_vm0 }
 0x745   : > { %v4469_v16 = vpop.permute.xlu0 %4468 }
 0x746   : > { %4534 = vst.msk [vmem:[#allocation2 + $0x248] sm:$0xff] %vm8660_vm4, %v4469_v16  ;;  %vm8674_vm4 = vmmov %vm8658_vm0 }
 0x749   : > { %v4356_v46 = vpop.permute.xlu1 %4355  ;;  %v4473_v27 = vpop.permute.xlu0 %4472 }
 0x74a   : > { %4419 = vst.msk [vmem:[#allocation2 + $0x2d8] sm:$0x1] %vm4418_vm14, %v4356_v46  ;;  %vm8675_vm14 = vmmov %vm8658_vm0 }
 0x74b   : > { %4536 = vst.msk [vmem:[#allocation2 + $0x278] sm:$0xff] %vm8661_vm3, %v4473_v27  ;;  %vm8676_vm3 = vmmov %vm8658_vm0 }
 0x74d   : > { %v4423_v48 = vpop.permute.xlu1 %4422  ;;  %v4477_v7 = vpop.permute.xlu0 %4476 }
 0x74e   : > { %4511 = vst.msk [vmem:[#allocation2 + $0x20] sm:$0xff] %vm8662_vm13, %v4423_v48 }
 0x74f   : > { %4538 = vst.msk [vmem:[#allocation2 + $0x2a8] sm:$0xff] %vm8663_vm6, %v4477_v7 }
 0x751   : > { %v4427_v56 = vpop.permute.xlu1 %4426 }
 0x752   : > { %4513 = vst.msk [vmem:[#allocation2 + $0x50] sm:$0xff] %vm8664_vm15, %v4427_v56 }
 0x755   : > { %v4431_v11 = vpop.permute.xlu1 %4430 }
 0x756   : > { %4515 = vst.msk [vmem:[#allocation2 + $0x80] sm:$0xff] %vm8665_vm5, %v4431_v11 }
 0x759   : > { %v4435_v41 = vpop.permute.xlu1 %4434 }
 0x75a   : > { %4517 = vst.msk [vmem:[#allocation2 + $0xb0] sm:$0xff] %vm8666_vm7, %v4435_v41 }
 0x75d   : > { %v4439_v51 = vpop.permute.xlu1 %4438 }
 0x75e   : > { %4519 = vst.msk [vmem:[#allocation2 + $0xe0] sm:$0xff] %vm8667_vm8, %v4439_v51 }
 0x761   : > { %v4443_v61 = vpop.permute.xlu1 %4442 }
 0x762   : > { %4521 = vst.msk [vmem:[#allocation2 + $0x110] sm:$0xff] %vm8668_vm12, %v4443_v61 }
 0x765   : > { %v4447_v8 = vpop.permute.xlu1 %4446 }
 0x766   : > { %4523 = vst.msk [vmem:[#allocation2 + $0x140] sm:$0xff] %vm8669_vm9, %v4447_v8 }
 0x769   : > { %v4451_v31 = vpop.permute.xlu1 %4450 }
 0x76a   : > { %4525 = vst.msk [vmem:[#allocation2 + $0x170] sm:$0xff] %vm8670_vm1, %v4451_v31 }
 0x76d   : > { %v4455_v45 = vpop.permute.xlu1 %4454 }
 0x76e   : > { %4527 = vst.msk [vmem:[#allocation2 + $0x1a0] sm:$0xff] %vm8671_vm10, %v4455_v45 }
 0x771   : > { %v4459_v26 = vpop.permute.xlu1 %4458 }
 0x772   : > { %4529 = vst.msk [vmem:[#allocation2 + $0x1d0] sm:$0xff] %vm8672_vm2, %v4459_v26 }
 0x775   : > { %v4463_v54 = vpop.permute.xlu1 %4462 }
 0x776   : > { %4531 = vst.msk [vmem:[#allocation2 + $0x200] sm:$0xff] %vm8658_vm0, %v4463_v54 }
 0x779   : > { %v4467_v20 = vpop.permute.xlu1 %4466 }
 0x77a   : > { %4533 = vst.msk [vmem:[#allocation2 + $0x230] sm:$0xff] %vm8673_vm11, %v4467_v20 }
 0x77d   : > { %v4471_v6 = vpop.permute.xlu1 %4470 }
 0x77e   : > { %4535 = vst.msk [vmem:[#allocation2 + $0x260] sm:$0xff] %vm8674_vm4, %v4471_v6 }
 0x781   : > { %v4475_v52 = vpop.permute.xlu1 %4474 }
 0x782   : > { %4537 = vst.msk [vmem:[#allocation2 + $0x290] sm:$0xff] %vm8675_vm14, %v4475_v52 }
 0x785   : > { %v4479_v40 = vpop.permute.xlu1 %4478 }
 0x786   : > { %4539 = vst.msk [vmem:[#allocation2 + $0x2c0] sm:$0xff] %vm8676_vm3, %v4479_v40 }
 0x787 PF: > { %s13_s16 = sadd.s32 1, %s5307_s16   ;;  %s8677_s12 = smov %s5299_s14 }
 0x788   : > { %p10_p10 = scmp.ge.s32.totalorder %s13_s16, 18   ;;  %s8678_s13 = smov %s5303_s15 }
 0x789   : > { %s8679_s14 = smov %s8682_s17  ;;  %s8680_s15 = smov %s8686_s18 }
 0x78a   :  { %12 = sbr.rel (!%p10_p10) target bundleno = 3 (0x3), region = 74 }

</bundles_post_ra>
